<compile_context>
chip_gen: v7x
topology: tpu7x:2x2x1
jax: 0.10.0
libtpu: 0.0.40
codegen_flags: <defaults>
</compile_context>

<pallas_src>
import functools

import jax
import jax.numpy as jnp
from jax.experimental import pallas as pl
from jax.experimental.pallas import tpu as pltpu


def _round_up(x, m):
    return ((x + m - 1) // m) * m


# ----------------------------------------------------------------------------
# Single fused Pallas kernel: one grid step == one image of the batch.
# ----------------------------------------------------------------------------
def _fused_forward_kernel(xp_ref, w1_ref, sh1_ref, w2_ref, sh2_ref,
                          wfc_ref, bfc_ref, out_ref, c1pad_ref, *, H, W):
    HW = H * W
    Cp = xp_ref.shape[-1]
    Wp = w1_ref.shape[-1]

    # ---- conv1: 3x3 SAME (BN scale folded into weights) + shift + ReLU -----
    # Input arrives as bf16 (half the HBM DMA); up-cast ONCE so the slicing /
    # reshape path below is identical to the verified f32 layout path.
    x_full = xp_ref[0].astype(jnp.float32)               # (H+2, W+2, Cp) f32
    acc1 = None
    for ki in range(3):
        for kj in range(3):
            xs = x_full[ki:ki + H, kj:kj + W, :].reshape(HW, Cp)
            d = jnp.dot(xs.astype(jnp.bfloat16), w1_ref[ki * 3 + kj],
                        preferred_element_type=jnp.float32)
            acc1 = d if acc1 is None else acc1 + d
    c1 = jnp.maximum(acc1 + sh1_ref[...], 0.0)            # (HW, Wp) f32

    # ---- stage conv1 output, spatially zero-padded, in VMEM for conv2 ------
    c1pad_ref[...] = jnp.zeros_like(c1pad_ref)
    c1pad_ref[1:H + 1, 1:W + 1, :] = c1.reshape(H, W, Wp)
    c1p = c1pad_ref[...]                                   # (H+2, W+2, Wp) f32

    # ---- conv2: 3x3 SAME (BN folded), no activation before residual add ----
    acc2 = None
    for ki in range(3):
        for kj in range(3):
            cs = c1p[ki:ki + H, kj:kj + W, :].reshape(HW, Wp)
            d = jnp.dot(cs.astype(jnp.bfloat16), w2_ref[ki * 3 + kj],
                        preferred_element_type=jnp.float32)
            acc2 = d if acc2 is None else acc2 + d
    c2 = acc2 + sh2_ref[...]                               # (HW, Wp) f32

    # ---- residual Add + ReLU ------------------------------------------------
    y = jnp.maximum(c2 + c1, 0.0)                          # (HW, Wp) f32

    # ---- GAP first, then Dense:  fc(mean(y)) = (sum(y)/HW) @ wfc + b --------
    pooled = jnp.sum(y, axis=0, keepdims=True) * (1.0 / HW)      # (1, Wp) f32
    z = jnp.dot(pooled.astype(jnp.bfloat16), wfc_ref[...],
                preferred_element_type=jnp.float32)              # (1, Np) f32
    out_ref[0] = z + bfc_ref[...]                                # (1, Np)


# ----------------------------------------------------------------------------
# Synthetic Architecture (deterministic parameter init, eval-mode BN)
# ----------------------------------------------------------------------------
class ArchitecturePallas:
    def __init__(self, key, in_channels=4, width=8, num_classes=10,
                 bn_epsilon=1e-5):
        self.bn_epsilon = bn_epsilon
        self.in_channels = in_channels
        self.width = width
        self.num_classes = num_classes
        k = jax.random.split(key, 10)

        def bn_fold(gamma, beta, mean, var):
            scale = gamma / jnp.sqrt(var + bn_epsilon)
            shift = beta - mean * scale
            return scale, shift

        # conv1: 3x3, in_channels -> width, BN, ReLU
        self.w1 = 0.1 * jax.random.normal(k[0], (3, 3, in_channels, width), jnp.float32)
        g1 = 1.0 + 0.05 * jax.random.normal(k[1], (width,), jnp.float32)
        b1 = 0.05 * jax.random.normal(k[2], (width,), jnp.float32)
        m1 = 0.01 * jax.random.normal(k[3], (width,), jnp.float32)
        v1 = 1.0 + 0.1 * jnp.abs(jax.random.normal(k[4], (width,), jnp.float32))
        self.s1, self.sh1 = bn_fold(g1, b1, m1, v1)

        # conv2: 3x3, width -> width, BN (no activation before residual add)
        self.w2 = 0.1 * jax.random.normal(k[5], (3, 3, width, width), jnp.float32)
        g2 = 1.0 + 0.05 * jax.random.normal(k[6], (width,), jnp.float32)
        b2 = 0.05 * jax.random.normal(k[7], (width,), jnp.float32)
        m2 = jnp.zeros((width,), jnp.float32)
        v2 = jnp.ones((width,), jnp.float32)
        self.s2, self.sh2 = bn_fold(g2, b2, m2, v2)

        # fc: Dense width -> num_classes
        self.wfc = 0.1 * jax.random.normal(k[8], (width, num_classes), jnp.float32)
        self.bfc = 0.05 * jax.random.normal(k[9], (num_classes,), jnp.float32)

        # ---- fold BN scale into weights + pad everything lane-dense (x128) --
        self.Cp = _round_up(in_channels, 128)
        self.Wp = _round_up(width, 128)
        self.Np = _round_up(num_classes, 128)

        w1f = (self.w1 * self.s1[None, None, None, :]).reshape(9, in_channels, width)
        self.w1p = jnp.pad(
            w1f, ((0, 0), (0, self.Cp - in_channels), (0, self.Wp - width))
        ).astype(jnp.bfloat16)
        self.sh1p = jnp.pad(self.sh1, (0, self.Wp - width)).reshape(1, self.Wp)

        w2f = (self.w2 * self.s2[None, None, None, :]).reshape(9, width, width)
        self.w2p = jnp.pad(
            w2f, ((0, 0), (0, self.Wp - width), (0, self.Wp - width))
        ).astype(jnp.bfloat16)
        self.sh2p = jnp.pad(self.sh2, (0, self.Wp - width)).reshape(1, self.Wp)

        self.wfcp = jnp.pad(
            self.wfc, ((0, self.Wp - width), (0, self.Np - num_classes))
        ).astype(jnp.bfloat16)
        self.bfcp = jnp.pad(self.bfc, (0, self.Np - num_classes)).reshape(1, self.Np)

    def __call__(self, x_nchw):
        B, Cin, H, W = x_nchw.shape
        assert Cin == self.in_channels
        # NCHW -> NHWC, SAME spatial halo + lane padding (plain-JAX glue only).
        # Shipped to the kernel in bf16: halves the largest HBM->VMEM DMA.
        x = jnp.transpose(x_nchw, (0, 2, 3, 1)).astype(jnp.float32)
        xp = jnp.pad(x, ((0, 0), (1, 1), (1, 1), (0, self.Cp - Cin)))
        xp = xp.astype(jnp.bfloat16)

        out = pl.pallas_call(
            functools.partial(_fused_forward_kernel, H=H, W=W),
            out_shape=jax.ShapeDtypeStruct((B, 1, self.Np), jnp.float32),
            grid=(B,),
            in_specs=[
                pl.BlockSpec((1, H + 2, W + 2, self.Cp), lambda b: (b, 0, 0, 0)),
                pl.BlockSpec((9, self.Cp, self.Wp), lambda b: (0, 0, 0)),
                pl.BlockSpec((1, self.Wp), lambda b: (0, 0)),
                pl.BlockSpec((9, self.Wp, self.Wp), lambda b: (0, 0, 0)),
                pl.BlockSpec((1, self.Wp), lambda b: (0, 0)),
                pl.BlockSpec((self.Wp, self.Np), lambda b: (0, 0)),
                pl.BlockSpec((1, self.Np), lambda b: (0, 0)),
            ],
            out_specs=pl.BlockSpec((1, 1, self.Np), lambda b: (b, 0, 0)),
            scratch_shapes=[pltpu.VMEM((H + 2, W + 2, self.Wp), jnp.float32)],
            compiler_params=pltpu.CompilerParams(
                dimension_semantics=("parallel",)),
        )(xp, self.w1p, self.sh1p, self.w2p, self.sh2p, self.wfcp, self.bfcp)

        # strip the lane padding on the class dim
        return out.reshape(B, self.Np)[:, :self.num_classes]


# ----------------------------------------------------------------------------
# Pure-JAX reference (f32, unfolded params) for a sanity check
# ----------------------------------------------------------------------------
def _reference_forward(x_nchw, m):
    x = jnp.transpose(x_nchw, (0, 2, 3, 1)).astype(jnp.float32)

    def conv_bn(h, w, s, sh, relu):
        y = jax.lax.conv_general_dilated(
            h, w, window_strides=(1, 1), padding="SAME",
            dimension_numbers=("NHWC", "HWIO", "NHWC"))
        y = y * s + sh
        return jnp.maximum(y, 0.0) if relu else y

    c1 = conv_bn(x, m.w1, m.s1, m.sh1, True)
    c2 = conv_bn(c1, m.w2, m.s2, m.sh2, False)
    a = jnp.maximum(c1 + c2, 0.0)
    pool = jnp.mean(a, axis=(1, 2))
    return pool @ m.wfc + m.bfc


if __name__ == "__main__":
    key = jax.random.PRNGKey(0)
    k_x, k_p = jax.random.split(key)
    x = jax.random.normal(k_x, (2, 4, 16, 16), jnp.float32)  # NCHW input
    model = ArchitecturePallas(k_p, in_channels=4, width=8, num_classes=10)

    fwd = jax.jit(lambda inp: model(inp))
    out = jax.block_until_ready(fwd(x))

    assert out.shape == (2, 10)
    assert bool(jnp.all(jnp.isfinite(out)))

    ref = _reference_forward(x, model)
    max_err = float(jnp.max(jnp.abs(out - ref)))
    assert max_err < 5e-2, f"max abs err vs reference too large: {max_err}"

    print("KERNEL_OK")
</pallas_src>

<mosaic_0001>
module attributes {stable_mosaic.version = 11 : i64} {
  func.func @_fused_forward_kernel(%arg0: i32, %arg1: memref<1x18x18x128xbf16, #tpu.memory_space<vmem>>, %arg2: memref<9x128x128xbf16, #tpu.memory_space<vmem>>, %arg3: memref<1x128xf32, #tpu.memory_space<vmem>>, %arg4: memref<9x128x128xbf16, #tpu.memory_space<vmem>>, %arg5: memref<1x128xf32, #tpu.memory_space<vmem>>, %arg6: memref<128x128xbf16, #tpu.memory_space<vmem>>, %arg7: memref<1x128xf32, #tpu.memory_space<vmem>>, %arg8: memref<1x1x128xf32, #tpu.memory_space<vmem>>, %arg9: memref<18x18x128xf32, #tpu.memory_space<vmem>>) attributes {dimension_semantics = [#tpu.dimension_semantics<parallel>], iteration_bounds = array<i64: 2>, scalar_prefetch = 0 : i64, scratch_operands = 1 : i64, tpu.core_type = #tpu.core_type<tc>, window_params = [{transform_indices = @transform_0, window_bounds = array<i64: 1, 18, 18, 128>}, {pipeline_mode = #tpu.pipeline_mode<synchronous>, transform_indices = @transform_1, window_bounds = array<i64: 9, 128, 128>}, {pipeline_mode = #tpu.pipeline_mode<synchronous>, transform_indices = @transform_2, window_bounds = array<i64: 1, 128>}, {pipeline_mode = #tpu.pipeline_mode<synchronous>, transform_indices = @transform_3, window_bounds = array<i64: 9, 128, 128>}, {pipeline_mode = #tpu.pipeline_mode<synchronous>, transform_indices = @transform_4, window_bounds = array<i64: 1, 128>}, {pipeline_mode = #tpu.pipeline_mode<synchronous>, transform_indices = @transform_5, window_bounds = array<i64: 128, 128>}, {pipeline_mode = #tpu.pipeline_mode<synchronous>, transform_indices = @transform_6, window_bounds = array<i64: 1, 128>}, {transform_indices = @transform_7, window_bounds = array<i64: 1, 1, 128>}]} {
    %c0 = arith.constant 0 : index
    %c0_0 = arith.constant 0 : index
    %c0_1 = arith.constant 0 : index
    %c0_2 = arith.constant 0 : index
    %0 = vector.load %arg1[%c0, %c0_0, %c0_1, %c0_2] : memref<1x18x18x128xbf16, #tpu.memory_space<vmem>>, vector<1x18x18x128xbf16>
    %1 = vector.shape_cast %0 : vector<1x18x18x128xbf16> to vector<18x18x128xbf16>
    %2 = arith.extf %1 : vector<18x18x128xbf16> to vector<18x18x128xf32>
    %3 = vector.extract_strided_slice %2 {offsets = [0, 0, 0], sizes = [16, 16, 128], strides = [1, 1, 1]} : vector<18x18x128xf32> to vector<16x16x128xf32>
    %4 = vector.shape_cast %3 : vector<16x16x128xf32> to vector<256x128xf32>
    %5 = arith.truncf %4 : vector<256x128xf32> to vector<256x128xbf16>
    %c0_3 = arith.constant 0 : index
    %c0_4 = arith.constant 0 : index
    %c0_5 = arith.constant 0 : index
    %6 = vector.load %arg2[%c0_3, %c0_4, %c0_5] : memref<9x128x128xbf16, #tpu.memory_space<vmem>>, vector<1x128x128xbf16>
    %7 = vector.shape_cast %6 : vector<1x128x128xbf16> to vector<128x128xbf16>
    %cst = arith.constant dense<0.000000e+00> : vector<256x128xf32>
    %8 = tpu.matmul %5, %7, %cst {dimension_numbers = #tpu.dot_dimension_numbers<[1], [0], [0], [1], [0, 0, 1, 1], [], []>} : vector<256x128xbf16>, vector<128x128xbf16>, vector<256x128xf32> -> vector<256x128xf32>
    %9 = vector.extract_strided_slice %2 {offsets = [0, 1, 0], sizes = [16, 16, 128], strides = [1, 1, 1]} : vector<18x18x128xf32> to vector<16x16x128xf32>
    %10 = vector.shape_cast %9 : vector<16x16x128xf32> to vector<256x128xf32>
    %11 = arith.truncf %10 : vector<256x128xf32> to vector<256x128xbf16>
    %c1 = arith.constant 1 : index
    %c0_6 = arith.constant 0 : index
    %c0_7 = arith.constant 0 : index
    %12 = vector.load %arg2[%c1, %c0_6, %c0_7] : memref<9x128x128xbf16, #tpu.memory_space<vmem>>, vector<1x128x128xbf16>
    %13 = vector.shape_cast %12 : vector<1x128x128xbf16> to vector<128x128xbf16>
    %cst_8 = arith.constant dense<0.000000e+00> : vector<256x128xf32>
    %14 = tpu.matmul %11, %13, %cst_8 {dimension_numbers = #tpu.dot_dimension_numbers<[1], [0], [0], [1], [0, 0, 1, 1], [], []>} : vector<256x128xbf16>, vector<128x128xbf16>, vector<256x128xf32> -> vector<256x128xf32>
    %15 = arith.addf %8, %14 : vector<256x128xf32>
    %16 = vector.extract_strided_slice %2 {offsets = [0, 2, 0], sizes = [16, 16, 128], strides = [1, 1, 1]} : vector<18x18x128xf32> to vector<16x16x128xf32>
    %17 = vector.shape_cast %16 : vector<16x16x128xf32> to vector<256x128xf32>
    %18 = arith.truncf %17 : vector<256x128xf32> to vector<256x128xbf16>
    %c2 = arith.constant 2 : index
    %c0_9 = arith.constant 0 : index
    %c0_10 = arith.constant 0 : index
    %19 = vector.load %arg2[%c2, %c0_9, %c0_10] : memref<9x128x128xbf16, #tpu.memory_space<vmem>>, vector<1x128x128xbf16>
    %20 = vector.shape_cast %19 : vector<1x128x128xbf16> to vector<128x128xbf16>
    %cst_11 = arith.constant dense<0.000000e+00> : vector<256x128xf32>
    %21 = tpu.matmul %18, %20, %cst_11 {dimension_numbers = #tpu.dot_dimension_numbers<[1], [0], [0], [1], [0, 0, 1, 1], [], []>} : vector<256x128xbf16>, vector<128x128xbf16>, vector<256x128xf32> -> vector<256x128xf32>
    %22 = arith.addf %15, %21 : vector<256x128xf32>
    %23 = vector.extract_strided_slice %2 {offsets = [1, 0, 0], sizes = [16, 16, 128], strides = [1, 1, 1]} : vector<18x18x128xf32> to vector<16x16x128xf32>
    %24 = vector.shape_cast %23 : vector<16x16x128xf32> to vector<256x128xf32>
    %25 = arith.truncf %24 : vector<256x128xf32> to vector<256x128xbf16>
    %c3 = arith.constant 3 : index
    %c0_12 = arith.constant 0 : index
    %c0_13 = arith.constant 0 : index
    %26 = vector.load %arg2[%c3, %c0_12, %c0_13] : memref<9x128x128xbf16, #tpu.memory_space<vmem>>, vector<1x128x128xbf16>
    %27 = vector.shape_cast %26 : vector<1x128x128xbf16> to vector<128x128xbf16>
    %cst_14 = arith.constant dense<0.000000e+00> : vector<256x128xf32>
    %28 = tpu.matmul %25, %27, %cst_14 {dimension_numbers = #tpu.dot_dimension_numbers<[1], [0], [0], [1], [0, 0, 1, 1], [], []>} : vector<256x128xbf16>, vector<128x128xbf16>, vector<256x128xf32> -> vector<256x128xf32>
    %29 = arith.addf %22, %28 : vector<256x128xf32>
    %30 = vector.extract_strided_slice %2 {offsets = [1, 1, 0], sizes = [16, 16, 128], strides = [1, 1, 1]} : vector<18x18x128xf32> to vector<16x16x128xf32>
    %31 = vector.shape_cast %30 : vector<16x16x128xf32> to vector<256x128xf32>
    %32 = arith.truncf %31 : vector<256x128xf32> to vector<256x128xbf16>
    %c4 = arith.constant 4 : index
    %c0_15 = arith.constant 0 : index
    %c0_16 = arith.constant 0 : index
    %33 = vector.load %arg2[%c4, %c0_15, %c0_16] : memref<9x128x128xbf16, #tpu.memory_space<vmem>>, vector<1x128x128xbf16>
    %34 = vector.shape_cast %33 : vector<1x128x128xbf16> to vector<128x128xbf16>
    %cst_17 = arith.constant dense<0.000000e+00> : vector<256x128xf32>
    %35 = tpu.matmul %32, %34, %cst_17 {dimension_numbers = #tpu.dot_dimension_numbers<[1], [0], [0], [1], [0, 0, 1, 1], [], []>} : vector<256x128xbf16>, vector<128x128xbf16>, vector<256x128xf32> -> vector<256x128xf32>
    %36 = arith.addf %29, %35 : vector<256x128xf32>
    %37 = vector.extract_strided_slice %2 {offsets = [1, 2, 0], sizes = [16, 16, 128], strides = [1, 1, 1]} : vector<18x18x128xf32> to vector<16x16x128xf32>
    %38 = vector.shape_cast %37 : vector<16x16x128xf32> to vector<256x128xf32>
    %39 = arith.truncf %38 : vector<256x128xf32> to vector<256x128xbf16>
    %c5 = arith.constant 5 : index
    %c0_18 = arith.constant 0 : index
    %c0_19 = arith.constant 0 : index
    %40 = vector.load %arg2[%c5, %c0_18, %c0_19] : memref<9x128x128xbf16, #tpu.memory_space<vmem>>, vector<1x128x128xbf16>
    %41 = vector.shape_cast %40 : vector<1x128x128xbf16> to vector<128x128xbf16>
    %cst_20 = arith.constant dense<0.000000e+00> : vector<256x128xf32>
    %42 = tpu.matmul %39, %41, %cst_20 {dimension_numbers = #tpu.dot_dimension_numbers<[1], [0], [0], [1], [0, 0, 1, 1], [], []>} : vector<256x128xbf16>, vector<128x128xbf16>, vector<256x128xf32> -> vector<256x128xf32>
    %43 = arith.addf %36, %42 : vector<256x128xf32>
    %44 = vector.extract_strided_slice %2 {offsets = [2, 0, 0], sizes = [16, 16, 128], strides = [1, 1, 1]} : vector<18x18x128xf32> to vector<16x16x128xf32>
    %45 = vector.shape_cast %44 : vector<16x16x128xf32> to vector<256x128xf32>
    %46 = arith.truncf %45 : vector<256x128xf32> to vector<256x128xbf16>
    %c6 = arith.constant 6 : index
    %c0_21 = arith.constant 0 : index
    %c0_22 = arith.constant 0 : index
    %47 = vector.load %arg2[%c6, %c0_21, %c0_22] : memref<9x128x128xbf16, #tpu.memory_space<vmem>>, vector<1x128x128xbf16>
    %48 = vector.shape_cast %47 : vector<1x128x128xbf16> to vector<128x128xbf16>
    %cst_23 = arith.constant dense<0.000000e+00> : vector<256x128xf32>
    %49 = tpu.matmul %46, %48, %cst_23 {dimension_numbers = #tpu.dot_dimension_numbers<[1], [0], [0], [1], [0, 0, 1, 1], [], []>} : vector<256x128xbf16>, vector<128x128xbf16>, vector<256x128xf32> -> vector<256x128xf32>
    %50 = arith.addf %43, %49 : vector<256x128xf32>
    %51 = vector.extract_strided_slice %2 {offsets = [2, 1, 0], sizes = [16, 16, 128], strides = [1, 1, 1]} : vector<18x18x128xf32> to vector<16x16x128xf32>
    %52 = vector.shape_cast %51 : vector<16x16x128xf32> to vector<256x128xf32>
    %53 = arith.truncf %52 : vector<256x128xf32> to vector<256x128xbf16>
    %c7 = arith.constant 7 : index
    %c0_24 = arith.constant 0 : index
    %c0_25 = arith.constant 0 : index
    %54 = vector.load %arg2[%c7, %c0_24, %c0_25] : memref<9x128x128xbf16, #tpu.memory_space<vmem>>, vector<1x128x128xbf16>
    %55 = vector.shape_cast %54 : vector<1x128x128xbf16> to vector<128x128xbf16>
    %cst_26 = arith.constant dense<0.000000e+00> : vector<256x128xf32>
    %56 = tpu.matmul %53, %55, %cst_26 {dimension_numbers = #tpu.dot_dimension_numbers<[1], [0], [0], [1], [0, 0, 1, 1], [], []>} : vector<256x128xbf16>, vector<128x128xbf16>, vector<256x128xf32> -> vector<256x128xf32>
    %57 = arith.addf %50, %56 : vector<256x128xf32>
    %58 = vector.extract_strided_slice %2 {offsets = [2, 2, 0], sizes = [16, 16, 128], strides = [1, 1, 1]} : vector<18x18x128xf32> to vector<16x16x128xf32>
    %59 = vector.shape_cast %58 : vector<16x16x128xf32> to vector<256x128xf32>
    %60 = arith.truncf %59 : vector<256x128xf32> to vector<256x128xbf16>
    %c8 = arith.constant 8 : index
    %c0_27 = arith.constant 0 : index
    %c0_28 = arith.constant 0 : index
    %61 = vector.load %arg2[%c8, %c0_27, %c0_28] : memref<9x128x128xbf16, #tpu.memory_space<vmem>>, vector<1x128x128xbf16>
    %62 = vector.shape_cast %61 : vector<1x128x128xbf16> to vector<128x128xbf16>
    %cst_29 = arith.constant dense<0.000000e+00> : vector<256x128xf32>
    %63 = tpu.matmul %60, %62, %cst_29 {dimension_numbers = #tpu.dot_dimension_numbers<[1], [0], [0], [1], [0, 0, 1, 1], [], []>} : vector<256x128xbf16>, vector<128x128xbf16>, vector<256x128xf32> -> vector<256x128xf32>
    %64 = arith.addf %57, %63 : vector<256x128xf32>
    %c0_30 = arith.constant 0 : index
    %c0_31 = arith.constant 0 : index
    %65 = vector.load %arg3[%c0_30, %c0_31] : memref<1x128xf32, #tpu.memory_space<vmem>>, vector<1x128xf32>
    %66 = vector.broadcast %65 : vector<1x128xf32> to vector<256x128xf32>
    %67 = arith.addf %64, %66 : vector<256x128xf32>
    %cst_32 = arith.constant 0.000000e+00 : f32
    %68 = vector.broadcast %cst_32 : f32 to vector<256x128xf32>
    %69 = arith.maximumf %67, %68 : vector<256x128xf32>
    %cst_33 = arith.constant 0.000000e+00 : f32
    %70 = vector.broadcast %cst_33 : f32 to vector<18x18x128xf32>
    %c0_34 = arith.constant 0 : index
    %c0_35 = arith.constant 0 : index
    %c0_36 = arith.constant 0 : index
    %71 = vector.load %arg9[%c0_34, %c0_35, %c0_36] : memref<18x18x128xf32, #tpu.memory_space<vmem>>, vector<18x18x128xf32>
    tpu.vector_store %arg9[%c0_34, %c0_35, %c0_36], %70 {strides = array<i32>} : memref<18x18x128xf32, #tpu.memory_space<vmem>>, vector<18x18x128xf32>,
    %72 = vector.shape_cast %69 : vector<256x128xf32> to vector<16x16x128xf32>
    %c1_37 = arith.constant 1 : index
    %c1_38 = arith.constant 1 : index
    %c0_39 = arith.constant 0 : index
    %73 = vector.load %arg9[%c1_37, %c1_38, %c0_39] : memref<18x18x128xf32, #tpu.memory_space<vmem>>, vector<16x16x128xf32>
    tpu.vector_store %arg9[%c1_37, %c1_38, %c0_39], %72 {strides = array<i32>} : memref<18x18x128xf32, #tpu.memory_space<vmem>>, vector<16x16x128xf32>,
    %c0_40 = arith.constant 0 : index
    %c0_41 = arith.constant 0 : index
    %c0_42 = arith.constant 0 : index
    %74 = vector.load %arg9[%c0_40, %c0_41, %c0_42] : memref<18x18x128xf32, #tpu.memory_space<vmem>>, vector<18x18x128xf32>
    %75 = vector.extract_strided_slice %74 {offsets = [0, 0, 0], sizes = [16, 16, 128], strides = [1, 1, 1]} : vector<18x18x128xf32> to vector<16x16x128xf32>
    %76 = vector.shape_cast %75 : vector<16x16x128xf32> to vector<256x128xf32>
    %77 = arith.truncf %76 : vector<256x128xf32> to vector<256x128xbf16>
    %c0_43 = arith.constant 0 : index
    %c0_44 = arith.constant 0 : index
    %c0_45 = arith.constant 0 : index
    %78 = vector.load %arg4[%c0_43, %c0_44, %c0_45] : memref<9x128x128xbf16, #tpu.memory_space<vmem>>, vector<1x128x128xbf16>
    %79 = vector.shape_cast %78 : vector<1x128x128xbf16> to vector<128x128xbf16>
    %cst_46 = arith.constant dense<0.000000e+00> : vector<256x128xf32>
    %80 = tpu.matmul %77, %79, %cst_46 {dimension_numbers = #tpu.dot_dimension_numbers<[1], [0], [0], [1], [0, 0, 1, 1], [], []>} : vector<256x128xbf16>, vector<128x128xbf16>, vector<256x128xf32> -> vector<256x128xf32>
    %81 = vector.extract_strided_slice %74 {offsets = [0, 1, 0], sizes = [16, 16, 128], strides = [1, 1, 1]} : vector<18x18x128xf32> to vector<16x16x128xf32>
    %82 = vector.shape_cast %81 : vector<16x16x128xf32> to vector<256x128xf32>
    %83 = arith.truncf %82 : vector<256x128xf32> to vector<256x128xbf16>
    %c1_47 = arith.constant 1 : index
    %c0_48 = arith.constant 0 : index
    %c0_49 = arith.constant 0 : index
    %84 = vector.load %arg4[%c1_47, %c0_48, %c0_49] : memref<9x128x128xbf16, #tpu.memory_space<vmem>>, vector<1x128x128xbf16>
    %85 = vector.shape_cast %84 : vector<1x128x128xbf16> to vector<128x128xbf16>
    %cst_50 = arith.constant dense<0.000000e+00> : vector<256x128xf32>
    %86 = tpu.matmul %83, %85, %cst_50 {dimension_numbers = #tpu.dot_dimension_numbers<[1], [0], [0], [1], [0, 0, 1, 1], [], []>} : vector<256x128xbf16>, vector<128x128xbf16>, vector<256x128xf32> -> vector<256x128xf32>
    %87 = arith.addf %80, %86 : vector<256x128xf32>
    %88 = vector.extract_strided_slice %74 {offsets = [0, 2, 0], sizes = [16, 16, 128], strides = [1, 1, 1]} : vector<18x18x128xf32> to vector<16x16x128xf32>
    %89 = vector.shape_cast %88 : vector<16x16x128xf32> to vector<256x128xf32>
    %90 = arith.truncf %89 : vector<256x128xf32> to vector<256x128xbf16>
    %c2_51 = arith.constant 2 : index
    %c0_52 = arith.constant 0 : index
    %c0_53 = arith.constant 0 : index
    %91 = vector.load %arg4[%c2_51, %c0_52, %c0_53] : memref<9x128x128xbf16, #tpu.memory_space<vmem>>, vector<1x128x128xbf16>
    %92 = vector.shape_cast %91 : vector<1x128x128xbf16> to vector<128x128xbf16>
    %cst_54 = arith.constant dense<0.000000e+00> : vector<256x128xf32>
    %93 = tpu.matmul %90, %92, %cst_54 {dimension_numbers = #tpu.dot_dimension_numbers<[1], [0], [0], [1], [0, 0, 1, 1], [], []>} : vector<256x128xbf16>, vector<128x128xbf16>, vector<256x128xf32> -> vector<256x128xf32>
    %94 = arith.addf %87, %93 : vector<256x128xf32>
    %95 = vector.extract_strided_slice %74 {offsets = [1, 0, 0], sizes = [16, 16, 128], strides = [1, 1, 1]} : vector<18x18x128xf32> to vector<16x16x128xf32>
    %96 = vector.shape_cast %95 : vector<16x16x128xf32> to vector<256x128xf32>
    %97 = arith.truncf %96 : vector<256x128xf32> to vector<256x128xbf16>
    %c3_55 = arith.constant 3 : index
    %c0_56 = arith.constant 0 : index
    %c0_57 = arith.constant 0 : index
    %98 = vector.load %arg4[%c3_55, %c0_56, %c0_57] : memref<9x128x128xbf16, #tpu.memory_space<vmem>>, vector<1x128x128xbf16>
    %99 = vector.shape_cast %98 : vector<1x128x128xbf16> to vector<128x128xbf16>
    %cst_58 = arith.constant dense<0.000000e+00> : vector<256x128xf32>
    %100 = tpu.matmul %97, %99, %cst_58 {dimension_numbers = #tpu.dot_dimension_numbers<[1], [0], [0], [1], [0, 0, 1, 1], [], []>} : vector<256x128xbf16>, vector<128x128xbf16>, vector<256x128xf32> -> vector<256x128xf32>
    %101 = arith.addf %94, %100 : vector<256x128xf32>
    %102 = vector.extract_strided_slice %74 {offsets = [1, 1, 0], sizes = [16, 16, 128], strides = [1, 1, 1]} : vector<18x18x128xf32> to vector<16x16x128xf32>
    %103 = vector.shape_cast %102 : vector<16x16x128xf32> to vector<256x128xf32>
    %104 = arith.truncf %103 : vector<256x128xf32> to vector<256x128xbf16>
    %c4_59 = arith.constant 4 : index
    %c0_60 = arith.constant 0 : index
    %c0_61 = arith.constant 0 : index
    %105 = vector.load %arg4[%c4_59, %c0_60, %c0_61] : memref<9x128x128xbf16, #tpu.memory_space<vmem>>, vector<1x128x128xbf16>
    %106 = vector.shape_cast %105 : vector<1x128x128xbf16> to vector<128x128xbf16>
    %cst_62 = arith.constant dense<0.000000e+00> : vector<256x128xf32>
    %107 = tpu.matmul %104, %106, %cst_62 {dimension_numbers = #tpu.dot_dimension_numbers<[1], [0], [0], [1], [0, 0, 1, 1], [], []>} : vector<256x128xbf16>, vector<128x128xbf16>, vector<256x128xf32> -> vector<256x128xf32>
    %108 = arith.addf %101, %107 : vector<256x128xf32>
    %109 = vector.extract_strided_slice %74 {offsets = [1, 2, 0], sizes = [16, 16, 128], strides = [1, 1, 1]} : vector<18x18x128xf32> to vector<16x16x128xf32>
    %110 = vector.shape_cast %109 : vector<16x16x128xf32> to vector<256x128xf32>
    %111 = arith.truncf %110 : vector<256x128xf32> to vector<256x128xbf16>
    %c5_63 = arith.constant 5 : index
    %c0_64 = arith.constant 0 : index
    %c0_65 = arith.constant 0 : index
    %112 = vector.load %arg4[%c5_63, %c0_64, %c0_65] : memref<9x128x128xbf16, #tpu.memory_space<vmem>>, vector<1x128x128xbf16>
    %113 = vector.shape_cast %112 : vector<1x128x128xbf16> to vector<128x128xbf16>
    %cst_66 = arith.constant dense<0.000000e+00> : vector<256x128xf32>
    %114 = tpu.matmul %111, %113, %cst_66 {dimension_numbers = #tpu.dot_dimension_numbers<[1], [0], [0], [1], [0, 0, 1, 1], [], []>} : vector<256x128xbf16>, vector<128x128xbf16>, vector<256x128xf32> -> vector<256x128xf32>
    %115 = arith.addf %108, %114 : vector<256x128xf32>
    %116 = vector.extract_strided_slice %74 {offsets = [2, 0, 0], sizes = [16, 16, 128], strides = [1, 1, 1]} : vector<18x18x128xf32> to vector<16x16x128xf32>
    %117 = vector.shape_cast %116 : vector<16x16x128xf32> to vector<256x128xf32>
    %118 = arith.truncf %117 : vector<256x128xf32> to vector<256x128xbf16>
    %c6_67 = arith.constant 6 : index
    %c0_68 = arith.constant 0 : index
    %c0_69 = arith.constant 0 : index
    %119 = vector.load %arg4[%c6_67, %c0_68, %c0_69] : memref<9x128x128xbf16, #tpu.memory_space<vmem>>, vector<1x128x128xbf16>
    %120 = vector.shape_cast %119 : vector<1x128x128xbf16> to vector<128x128xbf16>
    %cst_70 = arith.constant dense<0.000000e+00> : vector<256x128xf32>
    %121 = tpu.matmul %118, %120, %cst_70 {dimension_numbers = #tpu.dot_dimension_numbers<[1], [0], [0], [1], [0, 0, 1, 1], [], []>} : vector<256x128xbf16>, vector<128x128xbf16>, vector<256x128xf32> -> vector<256x128xf32>
    %122 = arith.addf %115, %121 : vector<256x128xf32>
    %123 = vector.extract_strided_slice %74 {offsets = [2, 1, 0], sizes = [16, 16, 128], strides = [1, 1, 1]} : vector<18x18x128xf32> to vector<16x16x128xf32>
    %124 = vector.shape_cast %123 : vector<16x16x128xf32> to vector<256x128xf32>
    %125 = arith.truncf %124 : vector<256x128xf32> to vector<256x128xbf16>
    %c7_71 = arith.constant 7 : index
    %c0_72 = arith.constant 0 : index
    %c0_73 = arith.constant 0 : index
    %126 = vector.load %arg4[%c7_71, %c0_72, %c0_73] : memref<9x128x128xbf16, #tpu.memory_space<vmem>>, vector<1x128x128xbf16>
    %127 = vector.shape_cast %126 : vector<1x128x128xbf16> to vector<128x128xbf16>
    %cst_74 = arith.constant dense<0.000000e+00> : vector<256x128xf32>
    %128 = tpu.matmul %125, %127, %cst_74 {dimension_numbers = #tpu.dot_dimension_numbers<[1], [0], [0], [1], [0, 0, 1, 1], [], []>} : vector<256x128xbf16>, vector<128x128xbf16>, vector<256x128xf32> -> vector<256x128xf32>
    %129 = arith.addf %122, %128 : vector<256x128xf32>
    %130 = vector.extract_strided_slice %74 {offsets = [2, 2, 0], sizes = [16, 16, 128], strides = [1, 1, 1]} : vector<18x18x128xf32> to vector<16x16x128xf32>
    %131 = vector.shape_cast %130 : vector<16x16x128xf32> to vector<256x128xf32>
    %132 = arith.truncf %131 : vector<256x128xf32> to vector<256x128xbf16>
    %c8_75 = arith.constant 8 : index
    %c0_76 = arith.constant 0 : index
    %c0_77 = arith.constant 0 : index
    %133 = vector.load %arg4[%c8_75, %c0_76, %c0_77] : memref<9x128x128xbf16, #tpu.memory_space<vmem>>, vector<1x128x128xbf16>
    %134 = vector.shape_cast %133 : vector<1x128x128xbf16> to vector<128x128xbf16>
    %cst_78 = arith.constant dense<0.000000e+00> : vector<256x128xf32>
    %135 = tpu.matmul %132, %134, %cst_78 {dimension_numbers = #tpu.dot_dimension_numbers<[1], [0], [0], [1], [0, 0, 1, 1], [], []>} : vector<256x128xbf16>, vector<128x128xbf16>, vector<256x128xf32> -> vector<256x128xf32>
    %136 = arith.addf %129, %135 : vector<256x128xf32>
    %c0_79 = arith.constant 0 : index
    %c0_80 = arith.constant 0 : index
    %137 = vector.load %arg5[%c0_79, %c0_80] : memref<1x128xf32, #tpu.memory_space<vmem>>, vector<1x128xf32>
    %138 = vector.broadcast %137 : vector<1x128xf32> to vector<256x128xf32>
    %139 = arith.addf %136, %138 : vector<256x128xf32>
    %140 = arith.addf %139, %69 : vector<256x128xf32>
    %cst_81 = arith.constant 0.000000e+00 : f32
    %141 = vector.broadcast %cst_81 : f32 to vector<256x128xf32>
    %142 = arith.maximumf %140, %141 : vector<256x128xf32>
    %cst_82 = arith.constant dense<0.000000e+00> : vector<128xf32>
    %143 = vector.multi_reduction <add>, %142, %cst_82 [0] : vector<256x128xf32> to vector<128xf32>
    %144 = vector.shape_cast %143 : vector<128xf32> to vector<1x128xf32>
    %cst_83 = arith.constant 3.906250e-03 : f32
    %145 = vector.broadcast %cst_83 : f32 to vector<1x128xf32>
    %146 = arith.mulf %144, %145 : vector<1x128xf32>
    %147 = arith.truncf %146 : vector<1x128xf32> to vector<1x128xbf16>
    %c0_84 = arith.constant 0 : index
    %c0_85 = arith.constant 0 : index
    %148 = vector.load %arg6[%c0_84, %c0_85] : memref<128x128xbf16, #tpu.memory_space<vmem>>, vector<128x128xbf16>
    %cst_86 = arith.constant dense<0.000000e+00> : vector<1x128xf32>
    %149 = tpu.matmul %147, %148, %cst_86 {dimension_numbers = #tpu.dot_dimension_numbers<[1], [0], [0], [1], [0, 0, 1, 1], [], []>} : vector<1x128xbf16>, vector<128x128xbf16>, vector<1x128xf32> -> vector<1x128xf32>
    %c0_87 = arith.constant 0 : index
    %c0_88 = arith.constant 0 : index
    %150 = vector.load %arg7[%c0_87, %c0_88] : memref<1x128xf32, #tpu.memory_space<vmem>>, vector<1x128xf32>
    %151 = arith.addf %149, %150 : vector<1x128xf32>
    %c0_89 = arith.constant 0 : index
    %c0_90 = arith.constant 0 : index
    %c0_91 = arith.constant 0 : index
    %152 = vector.load %arg8[%c0_89, %c0_90, %c0_91] : memref<1x1x128xf32, #tpu.memory_space<vmem>>, vector<1x1x128xf32>
    %153 = vector.shape_cast %152 : vector<1x1x128xf32> to vector<1x128xf32>
    %154 = vector.shape_cast %151 : vector<1x128xf32> to vector<1x1x128xf32>
    tpu.vector_store %arg8[%c0_89, %c0_90, %c0_91], %154 {strides = array<i32>} : memref<1x1x128xf32, #tpu.memory_space<vmem>>, vector<1x1x128xf32>,
    return
  }
  func.func @transform_0(%arg0: i32) -> (i32, i32, i32, i32) {
    %c0_i32 = arith.constant 0 : i32
    %c0_i32_0 = arith.constant 0 : i32
    %c0_i32_1 = arith.constant 0 : i32
    %c0_i32_2 = arith.constant 0 : i32
    return %arg0, %c0_i32, %c0_i32_0, %c0_i32_1 : i32, i32, i32, i32
  }
  func.func @transform_1(%arg0: i32) -> (i32, i32, i32) {
    %c0_i32 = arith.constant 0 : i32
    %c0_i32_0 = arith.constant 0 : i32
    %c0_i32_1 = arith.constant 0 : i32
    %c0_i32_2 = arith.constant 0 : i32
    return %c0_i32, %c0_i32_0, %c0_i32_1 : i32, i32, i32
  }
  func.func @transform_2(%arg0: i32) -> (i32, i32) {
    %c0_i32 = arith.constant 0 : i32
    %c0_i32_0 = arith.constant 0 : i32
    %c0_i32_1 = arith.constant 0 : i32
    return %c0_i32, %c0_i32_0 : i32, i32
  }
  func.func @transform_3(%arg0: i32) -> (i32, i32, i32) {
    %c0_i32 = arith.constant 0 : i32
    %c0_i32_0 = arith.constant 0 : i32
    %c0_i32_1 = arith.constant 0 : i32
    %c0_i32_2 = arith.constant 0 : i32
    return %c0_i32, %c0_i32_0, %c0_i32_1 : i32, i32, i32
  }
  func.func @transform_4(%arg0: i32) -> (i32, i32) {
    %c0_i32 = arith.constant 0 : i32
    %c0_i32_0 = arith.constant 0 : i32
    %c0_i32_1 = arith.constant 0 : i32
    return %c0_i32, %c0_i32_0 : i32, i32
  }
  func.func @transform_5(%arg0: i32) -> (i32, i32) {
    %c0_i32 = arith.constant 0 : i32
    %c0_i32_0 = arith.constant 0 : i32
    %c0_i32_1 = arith.constant 0 : i32
    return %c0_i32, %c0_i32_0 : i32, i32
  }
  func.func @transform_6(%arg0: i32) -> (i32, i32) {
    %c0_i32 = arith.constant 0 : i32
    %c0_i32_0 = arith.constant 0 : i32
    %c0_i32_1 = arith.constant 0 : i32
    return %c0_i32, %c0_i32_0 : i32, i32
  }
  func.func @transform_7(%arg0: i32) -> (i32, i32, i32) {
    %c0_i32 = arith.constant 0 : i32
    %c0_i32_0 = arith.constant 0 : i32
    %c0_i32_1 = arith.constant 0 : i32
    return %arg0, %c0_i32, %c0_i32_0 : i32, i32, i32
  }
}

</mosaic_0001>

<bundles_post_ra>
// kernel: _lambda_.1
= control target key start
LH: loop header
LB: loop body
LE: loop exit
PB: predicated region body
PF: predicated region fallthrough
CT: control target
= control target key end

     0   :  { %12 = vsyncpa [#allocation4], 0  ;;  %s10603_s0 = inlined_call_operand.vmem [shape: bf16[2,18,18,128], index: 0, kind: input, shape index: {}]   ;;  %s10604_s1 = inlined_call_operand.vmem [shape: bf16[9,128,128], index: 1, kind: input, shape index: {}]   ;;  %s10605_s2 = inlined_call_operand.vmem [shape: f32[1,128], index: 2, kind: input, shape index: {}]   ;;  %s10606_s3 = inlined_call_operand.vmem [shape: bf16[9,128,128], index: 3, kind: input, shape index: {}]   ;;  %s10607_s4 = inlined_call_operand.vmem [shape: f32[1,128], index: 4, kind: input, shape index: {}]   ;;  %s10608_s5 = inlined_call_operand.vmem [shape: bf16[128,128], index: 5, kind: input, shape index: {}]   ;;  %s10609_s6 = inlined_call_operand.vmem [shape: f32[1,128], index: 6, kind: input, shape index: {}]   ;;  %s10610_s7 = inlined_call_operand.hbm [shape: f32[2,1,128], index: 7, kind: output, shape index: {}]  }
   0x1   :  { %14 = vsyncpa [#allocation4 + $0x1], 0  ;;  %s8797_s24 = smov 0   ;;  %s8799_s25 = smov 0  }
   0x2   :  { %s8801_s26 = smov 0   ;;  %s8803_s27 = smov 0  }
   0x3 LB: > { %s8818_s28 = sadd.s32 4294967295, %s8751_s27   ;;  %s6149_s29 = sadd.s32 4294967294, %s8751_s27   ;;  %s8751_s27 = sphi %s8803_s27, %s10740_s27   ;;  %s8747_s26 = sphi %s8801_s26, %s10739_s26   ;;  %s8743_s25 = sphi %s8799_s25, %s10738_s25   ;;  %s8739_s24 = sphi %s8797_s24, %s10737_s24  }
   0x4   : > { %s8822_s30 = sadd.s32 1, %s8751_s27   ;;  %s179_s8 = sadd.s32 1, %s8747_s26 }
   0x5   : > { %s176_s9 = ssub.s32 %s8751_s27, %s8822_s30  ;;  %p189_p0 = scmp.ne.s32.totalorder %s8747_s26, %s8743_s25 }
   0x6   : > { %p177_p1 = scmp.eq.s32.totalorder %s176_s9, 0  ;;  %p190_p2 = scmp.eq.s32.totalorder %s8818_s28, 1 }
   0x7   : > { %p195_p3 = scmp.ne.s32.totalorder %s8743_s25, %s8739_s24  ;;  %p196_p4 = scmp.eq.s32.totalorder %s6149_s29, 1 }
   0x8   : > { %s8833_s10 = scalar_select %p177_p1, %s8747_s26, %s179_s8  }
   0x9   : > { %p8835_p5 = por %p190_p2, %p189_p0  ;;  %p8839_p6 = por %p196_p4, %p195_p3 }
   0xa   : > { %p6152_p7 = scmp.ge.s32.totalorder %s8751_s27, 1  ;;  %p240_p8 = scmp.lt.s32.totalorder %s8751_s27, 3 }
   0xc   : > { %p241_p9 = pnand %p6152_p7, %p240_p8 }
   0xe   : > { %244 = sbr.rel (%p241_p9) target bundleno = 1839 (0x72f), region = 48 }
  0x15   : > { %v8464_v0 = vld [vmem:[%s10604_s1 + $0x40] sm:$0xff]   ;;  %p271_p10 = scmp.lt.s32.totalorder %s8818_s28, 1  ;;  %v8465_v1 = vld [vmem:[%s10604_s1 + $0x48] sm:$0xff]   ;;  %v8466_v2 = vld [vmem:[%s10604_s1 + $0x50] sm:$0xff]   ;;  %vm465_vm0 = vcmask 1046528   ;;  %vm1029_vm1 = vcmask 1045504  }
  0x16   : > { %7026 = vmatprep.subr.bf16.mxu0 %v8464_v0  ;;  %v8467_v3 = vld [vmem:[%s10604_s1 + $0x58] sm:$0xff]   ;;  %v8468_v12 = vld [vmem:[%s10604_s1 + $0x60] sm:$0xff]   ;;  %v8469_v21 = vld [vmem:[%s10604_s1 + $0x68] sm:$0xff]   ;;  %vm8755_vm2 = vmmov 0   ;;  %s269_s13 = sand.u32 1, %s8743_s25   ;;  %s6582_s16 = sshll.u32 %s8818_s28, 4 }
  0x17   : > { %s272_s17 = scalar_select %p271_p10, %s8818_s28, 1  ;;  %7027 = vmatpush3.bf16.msra.mxu0 %v8464_v0  ;;  %v8470_v30 = vld [vmem:[%s10604_s1 + $0x70] sm:$0xff]   ;;  %v8471_v48 = vld [vmem:[%s10604_s1 + $0x78] sm:$0xff]   ;;  %v8472_v59 = vld [vmem:[%s10604_s1] sm:$0xff]  }
  0x18   : > { %7028 = vmatprep.subr.bf16.mxu0 %v8465_v1  ;;  %s6082_s21 = scalar_lea.sflag [#allocation4], %s269_s13  ;;  %s8756_s22 = smov [#allocation3]  }
  0x19   : > { %s8422_s20 = smul.u32 216, %s272_s17  ;;  %s270_s17 = scalar_lea.vmem [#allocation3], %s269_s13 }
  0x1a   : > { %s8693_s29 = sshll.u32 %s8756_s22, 4  ;;  %s8694_s29 = int_to_ptr.vmem [resolvable:$false] %s8693_s29 }
  0x1b   : > { %s8859_s23 = scalar_lea.vmem %s10603_s0, %s8422_s20  ;;  %7029 = vmatpush3.bf16.msra.mxu0 %v8465_v1  ;;  %s10561_s20 = scalar_lea.hbm %s10610_s7, %s6582_s16 }
  0x1c   : > { %7030 = vmatprep.subr.bf16.mxu0 %v8466_v2  ;;  %v8865_v4 = vld [vmem:[%s8859_s23] sm:$0xff]   ;;  %v8868_v5 = vld [vmem:[%s8859_s23 + $0x8] sm:$0x1]  ;;  %v8885_v15 = vld [vmem:[%s8859_s23 + $0xc] sm:$0xff]   ;;  %s8695_s8 = scalar_lea.vmem %s8694_s29, 32 }
  0x1d   : > { %v10636_v6 = vunpack.c.l.bf16 %v8865_v4  ;;  %v10633_v7 = vunpack.c.h.bf16 %v8865_v4  ;;  %v10632_v8 = vunpack.c.l.bf16 %v8868_v5  ;;  %10663 = vst [vmem:[#allocation6_spill] sm:$0xff] %v8885_v15  ;;  %v282_v17 = vld [vmem:[%s8859_s23 + $0x14] sm:$0x1]  ;;  %v8889_v18 = vld [vmem:[%s8859_s23 + $0x18] sm:$0xff]   ;;  %v8892_v19 = vld [vmem:[%s8859_s23 + $0x20] sm:$0x1]  ;;  %v334_v23 = vunpack.c.l.bf16 %v8885_v15 }
  0x1e   : > { %v8895_v20 = vld [vmem:[%s8859_s23 + $0x24] sm:$0xff]   ;;  %v8901_v22 = vld [vmem:[%s8859_s23 + $0x2c] sm:$0x1]  ;;  %v335_v24 = vunpack.c.h.bf16 %v8885_v15  ;;  %v336_v25 = vunpack.c.l.bf16 %v282_v17  ;;  %v10631_v26 = vunpack.c.l.bf16 %v8889_v18  ;;  %v10628_v27 = vunpack.c.h.bf16 %v8889_v18  ;;  %v8915_v33 = vld [vmem:[%s8859_s23 + $0x30] sm:$0xff]  }
  0x1f   : > { %7031 = vmatpush3.bf16.msra.mxu0 %v8466_v2  ;;  %v466_v9 = vrot.slane %v10636_v6, 1  ;;  %v467_v10 = vrot.slane %v10633_v7, 1  ;;  %v469_v11 = vrot.slane %v10632_v8, 1  ;;  %v10627_v28 = vunpack.c.l.bf16 %v8892_v19  ;;  %v8918_v34 = vld [vmem:[%s8859_s23 + $0x38] sm:$0x1]  ;;  %v8930_v43 = vld [vmem:[%s8859_s23 + $0x3c] sm:$0xff]  }
  0x20   : > { %7032 = vmatprep.subr.bf16.mxu0 %v8467_v3  ;;  %v10626_v29 = vunpack.c.l.bf16 %v8895_v20  ;;  %v10624_v31 = vunpack.c.h.bf16 %v8895_v20  ;;  %v10622_v32 = vunpack.c.l.bf16 %v8901_v22  ;;  %v471_v35 = vrot.slane %v334_v23, 1  ;;  %v8946_v51 = vld [vmem:[%s8859_s23 + $0x44] sm:$0x1]  ;;  %v8953_v56 = vld [vmem:[%s8859_s23 + $0x48] sm:$0xff]   ;;  %v8956_v57 = vld [vmem:[%s8859_s23 + $0x50] sm:$0x1] }
  0x21   : > { %v468_v13 = vsel %vm465_vm0, %v466_v9, %v467_v10  ;;  %v470_v14 = vsel %vm465_vm0, %v467_v10, %v469_v11  ;;  %v472_v36 = vrot.slane %v335_v24, 1  ;;  %v474_v37 = vrot.slane %v336_v25, 1  ;;  %v8968_v63 = vld [vmem:[%s8859_s23 + $0x5c] sm:$0x1]  ;;  %v8977_v9 = vld [vmem:[%s8859_s23 + $0x54] sm:$0xff]   ;;  %v8980_v10 = vld [vmem:[%s8859_s23 + $0x60] sm:$0xff]  }
  0x22   : > { %v578_v16 = vpack.c.bf16 %v470_v14, %v468_v13  ;;  %v476_v38 = vrot.slane %v10631_v26, 1  ;;  %v477_v39 = vrot.slane %v10628_v27, 1  ;;  %v479_v40 = vrot.slane %v10627_v28, 1  ;;  %v8987_v14 = vld [vmem:[%s8859_s23 + $0x68] sm:$0x1] }
  0x23   : > { %7033 = vmatpush3.bf16.msra.mxu0 %v8467_v3  ;;  %v481_v41 = vrot.slane %v10626_v29, 1  ;;  %v10619_v42 = vunpack.c.l.bf16 %v8915_v33  ;;  %v482_v44 = vrot.slane %v10624_v31, 1  ;;  %v484_v45 = vrot.slane %v10622_v32, 1  ;;  %v9074_v31 = vld [vmem:[%s8859_s23 + $0xa4] sm:$0x1]  ;;  %v9087_v7 = vld [vmem:[%s8859_s23 + $0xa8] sm:$0xff]  }
  0x24   : > { %7034 = vmatprep.subr.bf16.mxu0 %v8468_v12  ;;  %7042 = vmatprep.mubr.bf16.mxu0 %v578_v16  ;;  %v10618_v46 = vunpack.c.h.bf16 %v8915_v33  ;;  %v10617_v47 = vunpack.c.l.bf16 %v8918_v34  ;;  %v8941_v49 = vrot.slane %v334_v23, 2  ;;  %v8943_v50 = vrot.slane %v335_v24, 2  ;;  %v8996_v24 = vld [vmem:[%s8859_s23 + $0x6c] sm:$0xff]  }
  0x25   : > { %v473_v52 = vsel %vm465_vm0, %v471_v35, %v472_v36  ;;  %v475_v53 = vsel %vm465_vm0, %v472_v36, %v474_v37  ;;  %v10616_v54 = vunpack.c.l.bf16 %v8930_v43  ;;  %v10613_v55 = vunpack.c.h.bf16 %v8930_v43  ;;  %v8473_v35 = vld [vmem:[%s10604_s1 + $0x8] sm:$0xff]  }
  0x26   : > { %v8958_v58 = vrot.slane %v336_v25, 2  ;;  %v478_v60 = vsel %vm465_vm0, %v476_v38, %v477_v39  ;;  %v480_v61 = vsel %vm465_vm0, %v477_v39, %v479_v40  ;;  %v486_v62 = vrot.slane %v10619_v42, 1  ;;  %v9008_v38 = vld [vmem:[%s8859_s23 + $0x74] sm:$0x1] }
  0x27   : > { %7035 = vmatpush3.bf16.msra.mxu0 %v8468_v12  ;;  %v483_v0 = vsel %vm465_vm0, %v481_v41, %v482_v44  ;;  %v485_v1 = vsel %vm465_vm0, %v482_v44, %v484_v45  ;;  %v487_v2 = vrot.slane %v10618_v46, 1  ;;  %v489_v3 = vrot.slane %v10617_v47, 1  ;;  %v9015_v45 = vld [vmem:[%s8859_s23 + $0x78] sm:$0xff]  }
  0x28   : > { %7036 = vmatprep.subr.bf16.mxu0 %v8469_v21  ;;  %v8982_v11 = vpack.c.bf16 %v475_v53, %v473_v52  ;;  %v10612_v12 = vunpack.c.l.bf16 %v8946_v51  ;;  %v10611_v13 = vunpack.c.l.bf16 %v8953_v56  ;;  %v491_v16 = vrot.slane %v10616_v54, 1  ;;  %v9055_v46 = vld [vmem:[%s8859_s23 + $0x98] sm:$0x1] }
  0x29   : > { %v492_v17 = vrot.slane %v10613_v55, 1  ;;  %v10615_v23 = vunpack.c.l.bf16 %v8956_v57  ;;  %v8998_v25 = vpack.c.bf16 %v480_v61, %v478_v60  ;;  %v10620_v36 = vunpack.c.l.bf16 %v8977_v9  ;;  %v9024_v61 = vld [vmem:[%s8859_s23 + $0x80] sm:$0x1] }
  0x2a   : > { %10664 = vst [vmem:[#allocation7_spill] sm:$0xff] %v8982_v11  ;;  %v10621_v37 = vunpack.c.h.bf16 %v8977_v9  ;;  %v488_v39 = vsel %vm465_vm0, %v486_v62, %v487_v2  ;;  %v490_v40 = vsel %vm465_vm0, %v487_v2, %v489_v3  ;;  %v10623_v41 = vunpack.c.l.bf16 %v8968_v63  ;;  %v9033_v3 = vld [vmem:[%s8859_s23 + $0x84] sm:$0xff]  }
  0x2b   : > { %7037 = vmatpush3.bf16.msra.mxu0 %v8469_v21  ;;  %v10614_v21 = vunpack.c.h.bf16 %v8953_v56  ;;  %10665 = vst [vmem:[#allocation8_spill] sm:$0xff] %v8998_v25  ;;  %v10625_v44 = vunpack.c.l.bf16 %v8980_v10  ;;  %v494_v52 = vrot.slane %v10612_v12, 1  ;;  %v10629_v53 = vunpack.c.h.bf16 %v8980_v10  ;;  %v9039_v12 = vld [vmem:[%s8859_s23 + $0x90] sm:$0xff]  }
  0x2c   : > { %7038 = vmatprep.subr.bf16.mxu0 %v8470_v30  ;;  %v10630_v60 = vunpack.c.l.bf16 %v8987_v14  ;;  %v10634_v2 = vunpack.c.h.bf16 %v8996_v24  ;;  %v9042_v55 = vpack.c.bf16 %v490_v40, %v488_v39  ;;  %v501_v54 = vrot.slane %v10620_v36, 1  ;;  %v9065_v36 = vld [vmem:[%s8859_s23 + $0x9c] sm:$0xff]  }
  0x2d   : > { %v497_v62 = vrot.slane %v10614_v21, 1  ;;  %v9045_v21 = vsel %vm465_vm0, %v491_v16, %v492_v17  ;;  %v502_v47 = vrot.slane %v10621_v37, 1  ;;  %v504_v16 = vrot.slane %v10623_v41, 1 }
  0x2e   : > { %10667 = vst [vmem:[#allocation10_spill] sm:$0xff] %v9042_v55  ;;  %v506_v39 = vrot.slane %v10625_v44, 1  ;;  %v10637_v40 = vunpack.c.l.bf16 %v9008_v38  ;;  %v10638_v42 = vunpack.c.l.bf16 %v9015_v45  ;;  %v507_v37 = vrot.slane %v10629_v53, 1 }
  0x2f   : > { %7039 = vmatpush3.bf16.msra.mxu0 %v8470_v30  ;;  %v9000_v30 = vpack.c.bf16 %v485_v1, %v483_v0  ;;  %v499_v0 = vrot.slane %v10615_v23, 1  ;;  %v10635_v1 = vunpack.c.l.bf16 %v8996_v24  ;;  %v8474_v23 = vld [vmem:[%s10604_s1 + $0x10] sm:$0xff]   ;;  %v10639_v32 = vunpack.c.h.bf16 %v9015_v45 }
  0x30   : > { %7040 = vmatprep.subr.bf16.mxu0 %v8471_v48  ;;  %v10640_v41 = vunpack.c.l.bf16 %v9024_v61  ;;  %v495_v44 = vsel %vm465_vm0, %v492_v17, %v494_v52  ;;  %v512_v27 = vrot.slane %v10634_v2, 1  ;;  %v10641_v53 = vunpack.c.l.bf16 %v9033_v3  ;;  %v8475_v17 = vld [vmem:[%s10604_s1 + $0x18] sm:$0xff]  }
  0x31   : > { %10666 = vst [vmem:[#allocation9_spill] sm:$0xff] %v9000_v30  ;;  %v511_v28 = vrot.slane %v10635_v1, 1  ;;  %v514_v52 = vrot.slane %v10637_v40, 1  ;;  %v517_v6 = vrot.slane %v10639_v32, 1  ;;  %v500_v40 = vsel %vm465_vm0, %v497_v62, %v499_v0  ;;  %v8476_v32 = vld [vmem:[%s10604_s1 + $0x20] sm:$0xff]  }
  0x32   : > { %v10668_v26 = vunpack.c.h.bf16 %v9033_v3  ;;  %v10670_v2 = vunpack.c.l.bf16 %v9039_v12  ;;  %v505_v8 = vsel %vm465_vm0, %v502_v47, %v504_v16  ;;  %v10671_v1 = vunpack.c.h.bf16 %v9039_v12 }
  0x33   : > { %7041 = vmatpush3.bf16.msra.mxu0 %v8471_v48  ;;  %v496_v48 = vrot.slane %v10611_v13, 1  ;;  %v9036_v13 = vld [vmem:[%s8859_s23 + $0x8c] sm:$0x1] }
  0x34   : > { %7074 = vmatprep.subr.bf16.mxu0 %v8472_v59 }
  0x35   : > { %v498_v29 = vsel %vm465_vm0, %v496_v48, %v497_v62  ;;  %v516_v48 = vrot.slane %v10638_v42, 1  ;;  %v9118_v62 = vrot.slane %v10668_v26, 1  ;;  %v9126_v42 = vrot.slane %v10670_v2, 1 }
  0x36   : > { %7043 = vmatmul.mubr.bf16.vlgmr.msra.gmra.mrb[0].mxu0 %v8982_v11  ;;  %v10672_v26 = vunpack.c.l.bf16 %v9055_v46  ;;  %v513_v2 = vsel %vm465_vm0, %v511_v28, %v512_v27  ;;  %v10676_v28 = vunpack.c.l.bf16 %v9087_v7 }
  0x37   : > { %7075 = vmatpush3.bf16.msra.mxu0 %v8472_v59  ;;  %7046 = vmatprep.mubr.bf16.mxu0 %v8998_v25  ;;  %v509_v59 = vrot.slane %v10630_v60, 1  ;;  %v503_v60 = vsel %vm465_vm0, %v501_v54, %v502_v47  ;;  %v10669_v54 = vunpack.c.l.bf16 %v9036_v13  ;;  %v10674_v47 = vunpack.c.h.bf16 %v9065_v36 }
  0x38   : > { %7076 = vmatprep.subr.bf16.mxu0 %v8473_v35  ;;  %v9137_v25 = vrot.slane %v10672_v26, 1  ;;  %v10675_v26 = vunpack.c.l.bf16 %v9074_v31 }
  0x39   : > { %v9122_v0 = vrot.slane %v10669_v54, 1  ;;  %v510_v54 = vsel %vm465_vm0, %v507_v37, %v509_v59  ;;  %v9147_v16 = vrot.slane %v10674_v47, 1  ;;  %v9160_v59 = vrot.slane %v10676_v28, 1 }
  0x3a   : > { %v9155_v11 = vrot.slane %v10675_v26, 1  ;;  %v518_v47 = vsel %vm465_vm0, %v516_v48, %v517_v6  ;;  %v9172_v26 = vpack.c.bf16 %v505_v8, %v503_v60 }
  0x3b   : > { %7077 = vmatpush3.bf16.msra.mxu0 %v8473_v35  ;;  %v519_v35 = vrot.slane %v10640_v41, 1  ;;  %v9114_v41 = vrot.slane %v10641_v53, 1  ;;  %v508_v53 = vsel %vm465_vm0, %v506_v39, %v507_v37  ;;  %v9150_v39 = vld [vmem:[%s8859_s23 + $0xb0] sm:$0x1] }
  0x3c   : > { %7078 = vmatprep.subr.bf16.mxu0 %v8474_v23  ;;  %v9174_v37 = vpack.c.bf16 %v510_v54, %v508_v53  ;;  %v10681_v53 = vunpack.c.h.bf16 %v8865_v4  ;;  %v10683_v54 = vunpack.c.l.bf16 %v8889_v18 }
  0x3d   : > { %v520_v15 = vsel %vm465_vm0, %v517_v6, %v519_v35  ;;  %v10679_v6 = vunpack.c.h.bf16 %v9087_v7  ;;  %v1039_v35 = vsel %vm1029_vm1, %v8943_v50, %v8958_v58  ;;  %v10686_v58 = vunpack.c.l.bf16 %v8895_v20 }
  0x3e   : > { %7047 = vmatmul.mubr.bf16.gmra.mrb[4].mxu0 %v9000_v30  ;;  %v9133_v30 = vrot.slane %v10671_v1, 1  ;;  %v515_v1 = vsel %vm465_vm0, %v512_v27, %v514_v52  ;;  %v8477_v27 = vld [vmem:[%s10604_s1 + $0x28] sm:$0xff]   ;;  %v9170_v52 = vpack.c.bf16 %v500_v40, %v498_v29  ;;  %v10680_v29 = vunpack.c.l.bf16 %v8865_v4 }
  0x3f   : > { %7050 = vmatprep.mubr.bf16.mxu0 %v9042_v55  ;;  %7079 = vmatpush3.bf16.msra.mxu0 %v8474_v23  ;;  %v10673_v55 = vunpack.c.l.bf16 %v9065_v36  ;;  %v9176_v28 = vpack.c.bf16 %v515_v1, %v513_v2  ;;  %v9183_v48 = vrot.slane %v10679_v6, 1  ;;  %v1031_v60 = vrot.slane %v10681_v53, 2 }
  0x40   : > { %7080 = vmatprep.subr.bf16.mxu0 %v8475_v17  ;;  %10678 = vst [vmem:[#allocation12_spill] sm:$0xff] %v9170_v52  ;;  %v1030_v8 = vrot.slane %v10680_v29, 2  ;;  %v10682_v40 = vunpack.c.l.bf16 %v8868_v5  ;;  %v1040_v2 = vrot.slane %v10683_v54, 2  ;;  %v10684_v1 = vunpack.c.h.bf16 %v8889_v18 }
  0x41   : > { %v9143_v23 = vrot.slane %v10673_v55, 1  ;;  %v9163_v55 = vpack.c.bf16 %v495_v44, %v9045_v21  ;;  %v9178_v21 = vpack.c.bf16 %v520_v15, %v518_v47  ;;  %v1037_v15 = vsel %vm1029_vm1, %v8941_v49, %v8943_v50  ;;  %v8478_v49 = vld [vmem:[%s10604_s1 + $0x30] sm:$0xff]  }
  0x42   : > { %v1041_v47 = vrot.slane %v10684_v1, 2  ;;  %v10685_v5 = vunpack.c.l.bf16 %v8892_v19  ;;  %v9214_v50 = vpack.c.bf16 %v1039_v35, %v1037_v15  ;;  %v1045_v53 = vrot.slane %v10686_v58, 2 }
  0x43   : > { %10677 = vst [vmem:[#allocation11_spill] sm:$0xff] %v9163_v55  ;;  %7081 = vmatpush3.bf16.msra.mxu0 %v8475_v17  ;;  %v1033_v17 = vrot.slane %v10682_v40, 2  ;;  %v10687_v1 = vunpack.c.h.bf16 %v8895_v20  ;;  %v10689_v15 = vunpack.c.l.bf16 %v8915_v33  ;;  %v10690_v58 = vunpack.c.h.bf16 %v8915_v33 }
  0x44   : > { %7082 = vmatprep.subr.bf16.mxu0 %v8476_v32  ;;  %v1043_v6 = vrot.slane %v10685_v5, 2  ;;  %v1042_v40 = vsel %vm1029_vm1, %v1040_v2, %v1041_v47  ;;  %v8479_v2 = vld [vmem:[%s10604_s1 + $0x38] sm:$0xff]  }
  0x45   : > { %v9212_v29 = vsel %vm1029_vm1, %v1031_v60, %v1033_v17  ;;  %v1046_v5 = vrot.slane %v10687_v1, 2  ;;  %v1050_v35 = vrot.slane %v10689_v15, 2  ;;  %v1051_v44 = vrot.slane %v10690_v58, 2 }
  0x46   : > { %7051 = vmatmul.mubr.bf16.gmra.mrb[8].mxu0 %v9163_v55  ;;  %v1044_v54 = vsel %vm1029_vm1, %v1041_v47, %v1043_v6  ;;  %v10691_v6 = vunpack.c.l.bf16 %v8918_v34  ;;  %v10693_v1 = vunpack.c.h.bf16 %v8930_v43  ;;  %v10694_v58 = vunpack.c.l.bf16 %v8946_v51 }
  0x47   : > { %7054 = vmatprep.mubr.bf16.mxu0 %v9170_v52  ;;  %7083 = vmatpush3.bf16.msra.mxu0 %v8476_v32  ;;  %v9209_v32 = vsel %vm1029_vm1, %v1030_v8, %v1031_v60  ;;  %v9224_v8 = vpack.c.bf16 %v1044_v54, %v1042_v40  ;;  %v10688_v60 = vunpack.c.l.bf16 %v8901_v22  ;;  %v1047_v47 = vsel %vm1029_vm1, %v1045_v53, %v1046_v5 }
  0x48   : > { %7084 = vmatprep.subr.bf16.mxu0 %v8477_v27  ;;  %v1053_v40 = vrot.slane %v10691_v6, 2  ;;  %v10692_v22 = vunpack.c.l.bf16 %v8930_v43  ;;  %v1058_v19 = vrot.slane %v10694_v58, 2  ;;  %v10695_v52 = vunpack.c.l.bf16 %v8953_v56 }
  0x49   : > { %v1048_v17 = vrot.slane %v10688_v60, 2  ;;  %v1056_v60 = vrot.slane %v10693_v1, 2 }
  0x4a   : > { %v1055_v54 = vrot.slane %v10692_v22, 2  ;;  %v1060_v53 = vrot.slane %v10695_v52, 2  ;;  %v1054_v34 = vsel %vm1029_vm1, %v1051_v44, %v1053_v40  ;;  %v10696_v22 = vunpack.c.h.bf16 %v8953_v56 }
  0x4b   : > { %7085 = vmatpush3.bf16.msra.mxu0 %v8477_v27  ;;  %v1049_v15 = vsel %vm1029_vm1, %v1046_v5, %v1048_v17  ;;  %v1052_v27 = vsel %vm1029_vm1, %v1050_v35, %v1051_v44  ;;  %v9256_v5 = vld [vmem:[%s8859_s23 + $0xb4] sm:$0xff]   ;;  %v1059_v51 = vsel %vm1029_vm1, %v1056_v60, %v1058_v19  ;;  %v10697_v35 = vunpack.c.l.bf16 %v8956_v57  ;;  %v9276_v57 = vld [vmem:[%s10604_s1 + $0x80] sm:$0xff]  }
  0x4c   : > { %7086 = vmatprep.subr.bf16.mxu0 %v8478_v49  ;;  %v9248_v55 = vpack.c.bf16 %v1049_v15, %v1047_v47  ;;  %v1057_v6 = vsel %vm1029_vm1, %v1055_v54, %v1056_v60  ;;  %v1061_v1 = vrot.slane %v10696_v22, 2  ;;  %v9258_v17 = vpack.c.bf16 %v1054_v34, %v1052_v27 }
  0x4d   : > { %v1063_v52 = vrot.slane %v10697_v35, 2  ;;  %v10698_v47 = vunpack.c.l.bf16 %v8977_v9  ;;  %v9266_v44 = vpack.c.bf16 %v1059_v51, %v1057_v6  ;;  %v10699_v54 = vunpack.c.h.bf16 %v8977_v9 }
  0x4e   : > { %7055 = vmatmul.mubr.bf16.gmra.mrb[12].mxu0 %v9172_v26  ;;  %v1062_v40 = vsel %vm1029_vm1, %v1060_v53, %v1061_v1  ;;  %v10700_v27 = vunpack.c.l.bf16 %v8968_v63  ;;  %v10702_v6 = vunpack.c.h.bf16 %v8980_v10  ;;  %v10703_v22 = vunpack.c.l.bf16 %v8987_v14 }
  0x4f   : > { %v1065_v15 = vrot.slane %v10698_v47, 2  ;;  %7058 = vmatprep.mubr.bf16.mxu0 %v9174_v37  ;;  %7087 = vmatpush3.bf16.msra.mxu0 %v8478_v49  ;;  %v1066_v58 = vrot.slane %v10699_v54, 2  ;;  %v1064_v19 = vsel %vm1029_vm1, %v1061_v1, %v1063_v52  ;;  %v10701_v49 = vunpack.c.l.bf16 %v8980_v10 }
  0x50   : > { %v1068_v34 = vrot.slane %v10700_v27, 2  ;;  %7088 = vmatprep.subr.bf16.mxu0 %v8479_v2  ;;  %v1071_v53 = vrot.slane %v10702_v6, 2  ;;  %v1073_v51 = vrot.slane %v10703_v22, 2  ;;  %v9285_v35 = vpack.c.bf16 %v1064_v19, %v1062_v40 }
  0x51   : > { %v1070_v60 = vrot.slane %v10701_v49, 2  ;;  %v1067_v63 = vsel %vm1029_vm1, %v1065_v15, %v1066_v58  ;;  %v10704_v54 = vunpack.c.l.bf16 %v8996_v24  ;;  %v10705_v6 = vunpack.c.h.bf16 %v8996_v24 }
  0x52   : > { %v1069_v47 = vsel %vm1029_vm1, %v1066_v58, %v1068_v34  ;;  %v1074_v49 = vsel %vm1029_vm1, %v1071_v53, %v1073_v51  ;;  %v10706_v40 = vunpack.c.l.bf16 %v9150_v39  ;;  %v376_v15 = vunpack.c.l.bf16 %v9256_v5 }
  0x53   : > { %v1075_v27 = vrot.slane %v10704_v54, 2  ;;  %v9291_v1 = vpack.c.bf16 %v1069_v47, %v1067_v63  ;;  %v1072_v52 = vsel %vm1029_vm1, %v1070_v60, %v1071_v53  ;;  %v1076_v14 = vrot.slane %v10705_v6, 2  ;;  %7089 = vmatpush3.bf16.msra.mxu0 %v8479_v2  ;;  %v324_v2 = vld [vmem:[%s8859_s23 + $0xbc] sm:$0x1] }
  0x54   : > { %v539_v19 = vrot.slane %v10706_v40, 1  ;;  %v9300_v58 = vpack.c.bf16 %v1074_v49, %v1072_v52  ;;  %v10707_v34 = vunpack.c.l.bf16 %v9008_v38  ;;  %7122 = vmatprep.subr.bf16.mxu0 %v9276_v57  ;;  %v523_v24 = vsel %vm465_vm0, %v9114_v41, %v9118_v62 }
  0x55   : > { %v1077_v60 = vsel %vm1029_vm1, %v1075_v27, %v1076_v14  ;;  %v525_v53 = vsel %vm465_vm0, %v9118_v62, %v9122_v0  ;;  %v10708_v38 = vunpack.c.l.bf16 %v9015_v45  ;;  %v10709_v54 = vunpack.c.h.bf16 %v9015_v45 }
  0x56   : > { %v1078_v22 = vrot.slane %v10707_v34, 2  ;;  %7059 = vmatmul.mubr.bf16.gmra.mrb[16].mxu0 %v9176_v28  ;;  %v10710_v52 = vunpack.c.l.bf16 %v9024_v61  ;;  %v541_v49 = vrot.slane %v376_v15, 1  ;;  %v10711_v62 = vunpack.c.l.bf16 %v9033_v3 }
  0x57   : > { %v1080_v47 = vrot.slane %v10708_v38, 2  ;;  %v1081_v27 = vrot.slane %v10709_v54, 2  ;;  %7062 = vmatprep.mubr.bf16.mxu0 %v9178_v21  ;;  %v10712_v6 = vunpack.c.h.bf16 %v9033_v3  ;;  %v10713_v40 = vunpack.c.l.bf16 %v9036_v13 }
  0x58   : > { %v1079_v51 = vsel %vm1029_vm1, %v1076_v14, %v1078_v22  ;;  %v1083_v41 = vrot.slane %v10710_v52, 2  ;;  %v1085_v0 = vrot.slane %v10711_v62, 2  ;;  %v528_v22 = vsel %vm465_vm0, %v9126_v42, %v9133_v30 }
  0x59   : > { %v9315_v63 = vpack.c.bf16 %v1079_v51, %v1077_v60  ;;  %v1086_v14 = vrot.slane %v10712_v6, 2  ;;  %v1088_v34 = vrot.slane %v10713_v40, 2  ;;  %v530_v61 = vsel %vm465_vm0, %v9133_v30, %v9137_v25 }
  0x5a   : > { %v1082_v60 = vsel %vm1029_vm1, %v1080_v47, %v1081_v27  ;;  %v1084_v51 = vsel %vm1029_vm1, %v1081_v27, %v1083_v41  ;;  %v9342_v13 = vpack.c.bf16 %v525_v53, %v523_v24  ;;  %v377_v52 = vunpack.c.h.bf16 %v9256_v5 }
  0x5b   : > { %v9338_v38 = vpack.c.bf16 %v1084_v51, %v1082_v60  ;;  %v1087_v3 = vsel %vm1029_vm1, %v1085_v0, %v1086_v14  ;;  %v1089_v54 = vsel %vm1029_vm1, %v1086_v14, %v1088_v34  ;;  %v9347_v42 = vpack.c.bf16 %v530_v61, %v528_v22 }
  0x5c   : > { %v9345_v62 = vpack.c.bf16 %v1089_v54, %v1087_v3  ;;  %v378_v6 = vunpack.c.l.bf16 %v324_v2  ;;  %v533_v25 = vsel %vm465_vm0, %v9143_v23, %v9147_v16  ;;  %v535_v30 = vsel %vm465_vm0, %v9147_v16, %v9155_v11 }
  0x5d   : > { %v542_v47 = vrot.slane %v377_v52, 1  ;;  %v10714_v24 = vunpack.c.l.bf16 %v9039_v12  ;;  %v10715_v27 = vunpack.c.h.bf16 %v9039_v12  ;;  %v10716_v0 = vunpack.c.l.bf16 %v9055_v46 }
  0x5e   : > { %7063 = vmatmul.mubr.bf16.gmra.mrb[20].mxu0 %v9342_v13  ;;  %v544_v14 = vrot.slane %v378_v6, 1  ;;  %v10717_v23 = vunpack.c.l.bf16 %v9065_v36  ;;  %v10718_v11 = vunpack.c.h.bf16 %v9065_v36  ;;  %v10719_v34 = vunpack.c.l.bf16 %v9074_v31 }
  0x5f   : > { %v1090_v53 = vrot.slane %v10714_v24, 2  ;;  %v1091_v41 = vrot.slane %v10715_v27, 2  ;;  %v1093_v2 = vrot.slane %v10716_v0, 2  ;;  %7066 = vmatprep.mubr.bf16.mxu0 %v9347_v42  ;;  %v538_v12 = vsel %vm465_vm0, %v9160_v59, %v9183_v48 }
  0x60   : > { %v1095_v40 = vrot.slane %v10717_v23, 2  ;;  %v1096_v16 = vrot.slane %v10718_v11, 2  ;;  %v1098_v22 = vrot.slane %v10719_v34, 2  ;;  %v540_v46 = vsel %vm465_vm0, %v9183_v48, %v539_v19 }
  0x61   : > { %v1092_v61 = vsel %vm1029_vm1, %v1090_v53, %v1091_v41  ;;  %v1094_v60 = vsel %vm1029_vm1, %v1091_v41, %v1093_v2  ;;  %v9380_v54 = vpack.c.bf16 %v535_v30, %v533_v25  ;;  %v9384_v24 = vpack.c.bf16 %v540_v46, %v538_v12  ;;  %v8503_v12 = vld [vmem:[%s10604_s1 + $0xb8] sm:$0xff]   ;;  %v8504_v46 = vld [vmem:[%s10604_s1 + $0xc0] sm:$0xff]  }
  0x62   : > { %v9376_v51 = vpack.c.bf16 %v1094_v60, %v1092_v61  ;;  %v1097_v3 = vsel %vm1029_vm1, %v1095_v40, %v1096_v16  ;;  %v1099_v36 = vsel %vm1029_vm1, %v1096_v16, %v1098_v22  ;;  %v543_v59 = vsel %vm465_vm0, %v541_v49, %v542_v47  ;;  %v9442_v61 = vld [vmem:[%s8859_s23 + $0x6c] sm:$0xff]   ;;  %v9447_v60 = vld [vmem:[%s8859_s23 + $0x84] sm:$0xff]  }
  0x63   : > { %v9382_v31 = vpack.c.bf16 %v1099_v36, %v1097_v3  ;;  %v10720_v48 = vunpack.c.l.bf16 %v9087_v7  ;;  %v10721_v53 = vunpack.c.h.bf16 %v9087_v7  ;;  %v10722_v41 = vunpack.c.l.bf16 %v9150_v39  ;;  %v9450_v3 = vld [vmem:[%s8859_s23 + $0x90] sm:$0xff]   ;;  %v9455_v36 = vld [vmem:[%s8859_s23 + $0x9c] sm:$0xff]  }
  0x64   : > { %v545_v25 = vsel %vm465_vm0, %v542_v47, %v544_v14  ;;  %v1105_v30 = vrot.slane %v376_v15, 2  ;;  %v1106_v2 = vrot.slane %v377_v52, 2  ;;  %v1108_v23 = vrot.slane %v378_v6, 2  ;;  %v8485_v15 = vld [vmem:[%s10604_s1 + $0x88] sm:$0xff]   ;;  %v10723_v52 = vld [vmem:[#allocation6_spill] sm:$0xff] }
  0x65   : > { %v1100_v19 = vrot.slane %v10720_v48, 2  ;;  %v1101_v27 = vrot.slane %v10721_v53, 2  ;;  %v1103_v0 = vrot.slane %v10722_v41, 2  ;;  %v9402_v22 = vpack.c.bf16 %v545_v25, %v543_v59  ;;  %v8488_v6 = vld [vmem:[%s10604_s1 + $0x90] sm:$0xff]   ;;  %v8491_v47 = vld [vmem:[%s10604_s1 + $0x98] sm:$0xff]   ;;  %v8505_v48 = vld [vmem:[%s10604_s1 + $0xc8] sm:$0xff]  }
  0x66   : > { %7067 = vmatmul.mubr.bf16.gmra.mrb[24].mxu0 %v9380_v54  ;;  %v1107_v16 = vsel %vm1029_vm1, %v1105_v30, %v1106_v2  ;;  %v1109_v34 = vsel %vm1029_vm1, %v1106_v2, %v1108_v23  ;;  %v8500_v14 = vld [vmem:[%s10604_s1 + $0xb0] sm:$0xff]   ;;  %v10724_v59 = vpack.c.bf16 %v9212_v29, %v9209_v32  ;;  %v8507_v32 = vld [vmem:[%s10604_s1 + $0xd8] sm:$0xff]   ;;  %v8508_v29 = vld [vmem:[%s10604_s1 + $0xe0] sm:$0xff]  }
  0x67   : > { %7070 = vmatprep.mubr.bf16.mxu0 %v9384_v24  ;;  %v1102_v40 = vsel %vm1029_vm1, %v1100_v19, %v1101_v27  ;;  %v1104_v49 = vsel %vm1029_vm1, %v1101_v27, %v1103_v0  ;;  %v9404_v39 = vpack.c.bf16 %v1109_v34, %v1107_v16  ;;  %v8506_v19 = vld [vmem:[%s10604_s1 + $0xd0] sm:$0xff]   ;;  %v8509_v53 = vld [vmem:[%s10604_s1 + $0xe8] sm:$0xff]   ;;  %v8511_v41 = vld [vmem:[%s10604_s1 + $0xf8] sm:$0xff]  }
  0x68   : > { %v9398_v11 = vpack.c.bf16 %v1104_v49, %v1102_v40  ;;  %v8510_v27 = vld [vmem:[%s10604_s1 + $0xf0] sm:$0xff]   ;;  %v8512_v0 = vld [vmem:[%s10604_s1 + $0x100] sm:$0xff]   ;;  %v8513_v25 = vld [vmem:[%s10604_s1 + $0x108] sm:$0xff]  }
  0x69   : > { %v8514_v30 = vld [vmem:[%s10604_s1 + $0x110] sm:$0xff]   ;;  %v8515_v2 = vld [vmem:[%s10604_s1 + $0x118] sm:$0xff]   ;;  %v8516_v23 = vld [vmem:[%s10604_s1 + $0x120] sm:$0xff]  }
  0x6a   : > { %v8517_v40 = vld [vmem:[%s10604_s1 + $0x128] sm:$0xff]   ;;  %v8518_v49 = vld [vmem:[%s10604_s1 + $0x130] sm:$0xff]   ;;  %v8520_v16 = vld [vmem:[%s10604_s1 + $0x138] sm:$0xff]  }
  0x6b   : > { %v8521_v34 = vld [vmem:[%s10604_s1 + $0x140] sm:$0xff]  }
  0x6e   : > { %7071 = vmatmul.mubr.bf16.gmra.mrb[28].mxu0 %v9402_v22 }
  0x6f   : > { %7090 = vmatprep.mubr.bf16.mxu0 %v8865_v4  ;;  %v8494_v4 = vld [vmem:[%s10604_s1 + $0xa0] sm:$0xff]  }
  0x76   : > { %7091 = vmatmul.mubr.bf16.vlgmr.msra.gmra.mrb[0].mxu0 %v10723_v52 }
  0x77   : > { %7123 = vmatpush3.bf16.msra.mxu0 %v9276_v57  ;;  %7094 = vmatprep.mubr.bf16.mxu0 %v8889_v18  ;;  %v8497_v57 = vld [vmem:[%s10604_s1 + $0xa8] sm:$0xff]  }
  0x78   : > { %7124 = vmatprep.subr.bf16.mxu0 %v8485_v15 }
  0x7b   : > { %7125 = vmatpush3.bf16.msra.mxu0 %v8485_v15  ;;  %v9540_v15 = vld [vmem:[%s8859_s23 + $0xc0] sm:$0xff]  }
  0x7c   : > { %7126 = vmatprep.subr.bf16.mxu0 %v8488_v6 }
  0x7e   : > { %7095 = vmatmul.mubr.bf16.gmra.mrb[4].mxu0 %v8895_v20 }
  0x7f   : > { %7098 = vmatprep.mubr.bf16.mxu0 %v8915_v33  ;;  %7127 = vmatpush3.bf16.msra.mxu0 %v8488_v6  ;;  %v380_v6 = vunpack.c.h.bf16 %v9540_v15 }
  0x80   : > { %7128 = vmatprep.subr.bf16.mxu0 %v8491_v47 }
  0x83   : > { %7129 = vmatpush3.bf16.msra.mxu0 %v8491_v47  ;;  %v327_v47 = vld [vmem:[%s8859_s23 + $0xc8] sm:$0x1] }
  0x84   : > { %7130 = vmatprep.subr.bf16.mxu0 %v8494_v4 }
  0x86   : > { %7099 = vmatmul.mubr.bf16.gmra.mrb[8].mxu0 %v8930_v43 }
  0x87   : > { %7102 = vmatprep.mubr.bf16.mxu0 %v8953_v56  ;;  %7131 = vmatpush3.bf16.msra.mxu0 %v8494_v4 }
  0x88   : > { %7132 = vmatprep.subr.bf16.mxu0 %v8497_v57 }
  0x8b   : > { %7133 = vmatpush3.bf16.msra.mxu0 %v8497_v57  ;;  %v1945_v57 = vrot.slane %v380_v6, 2 }
  0x8c   : > { %7134 = vmatprep.subr.bf16.mxu0 %v8500_v14 }
  0x8e   : > { %7103 = vmatmul.mubr.bf16.gmra.mrb[12].mxu0 %v8977_v9 }
  0x8f   : > { %7106 = vmatprep.mubr.bf16.mxu0 %v8980_v10  ;;  %7135 = vmatpush3.bf16.msra.mxu0 %v8500_v14  ;;  %v381_v14 = vunpack.c.l.bf16 %v327_v47  ;;  %v1679_v47 = vrot.slane %v380_v6, 1  ;;  %v8531_v6 = vld [vmem:[%s10604_s1 + $0x190] sm:$0xff]  }
  0x90   : > { %7136 = vmatprep.subr.bf16.mxu0 %v8503_v12 }
  0x93   : > { %7137 = vmatpush3.bf16.msra.mxu0 %v8503_v12 }
  0x94   : > { %7170 = vmatprep.subr.bf16.mxu0 %v8504_v46 }
  0x96   : > { %7107 = vmatmul.mubr.bf16.gmra.mrb[16].mxu0 %v9442_v61 }
  0x97   : > { %7110 = vmatprep.mubr.bf16.mxu0 %v9015_v45 }
  0x9e   : > { %7111 = vmatmul.mubr.bf16.gmra.mrb[20].mxu0 %v9447_v60 }
  0x9f   : > { %7114 = vmatprep.mubr.bf16.mxu0 %v9450_v3 }
  0xa6   : > { %7115 = vmatmul.mubr.bf16.gmra.mrb[24].mxu0 %v9455_v36 }
  0xa7   : > { %7118 = vmatprep.mubr.bf16.mxu0 %v9087_v7 }
  0xae   : > { %7119 = vmatmul.mubr.bf16.gmra.mrb[28].mxu0 %v9256_v5 }
  0xaf   : > { %7138 = vmatprep.mubr.bf16.mxu0 %v10724_v59 }
  0xb6   : > { %7139 = vmatmul.mubr.bf16.vlgmr.msra.gmra.mrb[0].mxu0 %v9214_v50 }
  0xb7   : > { %7171 = vmatpush3.bf16.msra.mxu0 %v8504_v46  ;;  %7142 = vmatprep.mubr.bf16.mxu0 %v9224_v8  ;;  %v1947_v46 = vrot.slane %v381_v14, 2 }
  0xb8   : > { %7172 = vmatprep.subr.bf16.mxu0 %v8505_v48 }
  0xb9   : > { %v1948_v59 = vsel %vm1029_vm1, %v1945_v57, %v1947_v46 }
  0xbb   : > { %7173 = vmatpush3.bf16.msra.mxu0 %v8505_v48 }
  0xbc   : > { %7174 = vmatprep.subr.bf16.mxu0 %v8506_v19 }
  0xbe   : > { %7143 = vmatmul.mubr.bf16.gmra.mrb[4].mxu0 %v9248_v55 }
  0xbf   : > { %7146 = vmatprep.mubr.bf16.mxu0 %v9258_v17  ;;  %7175 = vmatpush3.bf16.msra.mxu0 %v8506_v19  ;;  %v10725_v19 = vld [vmem:[#allocation7_spill] sm:$0xff] }
  0xc0   : > { %7176 = vmatprep.subr.bf16.mxu0 %v8507_v32 }
  0xc3   : > { %7177 = vmatpush3.bf16.msra.mxu0 %v8507_v32  ;;  %v8522_v32 = vld [vmem:[%s10604_s1 + $0x148] sm:$0xff]  }
  0xc4   : > { %7178 = vmatprep.subr.bf16.mxu0 %v8508_v29 }
  0xc6   : > { %7147 = vmatmul.mubr.bf16.gmra.mrb[8].mxu0 %v9266_v44 }
  0xc7   : > { %7150 = vmatprep.mubr.bf16.mxu0 %v9285_v35  ;;  %7179 = vmatpush3.bf16.msra.mxu0 %v8508_v29  ;;  %v10726_v29 = vld [vmem:[#allocation8_spill] sm:$0xff] }
  0xc8   : > { %7180 = vmatprep.subr.bf16.mxu0 %v8509_v53 }
  0xcb   : > { %7181 = vmatpush3.bf16.msra.mxu0 %v8509_v53  ;;  %v10727_v53 = vld [vmem:[#allocation9_spill] sm:$0xff] }
  0xcc   : > { %7182 = vmatprep.subr.bf16.mxu0 %v8510_v27 }
  0xce   : > { %7151 = vmatmul.mubr.bf16.gmra.mrb[12].mxu0 %v9291_v1 }
  0xcf   : > { %7154 = vmatprep.mubr.bf16.mxu0 %v9300_v58  ;;  %7183 = vmatpush3.bf16.msra.mxu0 %v8510_v27  ;;  %v8523_v27 = vld [vmem:[%s10604_s1 + $0x150] sm:$0xff]  }
  0xd0   : > { %7184 = vmatprep.subr.bf16.mxu0 %v8511_v41 }
  0xd3   : > { %7185 = vmatpush3.bf16.msra.mxu0 %v8511_v41  ;;  %v8524_v41 = vld [vmem:[%s10604_s1 + $0x158] sm:$0xff]  }
  0xd4   : > { %7218 = vmatprep.subr.bf16.mxu0 %v8512_v0 }
  0xd6   : > { %7155 = vmatmul.mubr.bf16.gmra.mrb[16].mxu0 %v9315_v63 }
  0xd7   : > { %7158 = vmatprep.mubr.bf16.mxu0 %v9338_v38 }
  0xde   : > { %7159 = vmatmul.mubr.bf16.gmra.mrb[20].mxu0 %v9345_v62 }
  0xdf   : > { %7162 = vmatprep.mubr.bf16.mxu0 %v9376_v51 }
  0xe6   : > { %7163 = vmatmul.mubr.bf16.gmra.mrb[24].mxu0 %v9382_v31 }
  0xe7   : > { %7166 = vmatprep.mubr.bf16.mxu0 %v9398_v11 }
  0xee   : > { %7167 = vmatmul.mubr.bf16.gmra.mrb[28].mxu0 %v9404_v39 }
  0xef   : > { %7186 = vmatprep.mubr.bf16.mxu0 %v10723_v52  ;;  %v379_v52 = vunpack.c.l.bf16 %v9540_v15 }
  0xf1   : > { %v1944_v4 = vrot.slane %v379_v52, 2 }
  0xf3   : > { %v1946_v12 = vsel %vm1029_vm1, %v1944_v4, %v1945_v57  ;;  %v1681_v4 = vrot.slane %v381_v14, 1  ;;  %v8533_v14 = vld [vmem:[%s10604_s1 + $0x1a0] sm:$0xff]  }
  0xf4   : > { %v9549_v48 = vpack.c.bf16 %v1948_v59, %v1946_v12  ;;  %v8534_v59 = vld [vmem:[%s10604_s1 + $0x1a8] sm:$0xff]  }
  0xf5   : > { %v1682_v12 = vsel %vm465_vm0, %v1679_v47, %v1681_v4  ;;  %v8549_v4 = vld [vmem:[%s10604_s1 + $0x218] sm:$0xff]  }
  0xf6   : > { %7187 = vmatmul.mubr.bf16.vlgmr.msra.gmra.mrb[0].mxu0 %v8889_v18 }
  0xf7   : > { %7219 = vmatpush3.bf16.msra.mxu0 %v8512_v0  ;;  %7190 = vmatprep.mubr.bf16.mxu0 %v8895_v20  ;;  %v10728_v0 = vld [vmem:[#allocation10_spill] sm:$0xff] }
  0xf8   : > { %7220 = vmatprep.subr.bf16.mxu0 %v8513_v25 }
  0xfb   : > { %7221 = vmatpush3.bf16.msra.mxu0 %v8513_v25  ;;  %v10729_v25 = vld [vmem:[#allocation11_spill] sm:$0xff] }
  0xfc   : > { %7222 = vmatprep.subr.bf16.mxu0 %v8514_v30 }
  0xfe   : > { %7191 = vmatmul.mubr.bf16.gmra.mrb[4].mxu0 %v8915_v33 }
  0xff   : > { %7194 = vmatprep.mubr.bf16.mxu0 %v8930_v43  ;;  %7223 = vmatpush3.bf16.msra.mxu0 %v8514_v30  ;;  %v8525_v30 = vld [vmem:[%s10604_s1 + $0x160] sm:$0xff]  }
 0x100   : > { %7224 = vmatprep.subr.bf16.mxu0 %v8515_v2 }
 0x103   : > { %7225 = vmatpush3.bf16.msra.mxu0 %v8515_v2  ;;  %v8526_v2 = vld [vmem:[%s10604_s1 + $0x168] sm:$0xff]  }
 0x104   : > { %7226 = vmatprep.subr.bf16.mxu0 %v8516_v23 }
 0x106   : > { %7195 = vmatmul.mubr.bf16.gmra.mrb[8].mxu0 %v8953_v56 }
 0x107   : > { %7198 = vmatprep.mubr.bf16.mxu0 %v8977_v9  ;;  %7227 = vmatpush3.bf16.msra.mxu0 %v8516_v23  ;;  %v10730_v23 = vld [vmem:[#allocation12_spill] sm:$0xff] }
 0x108   : > { %7228 = vmatprep.subr.bf16.mxu0 %v8517_v40 }
 0x10b   : > { %7229 = vmatpush3.bf16.msra.mxu0 %v8517_v40  ;;  %v8527_v40 = vld [vmem:[%s10604_s1 + $0x170] sm:$0xff]  }
 0x10c   : > { %7230 = vmatprep.subr.bf16.mxu0 %v8518_v49 }
 0x10e   : > { %7199 = vmatmul.mubr.bf16.gmra.mrb[12].mxu0 %v8980_v10 }
 0x10f   : > { %7202 = vmatprep.mubr.bf16.mxu0 %v9442_v61  ;;  %7231 = vmatpush3.bf16.msra.mxu0 %v8518_v49  ;;  %v8528_v49 = vld [vmem:[%s10604_s1 + $0x178] sm:$0xff]  }
 0x110   : > { %7232 = vmatprep.subr.bf16.mxu0 %v8520_v16 }
 0x113   : > { %7233 = vmatpush3.bf16.msra.mxu0 %v8520_v16  ;;  %v8529_v16 = vld [vmem:[%s10604_s1 + $0x180] sm:$0xff]  }
 0x114   : > { %7266 = vmatprep.subr.bf16.mxu0 %v8521_v34 }
 0x116   : > { %7203 = vmatmul.mubr.bf16.gmra.mrb[16].mxu0 %v9015_v45 }
 0x117   : > { %7206 = vmatprep.mubr.bf16.mxu0 %v9447_v60 }
 0x11e   : > { %7207 = vmatmul.mubr.bf16.gmra.mrb[20].mxu0 %v9450_v3 }
 0x11f   : > { %7210 = vmatprep.mubr.bf16.mxu0 %v9455_v36 }
 0x126   : > { %7211 = vmatmul.mubr.bf16.gmra.mrb[24].mxu0 %v9087_v7 }
 0x127   : > { %7214 = vmatprep.mubr.bf16.mxu0 %v9256_v5 }
 0x12e   : > { %7215 = vmatmul.mubr.bf16.gmra.mrb[28].mxu0 %v9540_v15 }
 0x12f   : > { %7234 = vmatprep.mubr.bf16.mxu0 %v10725_v19  ;;  %v8535_v19 = vld [vmem:[%s10604_s1 + $0x1b0] sm:$0xff]  }
 0x136   : > { %7235 = vmatmul.mubr.bf16.vlgmr.msra.gmra.mrb[0].mxu0 %v10726_v29 }
 0x137   : > { %7267 = vmatpush3.bf16.msra.mxu0 %v8521_v34  ;;  %7238 = vmatprep.mubr.bf16.mxu0 %v10727_v53  ;;  %v1678_v34 = vrot.slane %v379_v52, 1  ;;  %v8530_v52 = vld [vmem:[%s10604_s1 + $0x188] sm:$0xff]  }
 0x138   : > { %7268 = vmatprep.subr.bf16.mxu0 %v8522_v32 }
 0x139   : > { %v1680_v57 = vsel %vm465_vm0, %v1678_v34, %v1679_v47  ;;  %v8547_v47 = vld [vmem:[%s10604_s1 + $0x208] sm:$0xff]  }
 0x13a   : > { %v9593_v46 = vpack.c.bf16 %v1682_v12, %v1680_v57 }
 0x13b   : > { %7269 = vmatpush3.bf16.msra.mxu0 %v8522_v32  ;;  %v8536_v32 = vld [vmem:[%s10604_s1 + $0x1b8] sm:$0xff]  }
 0x13c   : > { %7270 = vmatprep.subr.bf16.mxu0 %v8523_v27 }
 0x13e   : > { %7239 = vmatmul.mubr.bf16.gmra.mrb[4].mxu0 %v10728_v0 }
 0x13f   : > { %7242 = vmatprep.mubr.bf16.mxu0 %v10729_v25  ;;  %7271 = vmatpush3.bf16.msra.mxu0 %v8523_v27  ;;  %v8537_v27 = vld [vmem:[%s10604_s1 + $0x1c0] sm:$0xff]  }
 0x140   : > { %7272 = vmatprep.subr.bf16.mxu0 %v8524_v41 }
 0x143   : > { %7273 = vmatpush3.bf16.msra.mxu0 %v8524_v41  ;;  %v8538_v41 = vld [vmem:[%s10604_s1 + $0x1c8] sm:$0xff]  }
 0x144   : > { %7274 = vmatprep.subr.bf16.mxu0 %v8525_v30 }
 0x146   : > { %7243 = vmatmul.mubr.bf16.gmra.mrb[8].mxu0 %v10730_v23 }
 0x147   : > { %7246 = vmatprep.mubr.bf16.mxu0 %v9172_v26  ;;  %7275 = vmatpush3.bf16.msra.mxu0 %v8525_v30  ;;  %v8539_v30 = vld [vmem:[%s10604_s1 + $0x1d0] sm:$0xff]  }
 0x148   : > { %7276 = vmatprep.subr.bf16.mxu0 %v8526_v2 }
 0x14b   : > { %7277 = vmatpush3.bf16.msra.mxu0 %v8526_v2 }
 0x14c   : > { %7278 = vmatprep.subr.bf16.mxu0 %v8527_v40 }
 0x14e   : > { %7247 = vmatmul.mubr.bf16.gmra.mrb[12].mxu0 %v9174_v37 }
 0x14f   : > { %7250 = vmatprep.mubr.bf16.mxu0 %v9176_v28  ;;  %7279 = vmatpush3.bf16.msra.mxu0 %v8527_v40 }
 0x150   : > { %7280 = vmatprep.subr.bf16.mxu0 %v8528_v49 }
 0x153   : > { %7281 = vmatpush3.bf16.msra.mxu0 %v8528_v49 }
 0x154   : > { %7314 = vmatprep.subr.bf16.mxu0 %v8529_v16 }
 0x156   : > { %7251 = vmatmul.mubr.bf16.gmra.mrb[16].mxu0 %v9178_v21 }
 0x157   : > { %7254 = vmatprep.mubr.bf16.mxu0 %v9342_v13 }
 0x15e   : > { %7255 = vmatmul.mubr.bf16.gmra.mrb[20].mxu0 %v9347_v42 }
 0x15f   : > { %7258 = vmatprep.mubr.bf16.mxu0 %v9380_v54 }
 0x166   : > { %7259 = vmatmul.mubr.bf16.gmra.mrb[24].mxu0 %v9384_v24 }
 0x167   : > { %7262 = vmatprep.mubr.bf16.mxu0 %v9402_v22 }
 0x16e   : > { %7263 = vmatmul.mubr.bf16.gmra.mrb[28].mxu0 %v9593_v46 }
 0x16f   : > { %7282 = vmatprep.mubr.bf16.mxu0 %v9214_v50  ;;  %v8532_v50 = vld [vmem:[%s10604_s1 + $0x198] sm:$0xff]  }
 0x176   : > { %7283 = vmatmul.mubr.bf16.vlgmr.msra.gmra.mrb[0].mxu0 %v9224_v8 }
 0x177   : > { %7315 = vmatpush3.bf16.msra.mxu0 %v8529_v16  ;;  %7286 = vmatprep.mubr.bf16.mxu0 %v9248_v55 }
 0x178   : > { %7316 = vmatprep.subr.bf16.mxu0 %v8530_v52 }
 0x17b   : > { %7317 = vmatpush3.bf16.msra.mxu0 %v8530_v52 }
 0x17c   : > { %7318 = vmatprep.subr.bf16.mxu0 %v8531_v6 }
 0x17e   : > { %7287 = vmatmul.mubr.bf16.gmra.mrb[4].mxu0 %v9258_v17 }
 0x17f   : > { %7290 = vmatprep.mubr.bf16.mxu0 %v9266_v44  ;;  %7319 = vmatpush3.bf16.msra.mxu0 %v8531_v6 }
 0x180   : > { %7320 = vmatprep.subr.bf16.mxu0 %v8532_v50 }
 0x183   : > { %7321 = vmatpush3.bf16.msra.mxu0 %v8532_v50 }
 0x184   : > { %7322 = vmatprep.subr.bf16.mxu0 %v8533_v14 }
 0x186   : > { %7291 = vmatmul.mubr.bf16.gmra.mrb[8].mxu0 %v9285_v35 }
 0x187   : > { %7294 = vmatprep.mubr.bf16.mxu0 %v9291_v1  ;;  %7323 = vmatpush3.bf16.msra.mxu0 %v8533_v14 }
 0x188   : > { %7324 = vmatprep.subr.bf16.mxu0 %v8534_v59 }
 0x18b   : > { %7325 = vmatpush3.bf16.msra.mxu0 %v8534_v59 }
 0x18c   : > { %7326 = vmatprep.subr.bf16.mxu0 %v8535_v19 }
 0x18e   : > { %7295 = vmatmul.mubr.bf16.gmra.mrb[12].mxu0 %v9300_v58 }
 0x18f   : > { %7298 = vmatprep.mubr.bf16.mxu0 %v9315_v63  ;;  %7327 = vmatpush3.bf16.msra.mxu0 %v8535_v19 }
 0x190   : > { %7328 = vmatprep.subr.bf16.mxu0 %v8536_v32 }
 0x193   : > { %7329 = vmatpush3.bf16.msra.mxu0 %v8536_v32 }
 0x194   : > { %7362 = vmatprep.subr.bf16.mxu0 %v8537_v27 }
 0x196   : > { %7299 = vmatmul.mubr.bf16.gmra.mrb[16].mxu0 %v9338_v38 }
 0x197   : > { %7302 = vmatprep.mubr.bf16.mxu0 %v9345_v62 }
 0x19e   : > { %7303 = vmatmul.mubr.bf16.gmra.mrb[20].mxu0 %v9376_v51 }
 0x19f   : > { %7306 = vmatprep.mubr.bf16.mxu0 %v9382_v31 }
 0x1a6   : > { %7307 = vmatmul.mubr.bf16.gmra.mrb[24].mxu0 %v9398_v11 }
 0x1a7   : > { %7310 = vmatprep.mubr.bf16.mxu0 %v9404_v39 }
 0x1ae   : > { %7311 = vmatmul.mubr.bf16.gmra.mrb[28].mxu0 %v9549_v48 }
 0x1af   : > { %7330 = vmatprep.mubr.bf16.mxu0 %v8889_v18  ;;  %v8540_v18 = vld [vmem:[%s10604_s1 + $0x1d8] sm:$0xff]  }
 0x1b6   : > { %7331 = vmatmul.mubr.bf16.vlgmr.msra.gmra.mrb[0].mxu0 %v8895_v20  ;;  %v8541_v20 = vld [vmem:[%s10604_s1 + $0x1e0] sm:$0xff]  }
 0x1b7   : > { %7363 = vmatpush3.bf16.msra.mxu0 %v8537_v27  ;;  %7334 = vmatprep.mubr.bf16.mxu0 %v8915_v33  ;;  %v8542_v33 = vld [vmem:[%s10604_s1 + $0x1e8] sm:$0xff]  }
 0x1b8   : > { %7364 = vmatprep.subr.bf16.mxu0 %v8538_v41 }
 0x1bb   : > { %7365 = vmatpush3.bf16.msra.mxu0 %v8538_v41 }
 0x1bc   : > { %7366 = vmatprep.subr.bf16.mxu0 %v8539_v30 }
 0x1be   : > { %7335 = vmatmul.mubr.bf16.gmra.mrb[4].mxu0 %v8930_v43  ;;  %v8543_v43 = vld [vmem:[%s10604_s1 + $0x1f0] sm:$0xff]  }
 0x1bf   : > { %7338 = vmatprep.mubr.bf16.mxu0 %v8953_v56  ;;  %7367 = vmatpush3.bf16.msra.mxu0 %v8539_v30  ;;  %v8545_v56 = vld [vmem:[%s10604_s1 + $0x1f8] sm:$0xff]  }
 0x1c0   : > { %7368 = vmatprep.subr.bf16.mxu0 %v8540_v18 }
 0x1c3   : > { %7369 = vmatpush3.bf16.msra.mxu0 %v8540_v18 }
 0x1c4   : > { %7370 = vmatprep.subr.bf16.mxu0 %v8541_v20 }
 0x1c6   : > { %7339 = vmatmul.mubr.bf16.gmra.mrb[8].mxu0 %v8977_v9  ;;  %v8546_v9 = vld [vmem:[%s10604_s1 + $0x200] sm:$0xff]  }
 0x1c7   : > { %7342 = vmatprep.mubr.bf16.mxu0 %v8980_v10  ;;  %7371 = vmatpush3.bf16.msra.mxu0 %v8541_v20  ;;  %v328_v10 = vld [vmem:[%s8859_s23 + $0xcc] sm:$0xff]  }
 0x1c8   : > { %7372 = vmatprep.subr.bf16.mxu0 %v8542_v33  ;;  %v383_v2 = vunpack.c.h.bf16 %v328_v10 }
 0x1ca   : > { %v2739_v49 = vrot.slane %v383_v2, 2 }
 0x1cb   : > { %7373 = vmatpush3.bf16.msra.mxu0 %v8542_v33 }
 0x1cc   : > { %7374 = vmatprep.subr.bf16.mxu0 %v8543_v43 }
 0x1ce   : > { %7343 = vmatmul.mubr.bf16.gmra.mrb[12].mxu0 %v9442_v61  ;;  %v382_v61 = vunpack.c.l.bf16 %v328_v10 }
 0x1cf   : > { %7346 = vmatprep.mubr.bf16.mxu0 %v9015_v45  ;;  %7375 = vmatpush3.bf16.msra.mxu0 %v8543_v43  ;;  %v330_v45 = vld [vmem:[%s8859_s23 + $0xd4] sm:$0x1]  ;;  %s6094_s23 = sshll.u32 %s270_s17, 4  ;;  %s10563_s23 = int_to_ptr.vmem [resolvable:$true] %s6094_s23 }
 0x1d0   : > { %7376 = vmatprep.subr.bf16.mxu0 %v8545_v56  ;;  %v2738_v40 = vrot.slane %v382_v61, 2  ;;  %v384_v16 = vunpack.c.l.bf16 %v330_v45  ;;  %s8689_s28 = scalar_lea.vmem %s10563_s23, 16  ;;  %p8696_p0 = scmp.lt.s32.totalorder %s10563_s23, %s8694_s29 }
 0x1d1   : > { %p8690_p11 = scmp.ne.s32.totalorder %s10563_s23, %s8689_s28  ;;  %p8697_p1 = scmp.lt.s32.totalorder %s8695_s8, %s8689_s28 }
 0x1d2   : > { %v9678_v34 = vsel %vm1029_vm1, %v2738_v40, %v2739_v49  ;;  %v2475_v57 = vrot.slane %v384_v16, 1 }
 0x1d3   : > { %7377 = vmatpush3.bf16.msra.mxu0 %v8545_v56  ;;  %p8691_p12 = pnand %p8690_p11, %p8835_p5  ;;  %p8698_p2 = por %p8697_p1, %p8696_p0 }
 0x1d4   : > { %7410 = vmatprep.subr.bf16.mxu0 %v8546_v9 }
 0x1d5   : > { %p8692_p13 = pneg %p8691_p12 }
 0x1d6   : > { %7347 = vmatmul.mubr.bf16.gmra.mrb[16].mxu0 %v9447_v60  ;;  %v2741_v60 = vrot.slane %v384_v16, 2 }
 0x1d7   : > { %7350 = vmatprep.mubr.bf16.mxu0 %v9450_v3  ;;  %p8699_p3 = pnand %p8698_p2, %p8692_p13 }
 0x1d8   : > { %v9681_v3 = vsel %vm1029_vm1, %v2739_v49, %v2741_v60 }
 0x1de   : > { %7351 = vmatmul.mubr.bf16.gmra.mrb[20].mxu0 %v9455_v36  ;;  %v8554_v36 = vld [vmem:[%s10606_s3 + $0x40] sm:$0xff]  }
 0x1df   : > { %7354 = vmatprep.mubr.bf16.mxu0 %v9087_v7  ;;  %v2745_v7 = vpack.c.bf16 %v9681_v3, %v9678_v34  ;;  %7458 = vmatprep.subr.bf16.mxu1 %v8554_v36 }
 0x1e0   : > { %7459 = vmatpush3.bf16.msra.mxu1 %v8554_v36 }
 0x1e6   : > { %7355 = vmatmul.mubr.bf16.gmra.mrb[24].mxu0 %v9256_v5  ;;  %v8555_v5 = vld [vmem:[%s10606_s3 + $0x48] sm:$0xff]  }
 0x1e7   : > { %7358 = vmatprep.mubr.bf16.mxu0 %v9540_v15  ;;  %7460 = vmatprep.subr.bf16.mxu1 %v8555_v5  ;;  %v8556_v15 = vld [vmem:[%s10606_s3 + $0x50] sm:$0xff]  }
 0x1e8   : > { %7461 = vmatpush3.bf16.msra.mxu1 %v8555_v5 }
 0x1e9   : > { %7462 = vmatprep.subr.bf16.mxu1 %v8556_v15 }
 0x1ec   : > { %7463 = vmatpush3.bf16.msra.mxu1 %v8556_v15 }
 0x1ee   : > { %7359 = vmatmul.mubr.bf16.gmra.mrb[28].mxu0 %v328_v10 }
 0x1ef   : > { %7378 = vmatprep.mubr.bf16.mxu0 %v10726_v29  ;;  %v8548_v29 = vld [vmem:[%s10604_s1 + $0x210] sm:$0xff]  }
 0x1f6   : > { %7379 = vmatmul.mubr.bf16.vlgmr.msra.gmra.mrb[0].mxu0 %v10727_v53  ;;  %v8550_v53 = vld [vmem:[%s10604_s1 + $0x220] sm:$0xff]  }
 0x1f7   : > { %7411 = vmatpush3.bf16.msra.mxu0 %v8546_v9  ;;  %7382 = vmatprep.mubr.bf16.mxu0 %v10728_v0  ;;  %v8551_v0 = vld [vmem:[%s10604_s1 + $0x228] sm:$0xff]  }
 0x1f8   : > { %7412 = vmatprep.subr.bf16.mxu0 %v8547_v47 }
 0x1fb   : > { %7413 = vmatpush3.bf16.msra.mxu0 %v8547_v47 }
 0x1fc   : > { %7414 = vmatprep.subr.bf16.mxu0 %v8548_v29 }
 0x1fe   : > { %7383 = vmatmul.mubr.bf16.gmra.mrb[4].mxu0 %v10729_v25  ;;  %v8552_v25 = vld [vmem:[%s10604_s1 + $0x230] sm:$0xff]  }
 0x1ff   : > { %7386 = vmatprep.mubr.bf16.mxu0 %v10730_v23  ;;  %7415 = vmatpush3.bf16.msra.mxu0 %v8548_v29  ;;  %v8553_v23 = vld [vmem:[%s10604_s1 + $0x238] sm:$0xff]  }
 0x200   : > { %7416 = vmatprep.subr.bf16.mxu0 %v8549_v4 }
 0x203   : > { %7417 = vmatpush3.bf16.msra.mxu0 %v8549_v4 }
 0x204   : > { %7418 = vmatprep.subr.bf16.mxu0 %v8550_v53 }
 0x206   : > { %7387 = vmatmul.mubr.bf16.gmra.mrb[8].mxu0 %v9172_v26  ;;  %v2473_v26 = vrot.slane %v383_v2, 1 }
 0x207   : > { %7390 = vmatprep.mubr.bf16.mxu0 %v9174_v37  ;;  %7419 = vmatpush3.bf16.msra.mxu0 %v8550_v53  ;;  %v2472_v37 = vrot.slane %v382_v61, 1 }
 0x208   : > { %7420 = vmatprep.subr.bf16.mxu0 %v8551_v0 }
 0x20b   : > { %7421 = vmatpush3.bf16.msra.mxu0 %v8551_v0 }
 0x20c   : > { %7422 = vmatprep.subr.bf16.mxu0 %v8552_v25 }
 0x20e   : > { %7391 = vmatmul.mubr.bf16.gmra.mrb[12].mxu0 %v9176_v28  ;;  %v2474_v28 = vsel %vm465_vm0, %v2472_v37, %v2473_v26 }
 0x20f   : > { %7394 = vmatprep.mubr.bf16.mxu0 %v9178_v21  ;;  %7423 = vmatpush3.bf16.msra.mxu0 %v8552_v25  ;;  %v2476_v21 = vsel %vm465_vm0, %v2473_v26, %v2475_v57 }
 0x210   : > { %7424 = vmatprep.subr.bf16.mxu0 %v8553_v23  ;;  %v2479_v12 = vpack.c.bf16 %v2476_v21, %v2474_v28 }
 0x213   : > { %7425 = vmatpush3.bf16.msra.mxu0 %v8553_v23 }
 0x216   : > { %7395 = vmatmul.mubr.bf16.gmra.mrb[16].mxu0 %v9342_v13 }
 0x217   : > { %7398 = vmatprep.mubr.bf16.mxu0 %v9347_v42  ;;  %v9772_v42 = vld [vmem:[%s10606_s3] sm:$0xff]  }
 0x21e   : > { %7399 = vmatmul.mubr.bf16.gmra.mrb[20].mxu0 %v9380_v54 }
 0x21f   : > { %7402 = vmatprep.mubr.bf16.mxu0 %v9384_v24 }
 0x226   : > { %7403 = vmatmul.mubr.bf16.gmra.mrb[24].mxu0 %v9402_v22 }
 0x227   : > { %7406 = vmatprep.mubr.bf16.mxu0 %v9593_v46 }
 0x22e   : > { %7407 = vmatmul.mubr.bf16.gmra.mrb[28].mxu0 %v2479_v12 }
 0x22f   : > { %7426 = vmatprep.mubr.bf16.mxu0 %v9224_v8  ;;  %v8558_v8 = vld [vmem:[%s10606_s3 + $0x60] sm:$0xff]  }
 0x236   : > { %7427 = vmatmul.mubr.bf16.vlgmr.msra.gmra.mrb[0].mxu0 %v9248_v55  ;;  %v8557_v55 = vld [vmem:[%s10606_s3 + $0x58] sm:$0xff]  }
 0x237   : > { %7430 = vmatprep.mubr.bf16.mxu0 %v9258_v17  ;;  %7464 = vmatprep.subr.bf16.mxu1 %v8557_v55  ;;  %v8753_v17 = vmov 0.0  }
 0x238   : > { %7465 = vmatpush3.bf16.msra.mxu1 %v8557_v55  ;;  %3081 = vst [vmem:[#allocation2 + $0x30] sm:$0xff] %v8753_v17  ;;  %3082 = vst [vmem:[#allocation2 + $0x38] sm:$0xff] %v8753_v17  ;;  %7890 = vmatprep.subr.bf16.mxu0 %v8753_v17 }
 0x239   : > { %3075 = vst [vmem:[#allocation2] sm:$0xff] %v8753_v17  ;;  %3077 = vst [vmem:[#allocation2 + $0x10] sm:$0x3] %v8753_v17  ;;  %7466 = vmatprep.subr.bf16.mxu1 %v8558_v8 }
 0x23a   : > { %3078 = vst [vmem:[#allocation2 + $0x18] sm:$0xff] %v8753_v17  ;;  %3079 = vst [vmem:[#allocation2 + $0x20] sm:$0xff] %v8753_v17 }
 0x23b   : > { %3080 = vst [vmem:[#allocation2 + $0x28] sm:$0x3] %v8753_v17  ;;  %3083 = vst [vmem:[#allocation2 + $0x40] sm:$0x3] %v8753_v17 }
 0x23c   : > { %3084 = vst [vmem:[#allocation2 + $0x48] sm:$0xff] %v8753_v17  ;;  %3085 = vst [vmem:[#allocation2 + $0x50] sm:$0xff] %v8753_v17  ;;  %7467 = vmatpush3.bf16.msra.mxu1 %v8558_v8 }
 0x23d   : > { %3086 = vst [vmem:[#allocation2 + $0x58] sm:$0x3] %v8753_v17  ;;  %3087 = vst [vmem:[#allocation2 + $0x60] sm:$0xff] %v8753_v17 }
 0x23e   : > { %7431 = vmatmul.mubr.bf16.gmra.mrb[4].mxu0 %v9266_v44  ;;  %3088 = vst [vmem:[#allocation2 + $0x68] sm:$0xff] %v8753_v17  ;;  %3089 = vst [vmem:[#allocation2 + $0x70] sm:$0x3] %v8753_v17  ;;  %v8559_v44 = vld [vmem:[%s10606_s3 + $0x68] sm:$0xff]  }
 0x23f   : > { %7434 = vmatprep.mubr.bf16.mxu0 %v9285_v35  ;;  %3090 = vst [vmem:[#allocation2 + $0x78] sm:$0xff] %v8753_v17  ;;  %3091 = vst [vmem:[#allocation2 + $0x80] sm:$0xff] %v8753_v17  ;;  %7468 = vmatprep.subr.bf16.mxu1 %v8559_v44  ;;  %v8560_v35 = vld [vmem:[%s10606_s3 + $0x70] sm:$0xff]  }
 0x240   : > { %3092 = vst [vmem:[#allocation2 + $0x88] sm:$0x3] %v8753_v17  ;;  %3093 = vst [vmem:[#allocation2 + $0x90] sm:$0xff] %v8753_v17  ;;  %7469 = vmatpush3.bf16.msra.mxu1 %v8559_v44  ;;  %v8563_v44 = vld [vmem:[%s10606_s3 + $0x8] sm:$0xff]  }
 0x241   : > { %3094 = vst [vmem:[#allocation2 + $0x98] sm:$0xff] %v8753_v17  ;;  %3095 = vst [vmem:[#allocation2 + $0xa0] sm:$0x3] %v8753_v17  ;;  %7470 = vmatprep.subr.bf16.mxu1 %v8560_v35 }
 0x242   : > { %3096 = vst [vmem:[#allocation2 + $0xa8] sm:$0xff] %v8753_v17  ;;  %3097 = vst [vmem:[#allocation2 + $0xb0] sm:$0xff] %v8753_v17 }
 0x243   : > { %3098 = vst [vmem:[#allocation2 + $0xb8] sm:$0x3] %v8753_v17  ;;  %3099 = vst [vmem:[#allocation2 + $0xc0] sm:$0xff] %v8753_v17 }
 0x244   : > { %3100 = vst [vmem:[#allocation2 + $0xc8] sm:$0xff] %v8753_v17  ;;  %3101 = vst [vmem:[#allocation2 + $0xd0] sm:$0x3] %v8753_v17  ;;  %7471 = vmatpush3.bf16.msra.mxu1 %v8560_v35 }
 0x245   : > { %3102 = vst [vmem:[#allocation2 + $0xd8] sm:$0xff] %v8753_v17  ;;  %3103 = vst [vmem:[#allocation2 + $0xe0] sm:$0xff] %v8753_v17 }
 0x246   : > { %7435 = vmatmul.mubr.bf16.gmra.mrb[8].mxu0 %v9291_v1  ;;  %3104 = vst [vmem:[#allocation2 + $0xe8] sm:$0x3] %v8753_v17  ;;  %3105 = vst [vmem:[#allocation2 + $0xf0] sm:$0xff] %v8753_v17  ;;  %v9762_v1 = vld [vmem:[#allocation2 + $0x10] sm:$0x3] }
 0x247   : > { %7438 = vmatprep.mubr.bf16.mxu0 %v9300_v58  ;;  %3106 = vst [vmem:[#allocation2 + $0xf8] sm:$0xff] %v8753_v17  ;;  %3107 = vst [vmem:[#allocation2 + $0x100] sm:$0x3] %v8753_v17  ;;  %v8561_v58 = vld [vmem:[%s10606_s3 + $0x78] sm:$0xff]  }
 0x248   : > { %3108 = vst [vmem:[#allocation2 + $0x108] sm:$0xff] %v8753_v17  ;;  %3109 = vst [vmem:[#allocation2 + $0x110] sm:$0xff] %v8753_v17  ;;  %7472 = vmatprep.subr.bf16.mxu1 %v8561_v58 }
 0x249   : > { %3110 = vst [vmem:[#allocation2 + $0x118] sm:$0x3] %v8753_v17  ;;  %3111 = vst [vmem:[#allocation2 + $0x120] sm:$0xff] %v8753_v17  ;;  %7473 = vmatpush3.bf16.msra.mxu1 %v8561_v58 }
 0x24a   : > { %3112 = vst [vmem:[#allocation2 + $0x128] sm:$0xff] %v8753_v17  ;;  %3113 = vst [vmem:[#allocation2 + $0x130] sm:$0x3] %v8753_v17  ;;  %7506 = vmatprep.subr.bf16.mxu1 %v9772_v42 }
 0x24b   : > { %3114 = vst [vmem:[#allocation2 + $0x138] sm:$0xff] %v8753_v17  ;;  %3115 = vst [vmem:[#allocation2 + $0x140] sm:$0xff] %v8753_v17 }
 0x24c   : > { %3116 = vst [vmem:[#allocation2 + $0x148] sm:$0x3] %v8753_v17  ;;  %3117 = vst [vmem:[#allocation2 + $0x150] sm:$0xff] %v8753_v17 }
 0x24d   : > { %3118 = vst [vmem:[#allocation2 + $0x158] sm:$0xff] %v8753_v17  ;;  %3119 = vst [vmem:[#allocation2 + $0x160] sm:$0x3] %v8753_v17 }
 0x24e   : > { %7439 = vmatmul.mubr.bf16.gmra.mrb[12].mxu0 %v9315_v63  ;;  %3120 = vst [vmem:[#allocation2 + $0x168] sm:$0xff] %v8753_v17  ;;  %3121 = vst [vmem:[#allocation2 + $0x170] sm:$0xff] %v8753_v17  ;;  %v3296_v63 = vrot.slane %v8753_v17, 1 }
 0x24f   : > { %7442 = vmatprep.mubr.bf16.mxu0 %v9338_v38  ;;  %3122 = vst [vmem:[#allocation2 + $0x178] sm:$0x3] %v8753_v17  ;;  %3123 = vst [vmem:[#allocation2 + $0x180] sm:$0xff] %v8753_v17  ;;  %v3299_v38 = vrot.slane %v9762_v1, 1 }
 0x250   : > { %3124 = vst [vmem:[#allocation2 + $0x188] sm:$0xff] %v8753_v17  ;;  %3125 = vst [vmem:[#allocation2 + $0x190] sm:$0x3] %v8753_v17 }
 0x251   : > { %3128 = vst [vmem:[#allocation2 + $0x1a8] sm:$0x3] %v8753_v17  ;;  %v3300_v13 = vsel %vm465_vm0, %v3296_v63, %v3299_v38 }
 0x256   : > { %7443 = vmatmul.mubr.bf16.gmra.mrb[16].mxu0 %v9345_v62  ;;  %v3408_v62 = vpack.c.bf16 %v3300_v13, %v3296_v63 }
 0x257   : > { %7446 = vmatprep.mubr.bf16.mxu0 %v9376_v51  ;;  %v9778_v51 = vld [vmem:[%s10605_s2] ss:$0 sm:$0xff] }
 0x258   : > { %7474 = vmatprep.mubr.bf16.mxu1 %v3408_v62 }
 0x25e   : > { %7447 = vmatmul.mubr.bf16.gmra.mrb[20].mxu0 %v9382_v31 }
 0x25f   : > { %7450 = vmatprep.mubr.bf16.mxu0 %v9398_v11 }
 0x266   : > { %7451 = vmatmul.mubr.bf16.gmra.mrb[24].mxu0 %v9404_v39 }
 0x267   : > { %7454 = vmatprep.mubr.bf16.mxu0 %v9549_v48 }
 0x26e   : > { %7455 = vmatmul.mubr.bf16.gmra.mrb[28].mxu0 %v2745_v7 }
 0x309   : > { %v7428_v54 = vpop.f32.mrb[0].mxu0 }
 0x30a   : > { %v3013_v31 = vadd.f32 %v7428_v54, %v9778_v51  ;;  %v2845_v24 = vpop.f32.mrb[1].mxu0 }
 0x30b   : > { %v3011_v11 = vadd.f32 %v9778_v51, %v2845_v24  ;;  %v7429_v22 = vpop.f32.mrb[2].mxu0 }
 0x30c   : > { %v3045_v39 = vmax.f32 %v3013_v31, 0.0  ;;  %v3014_v48 = vadd.f32 %v7429_v22, %v9778_v51  ;;  %v2848_v46 = vpop.f32.mrb[3].mxu0 }
 0x30d   : > { %v3043_v52 = vmax.f32 %v3011_v11, 0.0  ;;  %v3012_v6 = vadd.f32 %v9778_v51, %v2848_v46 }
 0x30e   : > { %3132 = vst [vmem:[#allocation2 + $0x31] sm:$0xff] %v3045_v39  ;;  %v3046_v50 = vmax.f32 %v3014_v48, 0.0 }
 0x30f   : > { %3130 = vst [vmem:[#allocation2 + $0x19] sm:$0xff] %v3043_v52  ;;  %v3044_v14 = vmax.f32 %v3012_v6, 0.0 }
 0x310   : > { %3133 = vst [vmem:[#allocation2 + $0x39] sm:$0xff] %v3046_v50 }
 0x311   : > { %3131 = vst [vmem:[#allocation2 + $0x21] sm:$0xff] %v3044_v14  ;;  %v7432_v59 = vpop.f32.mrb[4].mxu0 }
 0x312   : > { %v3017_v19 = vadd.f32 %v7432_v59, %v9778_v51  ;;  %v2861_v32 = vpop.f32.mrb[5].mxu0 }
 0x313   : > { %v3015_v27 = vadd.f32 %v9778_v51, %v2861_v32  ;;  %v7433_v41 = vpop.f32.mrb[6].mxu0 }
 0x314   : > { %v3049_v30 = vmax.f32 %v3017_v19, 0.0  ;;  %v3018_v18 = vadd.f32 %v7433_v41, %v9778_v51  ;;  %v2864_v20 = vpop.f32.mrb[7].mxu0 }
 0x315   : > { %v3047_v33 = vmax.f32 %v3015_v27, 0.0  ;;  %v3016_v43 = vadd.f32 %v9778_v51, %v2864_v20  ;;  %v9788_v56 = vld [vmem:[#allocation2 + $0x30] sm:$0xff] }
 0x316   : > { %3136 = vst [vmem:[#allocation2 + $0x61] sm:$0xff] %v3049_v30  ;;  %v3050_v9 = vmax.f32 %v3018_v18, 0.0  ;;  %v3165_v10 = vld [vmem:[#allocation2 + $0x18] sm:$0xff]  ;;  %v3306_v40 = vrot.slane %v9788_v56, 1  ;;  %v3869_v35 = vrot.slane %v9788_v56, 2 }
 0x317   : > { %3134 = vst [vmem:[#allocation2 + $0x49] sm:$0xff] %v3047_v33  ;;  %v3048_v61 = vmax.f32 %v3016_v43, 0.0  ;;  %v9790_v2 = vld [vmem:[#allocation2 + $0x38] sm:$0xff]  ;;  %v9792_v45 = vld [vmem:[#allocation2 + $0x40] sm:$0x3]  ;;  %v3301_v34 = vrot.slane %v3165_v10, 1 }
 0x318   : > { %3137 = vst [vmem:[#allocation2 + $0x69] sm:$0xff] %v3050_v9  ;;  %v3166_v49 = vld [vmem:[#allocation2 + $0x20] sm:$0xff]  ;;  %v3167_v16 = vld [vmem:[#allocation2 + $0x28] sm:$0x3]  ;;  %v3307_v60 = vrot.slane %v9790_v2, 1  ;;  %v3309_v3 = vrot.slane %v9792_v45, 1  ;;  %v9799_v7 = vpack.c.bf16 %v9790_v2, %v9788_v56 }
 0x319   : > { %3135 = vst [vmem:[#allocation2 + $0x51] sm:$0xff] %v3048_v61  ;;  %v7436_v36 = vpop.f32.mrb[8].mxu0  ;;  %v3302_v5 = vrot.slane %v3166_v49, 1  ;;  %v3304_v15 = vrot.slane %v3167_v16, 1  ;;  %v3865_v47 = vrot.slane %v3166_v49, 2  ;;  %v3867_v29 = vrot.slane %v3167_v16, 2 }
 0x31a   : > { %v3021_v4 = vadd.f32 %v7436_v36, %v9778_v51  ;;  %v2877_v53 = vpop.f32.mrb[9].mxu0  ;;  %v3308_v0 = vsel %vm465_vm0, %v3306_v40, %v3307_v60  ;;  %v3310_v25 = vsel %vm465_vm0, %v3307_v60, %v3309_v3  ;;  %v9804_v23 = vpack.c.bf16 %v3166_v49, %v3165_v10 }
 0x31b   : > { %v3019_v37 = vadd.f32 %v9778_v51, %v2877_v53  ;;  %v7437_v26 = vpop.f32.mrb[10].mxu0  ;;  %v3303_v57 = vsel %vm465_vm0, %v3301_v34, %v3302_v5  ;;  %v3305_v28 = vsel %vm465_vm0, %v3302_v5, %v3304_v15  ;;  %v3864_v21 = vrot.slane %v3165_v10, 2  ;;  %v8565_v15 = vld [vmem:[%s10606_s3 + $0x18] sm:$0xff]  }
 0x31c   : > { %v3053_v12 = vmax.f32 %v3021_v4, 0.0  ;;  %v3022_v55 = vadd.f32 %v7437_v26, %v9778_v51  ;;  %v2880_v8 = vpop.f32.mrb[11].mxu0  ;;  %v9810_v17 = vpack.c.bf16 %v3305_v28, %v3303_v57  ;;  %v9817_v38 = vpack.c.bf16 %v3310_v25, %v3308_v0 }
 0x31d   : > { %v3051_v58 = vmax.f32 %v3019_v37, 0.0  ;;  %v3020_v63 = vadd.f32 %v9778_v51, %v2880_v8  ;;  %v9819_v13 = vld [vmem:[#allocation2 + $0x60] sm:$0xff]  ;;  %v3866_v62 = vsel %vm1029_vm1, %v3864_v21, %v3865_v47  ;;  %v3868_v11 = vsel %vm1029_vm1, %v3865_v47, %v3867_v29 }
 0x31e   : > { %3140 = vst [vmem:[#allocation2 + $0x91] sm:$0xff] %v3053_v12  ;;  %v3054_v54 = vmax.f32 %v3022_v55, 0.0  ;;  %7475 = vmatmul.mubr.bf16.vlgmr.msra.gmra.mrb[0].mxu1 %v9810_v17  ;;  %v9823_v31 = vld [vmem:[#allocation2 + $0x48] sm:$0xff]  ;;  %v3316_v24 = vrot.slane %v9819_v13, 1  ;;  %v3870_v22 = vrot.slane %v9790_v2, 2  ;;  %v9835_v6 = vpack.c.bf16 %v3868_v11, %v3866_v62 }
 0x31f   : > { %3138 = vst [vmem:[#allocation2 + $0x79] sm:$0xff] %v3051_v58  ;;  %v3052_v39 = vmax.f32 %v3020_v63, 0.0  ;;  %7478 = vmatprep.mubr.bf16.mxu1 %v9817_v38  ;;  %7507 = vmatpush3.bf16.msra.mxu1 %v9772_v42  ;;  %v3311_v48 = vrot.slane %v9823_v31, 1  ;;  %v9831_v46 = vld [vmem:[#allocation2 + $0x68] sm:$0xff]  ;;  %v9833_v52 = vld [vmem:[#allocation2 + $0x70] sm:$0x3] }
 0x320   : > { %v3872_v50 = vrot.slane %v9792_v45, 2  ;;  %3141 = vst [vmem:[#allocation2 + $0x99] sm:$0xff] %v3054_v54  ;;  %v3172_v14 = vld [vmem:[#allocation2 + $0x50] sm:$0xff]  ;;  %v3173_v59 = vld [vmem:[#allocation2 + $0x58] sm:$0x3]  ;;  %7508 = vmatprep.subr.bf16.mxu1 %v8563_v44  ;;  %v3317_v19 = vrot.slane %v9831_v46, 1  ;;  %v9845_v27 = vpack.c.bf16 %v9831_v46, %v9819_v13  ;;  %v3871_v41 = vsel %vm1029_vm1, %v3869_v35, %v3870_v22 }
 0x321   : > { %v3319_v32 = vrot.slane %v9833_v52, 1  ;;  %v8564_v42 = vld [vmem:[%s10606_s3 + $0x10] sm:$0xff]   ;;  %3139 = vst [vmem:[#allocation2 + $0x81] sm:$0xff] %v3052_v39  ;;  %v7440_v30 = vpop.f32.mrb[12].mxu0  ;;  %v3312_v18 = vrot.slane %v3172_v14, 1  ;;  %v3314_v20 = vrot.slane %v3173_v59, 1  ;;  %v9849_v33 = vpack.c.bf16 %v3172_v14, %v9823_v31 }
 0x322   : > { %v3873_v43 = vsel %vm1029_vm1, %v3870_v22, %v3872_v50  ;;  %v3025_v56 = vadd.f32 %v7440_v30, %v9778_v51  ;;  %v2893_v9 = vpop.f32.mrb[13].mxu0  ;;  %v3318_v10 = vsel %vm465_vm0, %v3316_v24, %v3317_v19  ;;  %v3874_v47 = vrot.slane %v9823_v31, 2  ;;  %v8566_v31 = vld [vmem:[%s10606_s3 + $0x20] sm:$0xff]  }
 0x323   : > { %v3320_v61 = vsel %vm465_vm0, %v3317_v19, %v3319_v32  ;;  %v9855_v2 = vpack.c.bf16 %v3873_v43, %v3871_v41  ;;  %v3023_v45 = vadd.f32 %v9778_v51, %v2893_v9  ;;  %v7441_v40 = vpop.f32.mrb[14].mxu0  ;;  %v3313_v49 = vsel %vm465_vm0, %v3311_v48, %v3312_v18  ;;  %7509 = vmatpush3.bf16.msra.mxu1 %v8563_v44 }
 0x324   : > { %v3315_v16 = vsel %vm465_vm0, %v3312_v18, %v3314_v20  ;;  %v9860_v34 = vpack.c.bf16 %v3320_v61, %v3318_v10  ;;  %v3057_v60 = vmax.f32 %v3025_v56, 0.0  ;;  %v3026_v3 = vadd.f32 %v7441_v40, %v9778_v51  ;;  %v2896_v36 = vpop.f32.mrb[15].mxu0  ;;  %7510 = vmatprep.subr.bf16.mxu1 %v8564_v42 }
 0x325   : > { %v9863_v5 = vpack.c.bf16 %v3315_v16, %v3313_v49  ;;  %v3055_v29 = vmax.f32 %v3023_v45, 0.0  ;;  %v3024_v4 = vadd.f32 %v9778_v51, %v2896_v36  ;;  %v9870_v53 = vld [vmem:[#allocation2 + $0x90] sm:$0xff]  ;;  %v3875_v0 = vrot.slane %v3172_v14, 2 }
 0x326   : > { %v3877_v25 = vrot.slane %v3173_v59, 2  ;;  %3144 = vst [vmem:[#allocation2 + $0xc1] sm:$0xff] %v3057_v60  ;;  %v3058_v37 = vmax.f32 %v3026_v3, 0.0  ;;  %v9873_v26 = vld [vmem:[#allocation2 + $0x78] sm:$0xff]  ;;  %v3326_v57 = vrot.slane %v9870_v53, 1  ;;  %v3879_v28 = vrot.slane %v9819_v13, 2 }
 0x327   : > { %7479 = vmatmul.mubr.bf16.gmra.mrb[4].mxu1 %v9863_v5  ;;  %v3880_v21 = vrot.slane %v9831_v46, 2  ;;  %3142 = vst [vmem:[#allocation2 + $0xa9] sm:$0xff] %v3055_v29  ;;  %v3056_v12 = vmax.f32 %v3024_v4, 0.0  ;;  %v3321_v55 = vrot.slane %v9873_v26, 1  ;;  %v9880_v8 = vld [vmem:[#allocation2 + $0x98] sm:$0xff]  ;;  %v3876_v35 = vsel %vm1029_vm1, %v3874_v47, %v3875_v0 }
 0x328   : > { %7482 = vmatprep.mubr.bf16.mxu1 %v9860_v34  ;;  %v9882_v44 = vld [vmem:[#allocation2 + $0xa0] sm:$0x3]  ;;  %7511 = vmatpush3.bf16.msra.mxu1 %v8564_v42  ;;  %v3878_v58 = vsel %vm1029_vm1, %v3875_v0, %v3877_v25  ;;  %3145 = vst [vmem:[#allocation2 + $0xc9] sm:$0xff] %v3058_v37  ;;  %v9888_v13 = vld [vmem:[#allocation2 + $0x88] sm:$0x3]  ;;  %v3327_v62 = vrot.slane %v9880_v8, 1  ;;  %v9897_v24 = vpack.c.bf16 %v9880_v8, %v9870_v53 }
 0x329   : > { %v9886_v63 = vld [vmem:[#allocation2 + $0x80] sm:$0xff]  ;;  %v3329_v54 = vrot.slane %v9882_v44, 1  ;;  %7512 = vmatprep.subr.bf16.mxu1 %v8565_v15  ;;  %v9899_v11 = vpack.c.bf16 %v3878_v58, %v3876_v35  ;;  %3143 = vst [vmem:[#allocation2 + $0xb1] sm:$0xff] %v3056_v12  ;;  %v7444_v22 = vpop.f32.mrb[16].mxu0  ;;  %v3324_v48 = vrot.slane %v9888_v13, 1  ;;  %v3881_v50 = vsel %vm1029_vm1, %v3879_v28, %v3880_v21  ;;  %v8568_v35 = vld [vmem:[%s10606_s3 + $0x30] sm:$0xff]  }
 0x32a   : > { %v3322_v39 = vrot.slane %v9886_v63, 1  ;;  %v9905_v46 = vpack.c.bf16 %v9886_v63, %v9873_v26  ;;  %v3029_v14 = vadd.f32 %v7444_v22, %v9778_v51  ;;  %v2909_v59 = vpop.f32.mrb[17].mxu0  ;;  %v3328_v19 = vsel %vm465_vm0, %v3326_v57, %v3327_v62 }
 0x32b   : > { %v3330_v32 = vsel %vm465_vm0, %v3327_v62, %v3329_v54  ;;  %v3882_v42 = vrot.slane %v9833_v52, 2  ;;  %v3027_v41 = vadd.f32 %v9778_v51, %v2909_v59  ;;  %v7445_v30 = vpop.f32.mrb[18].mxu0  ;;  %v8567_v52 = vld [vmem:[%s10606_s3 + $0x28] sm:$0xff]   ;;  %v3884_v3 = vrot.slane %v9873_v26, 2 }
 0x32c   : > { %v3323_v18 = vsel %vm465_vm0, %v3321_v55, %v3322_v39  ;;  %v3325_v20 = vsel %vm465_vm0, %v3322_v39, %v3324_v48  ;;  %v9915_v43 = vpack.c.bf16 %v3330_v32, %v3328_v19  ;;  %7513 = vmatpush3.bf16.msra.mxu1 %v8565_v15  ;;  %v3061_v56 = vmax.f32 %v3029_v14, 0.0  ;;  %v2912_v10 = vpop.f32.mrb[19].mxu0 }
 0x32d   : > { %v3030_v9 = vadd.f32 %v7445_v30, %v9778_v51  ;;  %v9918_v61 = vpack.c.bf16 %v3325_v20, %v3323_v18  ;;  %7514 = vmatprep.subr.bf16.mxu1 %v8566_v31  ;;  %v3883_v45 = vsel %vm1029_vm1, %v3880_v21, %v3882_v42  ;;  %v3059_v40 = vmax.f32 %v3027_v41, 0.0  ;;  %v9925_v16 = vld [vmem:[#allocation2 + $0xc0] sm:$0xff] }
 0x32e   : > { %v3028_v49 = vadd.f32 %v9778_v51, %v2912_v10  ;;  %v9927_v60 = vpack.c.bf16 %v3883_v45, %v3881_v50  ;;  %3148 = vst [vmem:[#allocation2 + $0xf1] sm:$0xff] %v3061_v56  ;;  %v9931_v15 = vld [vmem:[#allocation2 + $0xa8] sm:$0xff]  ;;  %v3336_v47 = vrot.slane %v9925_v16, 1  ;;  %v3885_v29 = vrot.slane %v9886_v63, 2 }
 0x32f   : > { %v3062_v36 = vmax.f32 %v3030_v9, 0.0  ;;  %7483 = vmatmul.mubr.bf16.gmra.mrb[8].mxu1 %v9918_v61  ;;  %v3887_v4 = vrot.slane %v9888_v13, 2  ;;  %3146 = vst [vmem:[#allocation2 + $0xd9] sm:$0xff] %v3059_v40  ;;  %v3331_v25 = vrot.slane %v9931_v15, 1  ;;  %v9938_v37 = vld [vmem:[#allocation2 + $0xc8] sm:$0xff]  ;;  %v3889_v57 = vrot.slane %v9870_v53, 2 }
 0x330   : > { %v3060_v0 = vmax.f32 %v3028_v49, 0.0  ;;  %7486 = vmatprep.mubr.bf16.mxu1 %v9915_v43  ;;  %v9940_v26 = vld [vmem:[#allocation2 + $0xd0] sm:$0x3]  ;;  %7515 = vmatpush3.bf16.msra.mxu1 %v8566_v31  ;;  %v9945_v21 = vld [vmem:[#allocation2 + $0xb8] sm:$0x3]  ;;  %v3337_v12 = vrot.slane %v9938_v37, 1  ;;  %v9954_v58 = vpack.c.bf16 %v9938_v37, %v9925_v16  ;;  %v3886_v53 = vsel %vm1029_vm1, %v3884_v3, %v3885_v29 }
 0x331   : > { %3149 = vst [vmem:[#allocation2 + $0xf9] sm:$0xff] %v3062_v36  ;;  %v9943_v28 = vld [vmem:[#allocation2 + $0xb0] sm:$0xff]  ;;  %v3339_v55 = vrot.slane %v9940_v26, 1  ;;  %7516 = vmatprep.subr.bf16.mxu1 %v8567_v52  ;;  %v7448_v63 = vpop.f32.mrb[20].mxu0  ;;  %v3334_v62 = vrot.slane %v9945_v21, 1  ;;  %v3888_v31 = vsel %vm1029_vm1, %v3885_v29, %v3887_v4  ;;  %v8569_v9 = vld [vmem:[%s10606_s3 + $0x38] sm:$0xff]  }
 0x332   : > { %3147 = vst [vmem:[#allocation2 + $0xe1] sm:$0xff] %v3060_v0  ;;  %v3332_v13 = vrot.slane %v9943_v28, 1  ;;  %v9961_v54 = vpack.c.bf16 %v9943_v28, %v9931_v15  ;;  %v3033_v22 = vadd.f32 %v7448_v63, %v9778_v51  ;;  %v2925_v39 = vpop.f32.mrb[21].mxu0  ;;  %v3338_v48 = vsel %vm465_vm0, %v3336_v47, %v3337_v12 }
 0x333   : > { %v3340_v50 = vsel %vm465_vm0, %v3337_v12, %v3339_v55  ;;  %v9967_v14 = vpack.c.bf16 %v3888_v31, %v3886_v53  ;;  %v3031_v59 = vadd.f32 %v9778_v51, %v2925_v39  ;;  %v7449_v19 = vpop.f32.mrb[22].mxu0  ;;  %v3890_v10 = vrot.slane %v9880_v8, 2 }
 0x334   : > { %v3333_v32 = vsel %vm465_vm0, %v3331_v25, %v3332_v13  ;;  %v3335_v42 = vsel %vm465_vm0, %v3332_v13, %v3334_v62  ;;  %v9972_v41 = vpack.c.bf16 %v3340_v50, %v3338_v48  ;;  %7517 = vmatpush3.bf16.msra.mxu1 %v8567_v52  ;;  %v3065_v30 = vmax.f32 %v3033_v22, 0.0  ;;  %v2928_v20 = vpop.f32.mrb[23].mxu0  ;;  %v10009_v13 = vld [vmem:[%s10606_s3 + $0x80] sm:$0xff]  }
 0x335   : > { %v3034_v18 = vadd.f32 %v7449_v19, %v9778_v51  ;;  %v9975_v56 = vpack.c.bf16 %v3335_v42, %v3333_v32  ;;  %7518 = vmatprep.subr.bf16.mxu1 %v8568_v35  ;;  %v3063_v45 = vmax.f32 %v3031_v59, 0.0  ;;  %v3032_v40 = vadd.f32 %v9778_v51, %v2928_v20  ;;  %v9982_v49 = vld [vmem:[#allocation2 + $0xf0] sm:$0xff] }
 0x336   : > { %v3892_v52 = vrot.slane %v9882_v44, 2  ;;  %v3894_v3 = vrot.slane %v9931_v15, 2  ;;  %3152 = vst [vmem:[#allocation2 + $0x121] sm:$0xff] %v3065_v30  ;;  %v9987_v47 = vld [vmem:[#allocation2 + $0xd8] sm:$0xff]  ;;  %v3346_v29 = vrot.slane %v9982_v49, 1  ;;  %v3891_v4 = vsel %vm1029_vm1, %v3889_v57, %v3890_v10 }
 0x337   : > { %v3066_v36 = vmax.f32 %v3034_v18, 0.0  ;;  %7487 = vmatmul.mubr.bf16.gmra.mrb[12].mxu1 %v9975_v56  ;;  %v3895_v8 = vrot.slane %v9943_v28, 2  ;;  %3150 = vst [vmem:[#allocation2 + $0x109] sm:$0xff] %v3063_v45  ;;  %v3064_v0 = vmax.f32 %v3032_v40, 0.0  ;;  %v3341_v44 = vrot.slane %v9987_v47, 1 }
 0x338   : > { %7490 = vmatprep.mubr.bf16.mxu1 %v9972_v41  ;;  %v9994_v25 = vld [vmem:[#allocation2 + $0xf8] sm:$0xff]  ;;  %v9996_v15 = vld [vmem:[#allocation2 + $0x100] sm:$0x3]  ;;  %7519 = vmatpush3.bf16.msra.mxu1 %v8568_v35  ;;  %v3893_v12 = vsel %vm1029_vm1, %v3890_v10, %v3892_v52  ;;  %v3897_v55 = vrot.slane %v9945_v21, 2 }
 0x339   : > { %3153 = vst [vmem:[#allocation2 + $0x129] sm:$0xff] %v3066_v36  ;;  %v10000_v53 = vld [vmem:[#allocation2 + $0xe0] sm:$0xff]  ;;  %v10002_v57 = vld [vmem:[#allocation2 + $0xe8] sm:$0x3]  ;;  %v3347_v28 = vrot.slane %v9994_v25, 1  ;;  %v3349_v63 = vrot.slane %v9996_v15, 1  ;;  %7520 = vmatprep.subr.bf16.mxu1 %v8569_v9  ;;  %v10013_v35 = vpack.c.bf16 %v9994_v25, %v9982_v49  ;;  %v10015_v21 = vpack.c.bf16 %v3893_v12, %v3891_v4 }
 0x33a   : > { %3151 = vst [vmem:[#allocation2 + $0x111] sm:$0xff] %v3064_v0  ;;  %v7452_v62 = vpop.f32.mrb[24].mxu0  ;;  %v3342_v31 = vrot.slane %v10000_v53, 1  ;;  %v3344_v22 = vrot.slane %v10002_v57, 1  ;;  %v10021_v39 = vpack.c.bf16 %v10000_v53, %v9987_v47  ;;  %v3896_v48 = vsel %vm1029_vm1, %v3894_v3, %v3895_v8 }
 0x33b   : > { %v3037_v50 = vadd.f32 %v7452_v62, %v9778_v51  ;;  %v2941_v59 = vpop.f32.mrb[25].mxu0  ;;  %v3348_v19 = vsel %vm465_vm0, %v3346_v29, %v3347_v28  ;;  %v3350_v32 = vsel %vm465_vm0, %v3347_v28, %v3349_v63  ;;  %v3898_v42 = vsel %vm1029_vm1, %v3895_v8, %v3897_v55 }
 0x33c   : > { %v3035_v30 = vadd.f32 %v9778_v51, %v2941_v59  ;;  %v7453_v18 = vpop.f32.mrb[26].mxu0  ;;  %v3343_v20 = vsel %vm465_vm0, %v3341_v44, %v3342_v31  ;;  %v3345_v10 = vsel %vm465_vm0, %v3342_v31, %v3344_v22  ;;  %v10031_v45 = vpack.c.bf16 %v3350_v32, %v3348_v19  ;;  %7521 = vmatpush3.bf16.msra.mxu1 %v8569_v9 }
 0x33d   : > { %v3069_v40 = vmax.f32 %v3037_v50, 0.0  ;;  %v3038_v52 = vadd.f32 %v7453_v18, %v9778_v51  ;;  %v2944_v3 = vpop.f32.mrb[27].mxu0  ;;  %v10034_v36 = vpack.c.bf16 %v3345_v10, %v3343_v20  ;;  %7554 = vmatprep.subr.bf16.mxu1 %v10009_v13  ;;  %v10037_v29 = vpack.c.bf16 %v3898_v42, %v3896_v48  ;;  %v10040_v0 = vld [vmem:[#allocation2 + $0x120] sm:$0xff] }
 0x33e   : > { %10731 = vst [vmem:[#allocation6_spill] sm:$0xff] %v10031_v45  ;;  %v3067_v4 = vmax.f32 %v3035_v30, 0.0  ;;  %v3036_v8 = vadd.f32 %v9778_v51, %v2944_v3  ;;  %v3899_v44 = vrot.slane %v9925_v16, 2  ;;  %v3900_v12 = vrot.slane %v9938_v37, 2  ;;  %v10045_v55 = vld [vmem:[#allocation2 + $0x108] sm:$0xff] }
 0x33f   : > { %3156 = vst [vmem:[#allocation2 + $0x151] sm:$0xff] %v3069_v40  ;;  %v3070_v9 = vmax.f32 %v3038_v52, 0.0  ;;  %7491 = vmatmul.mubr.bf16.gmra.mrb[16].mxu1 %v10034_v36  ;;  %v3356_v28 = vrot.slane %v10040_v0, 1  ;;  %v3902_v63 = vrot.slane %v9940_v26, 2  ;;  %v3904_v62 = vrot.slane %v9987_v47, 2 }
 0x340   : > { %3154 = vst [vmem:[#allocation2 + $0x139] sm:$0xff] %v3067_v4  ;;  %v3068_v31 = vmax.f32 %v3036_v8, 0.0  ;;  %7494 = vmatprep.mubr.bf16.mxu1 %v10031_v45  ;;  %v3351_v16 = vrot.slane %v10045_v55, 1  ;;  %v10052_v22 = vld [vmem:[#allocation2 + $0x128] sm:$0xff]  ;;  %v10054_v37 = vld [vmem:[#allocation2 + $0x130] sm:$0x3]  ;;  %v3901_v48 = vsel %vm1029_vm1, %v3899_v44, %v3900_v12 }
 0x341   : > { %v3905_v50 = vrot.slane %v10000_v53, 2  ;;  %3157 = vst [vmem:[#allocation2 + $0x159] sm:$0xff] %v3070_v9  ;;  %v10058_v59 = vld [vmem:[#allocation2 + $0x110] sm:$0xff]  ;;  %v10060_v26 = vld [vmem:[#allocation2 + $0x118] sm:$0x3]  ;;  %v3357_v47 = vrot.slane %v10052_v22, 1  ;;  %v10066_v32 = vpack.c.bf16 %v10052_v22, %v10040_v0  ;;  %v3903_v42 = vsel %vm1029_vm1, %v3900_v12, %v3902_v63 }
 0x342   : > { %v3359_v19 = vrot.slane %v10054_v37, 1  ;;  %3155 = vst [vmem:[#allocation2 + $0x141] sm:$0xff] %v3068_v31  ;;  %v7456_v30 = vpop.f32.mrb[28].mxu0  ;;  %v3352_v18 = vrot.slane %v10058_v59, 1  ;;  %v3354_v53 = vrot.slane %v10060_v26, 1  ;;  %v10073_v20 = vpack.c.bf16 %v10058_v59, %v10045_v55 }
 0x343   : > { %v10075_v10 = vpack.c.bf16 %v3903_v42, %v3901_v48  ;;  %v3041_v40 = vadd.f32 %v7456_v30, %v9778_v51  ;;  %v2957_v52 = vpop.f32.mrb[29].mxu0  ;;  %v3358_v3 = vsel %vm465_vm0, %v3356_v28, %v3357_v47  ;;  %v3906_v8 = vsel %vm1029_vm1, %v3904_v62, %v3905_v50 }
 0x344   : > { %v3360_v4 = vsel %vm465_vm0, %v3357_v47, %v3359_v19  ;;  %v3039_v44 = vadd.f32 %v9778_v51, %v2957_v52  ;;  %v7457_v12 = vpop.f32.mrb[30].mxu0  ;;  %v3353_v9 = vsel %vm465_vm0, %v3351_v16, %v3352_v18  ;;  %v3355_v63 = vsel %vm465_vm0, %v3352_v18, %v3354_v53 }
 0x345   : > { %v10084_v31 = vpack.c.bf16 %v3360_v4, %v3358_v3  ;;  %v3073_v48 = vmax.f32 %v3041_v40, 0.0  ;;  %v3042_v42 = vadd.f32 %v7457_v12, %v9778_v51  ;;  %v2960_v30 = vpop.f32.mrb[31].mxu0  ;;  %v10087_v45 = vpack.c.bf16 %v3355_v63, %v3353_v9 }
 0x346   : > { %v3907_v28 = vrot.slane %v10002_v57, 2  ;;  %v3071_v47 = vmax.f32 %v3039_v44, 0.0  ;;  %v3040_v62 = vadd.f32 %v9778_v51, %v2960_v30  ;;  %v10091_v19 = vld [vmem:[#allocation2 + $0x150] sm:$0xff]  ;;  %v3909_v52 = vrot.slane %v9982_v49, 2 }
 0x347   : > { %10732 = vst [vmem:[#allocation7_spill] sm:$0xff] %v10084_v31  ;;  %10733 = vst [vmem:[#allocation8_spill] sm:$0xff] %v10087_v45  ;;  %v3910_v16 = vrot.slane %v9994_v25, 2  ;;  %v3074_v18 = vmax.f32 %v3042_v42, 0.0  ;;  %7495 = vmatmul.mubr.bf16.gmra.mrb[20].mxu1 %v10087_v45  ;;  %v3201_v53 = vld [vmem:[#allocation2 + $0x138] sm:$0xff]  ;;  %v3366_v40 = vrot.slane %v10091_v19, 1 }
 0x348   : > { %3160 = vst [vmem:[#allocation2 + $0x181] sm:$0xff] %v3073_v48  ;;  %v3908_v3 = vsel %vm1029_vm1, %v3905_v50, %v3907_v28  ;;  %v3912_v57 = vrot.slane %v9996_v15, 2  ;;  %3158 = vst [vmem:[#allocation2 + $0x169] sm:$0xff] %v3071_v47  ;;  %v3072_v4 = vmax.f32 %v3040_v62, 0.0  ;;  %7498 = vmatprep.mubr.bf16.mxu1 %v10084_v31  ;;  %v3361_v51 = vrot.slane %v3201_v53, 1  ;;  %v3205_v44 = vld [vmem:[#allocation2 + $0x158] sm:$0xff] }
 0x349   : > { %v3206_v49 = vld [vmem:[#allocation2 + $0x160] sm:$0x3]  ;;  %v10100_v12 = vpack.c.bf16 %v3908_v3, %v3906_v8  ;;  %v3911_v25 = vsel %vm1029_vm1, %v3909_v52, %v3910_v16  ;;  %3161 = vst [vmem:[#allocation2 + $0x189] sm:$0xff] %v3074_v18  ;;  %v3203_v63 = vld [vmem:[#allocation2 + $0x148] sm:$0x3]  ;;  %v3367_v48 = vrot.slane %v3205_v44, 1  ;;  %v10104_v50 = vpack.c.bf16 %v3205_v44, %v10091_v19 }
 0x34a   : > { %v3202_v9 = vld [vmem:[#allocation2 + $0x140] sm:$0xff]  ;;  %v3369_v42 = vrot.slane %v3206_v49, 1  ;;  %v3913_v15 = vsel %vm1029_vm1, %v3910_v16, %v3912_v57  ;;  %3159 = vst [vmem:[#allocation2 + $0x171] sm:$0xff] %v3072_v4  ;;  %v3364_v28 = vrot.slane %v3203_v63, 1  ;;  %v3914_v18 = vrot.slane %v10045_v55, 2 }
 0x34b   : > { %v3362_v30 = vrot.slane %v3202_v9, 1  ;;  %v10107_v47 = vpack.c.bf16 %v3202_v9, %v3201_v53  ;;  %v10109_v62 = vpack.c.bf16 %v3913_v15, %v3911_v25  ;;  %v3368_v8 = vsel %vm465_vm0, %v3366_v40, %v3367_v48 }
 0x34c   : > { %v3370_v52 = vsel %vm465_vm0, %v3367_v48, %v3369_v42  ;;  %v3915_v3 = vrot.slane %v10058_v59, 2  ;;  %v3917_v57 = vrot.slane %v10060_v26, 2  ;;  %v3919_v40 = vrot.slane %v10040_v0, 2 }
 0x34d   : > { %v3363_v31 = vsel %vm465_vm0, %v3361_v51, %v3362_v30  ;;  %v3365_v45 = vsel %vm465_vm0, %v3362_v30, %v3364_v28  ;;  %v10117_v16 = vpack.c.bf16 %v3370_v52, %v3368_v8  ;;  %v3920_v48 = vrot.slane %v10052_v22, 2 }
 0x34e   : > { %v10120_v4 = vpack.c.bf16 %v3365_v45, %v3363_v31  ;;  %v3916_v25 = vsel %vm1029_vm1, %v3914_v18, %v3915_v3  ;;  %v3918_v55 = vsel %vm1029_vm1, %v3915_v3, %v3917_v57  ;;  %v3922_v59 = vrot.slane %v10054_v37, 2 }
 0x34f   : > { %v3924_v42 = vrot.slane %v3201_v53, 2  ;;  %v3925_v51 = vrot.slane %v3202_v9, 2  ;;  %v3207_v15 = vld [vmem:[#allocation2 + $0x168] sm:$0xff]  ;;  %v10128_v30 = vpack.c.bf16 %v3918_v55, %v3916_v25  ;;  %v3921_v45 = vsel %vm1029_vm1, %v3919_v40, %v3920_v48 }
 0x350   : > { %7499 = vmatmul.mubr.bf16.gmra.mrb[24].mxu1 %v10120_v4  ;;  %v3927_v26 = vrot.slane %v3203_v63, 2  ;;  %v3929_v31 = vrot.slane %v10091_v19, 2  ;;  %v3371_v0 = vrot.slane %v3207_v15, 1  ;;  %v3923_v22 = vsel %vm1029_vm1, %v3920_v48, %v3922_v59  ;;  %v10144_v59 = vld [vmem:[#allocation2 + $0x180] sm:$0xff] }
 0x351   : > { %7502 = vmatprep.mubr.bf16.mxu1 %v10117_v16  ;;  %v3926_v28 = vsel %vm1029_vm1, %v3924_v42, %v3925_v51  ;;  %v3930_v37 = vrot.slane %v3205_v44, 2  ;;  %v3208_v53 = vld [vmem:[#allocation2 + $0x170] sm:$0xff]  ;;  %v3209_v9 = vld [vmem:[#allocation2 + $0x178] sm:$0x3]  ;;  %v10135_v8 = vpack.c.bf16 %v3923_v22, %v3921_v45  ;;  %v3932_v18 = vrot.slane %v3206_v49, 2  ;;  %v10146_v42 = vld [vmem:[#allocation2 + $0x188] sm:$0xff] }
 0x352   : > { %v3928_v52 = vsel %vm1029_vm1, %v3925_v51, %v3927_v26  ;;  %v3934_v3 = vrot.slane %v3207_v15, 2  ;;  %v3372_v57 = vrot.slane %v3208_v53, 1  ;;  %v3374_v63 = vrot.slane %v3209_v9, 1 }
 0x353   : > { %v10138_v25 = vpack.c.bf16 %v3208_v53, %v3207_v15  ;;  %v10140_v19 = vpack.c.bf16 %v3928_v52, %v3926_v28  ;;  %v3931_v40 = vsel %vm1029_vm1, %v3929_v31, %v3930_v37  ;;  %v3933_v48 = vsel %vm1029_vm1, %v3930_v37, %v3932_v18  ;;  %v10152_v15 = vld [vmem:[#allocation2 + $0x190] sm:$0x3] }
 0x354   : > { %v3935_v55 = vrot.slane %v3208_v53, 2  ;;  %v3937_v44 = vrot.slane %v3209_v9, 2  ;;  %v3373_v51 = vsel %vm465_vm0, %v3371_v0, %v3372_v57  ;;  %v3375_v49 = vsel %vm465_vm0, %v3372_v57, %v3374_v63  ;;  %v8571_v57 = vld [vmem:[%s10606_s3 + $0x88] sm:$0xff]   ;;  %v8572_v63 = vld [vmem:[%s10606_s3 + $0x90] sm:$0xff]  }
 0x355   : > { %v10150_v45 = vpack.c.bf16 %v3933_v48, %v3931_v40  ;;  %v10154_v26 = vpack.c.bf16 %v3375_v49, %v3373_v51  ;;  %v4773_v37 = vrot.slane %v10144_v59, 2  ;;  %v4774_v53 = vrot.slane %v10146_v42, 2  ;;  %v8573_v40 = vld [vmem:[%s10606_s3 + $0x98] sm:$0xff]   ;;  %v8575_v48 = vld [vmem:[%s10606_s3 + $0xa8] sm:$0xff]   ;;  %v8578_v51 = vld [vmem:[%s10606_s3 + $0xc0] sm:$0xff]  }
 0x356   : > { %v3936_v31 = vsel %vm1029_vm1, %v3934_v3, %v3935_v55  ;;  %v3938_v22 = vsel %vm1029_vm1, %v3935_v55, %v3937_v44  ;;  %v4776_v0 = vrot.slane %v10152_v15, 2  ;;  %v8754_v9 = vmov 0.0|0.0   ;;  %v8576_v55 = vld [vmem:[%s10606_s3 + $0xb0] sm:$0xff]   ;;  %v8577_v44 = vld [vmem:[%s10606_s3 + $0xb8] sm:$0xff]  }
 0x357   : > { %v10158_v28 = vpack.c.bf16 %v3938_v22, %v3936_v31  ;;  %v4775_v52 = vsel %vm1029_vm1, %v4773_v37, %v4774_v53  ;;  %v3862_v49 = vrot.slane %v9762_v1, 2  ;;  %v10207_v31 = vld [vmem:[#allocation2] sm:$0xff]  ;;  %v8579_v1 = vld [vmem:[%s10606_s3 + $0xc8] sm:$0xff]  }
 0x358   : > { %7503 = vmatmul.mubr.bf16.gmra.mrb[28].mxu1 %v10154_v26  ;;  %v4777_v18 = vsel %vm1029_vm1, %v4774_v53, %v4776_v0  ;;  %v10210_v22 = vrot.slane %v10207_v31, 2  ;;  %v8580_v0 = vld [vmem:[%s10606_s3 + $0xd0] sm:$0xff]   ;;  %7906 = vmatprep.mubr.msk.bf16.mxu0 %vm8755_vm2, %v10207_v31 }
 0x359   : > { %7522 = vmatprep.mubr.bf16.mxu1 %v8754_v9  ;;  %v10167_v3 = vpack.c.bf16 %v4777_v18, %v4775_v52  ;;  %v8581_v52 = vld [vmem:[%s10606_s3 + $0xd8] sm:$0xff]   ;;  %v8582_v18 = vld [vmem:[%s10606_s3 + $0xe0] sm:$0xff]  }
 0x35a   : > { %v3863_v37 = vsel %vm1029_vm1, %v10210_v22, %v3862_v49  ;;  %v8592_v49 = vld [vmem:[%s10606_s3 + $0x130] sm:$0xff]  }
 0x35b   : > { %v3971_v53 = vpack.c.bf16 %v3863_v37, %v10210_v22  ;;  %v8593_v37 = vld [vmem:[%s10606_s3 + $0x138] sm:$0xff]  }
 0x360   : > { %7523 = vmatmul.mubr.bf16.vlgmr.msra.gmra.mrb[0].mxu1 %v9804_v23 }
 0x361   : > { %7526 = vmatprep.mubr.bf16.mxu1 %v9799_v7  ;;  %7555 = vmatpush3.bf16.msra.mxu1 %v10009_v13  ;;  %v8574_v13 = vld [vmem:[%s10606_s3 + $0xa0] sm:$0xff]  }
 0x362   : > { %7556 = vmatprep.subr.bf16.mxu1 %v8571_v57 }
 0x365   : > { %7557 = vmatpush3.bf16.msra.mxu1 %v8571_v57  ;;  %v8583_v57 = vld [vmem:[%s10606_s3 + $0xe8] sm:$0xff]  }
 0x366   : > { %7558 = vmatprep.subr.bf16.mxu1 %v8572_v63 }
 0x368   : > { %7527 = vmatmul.mubr.bf16.gmra.mrb[4].mxu1 %v9849_v33 }
 0x369   : > { %7530 = vmatprep.mubr.bf16.mxu1 %v9845_v27  ;;  %7559 = vmatpush3.bf16.msra.mxu1 %v8572_v63  ;;  %v8584_v63 = vld [vmem:[%s10606_s3 + $0xf0] sm:$0xff]  }
 0x36a   : > { %7560 = vmatprep.subr.bf16.mxu1 %v8573_v40 }
 0x36d   : > { %7561 = vmatpush3.bf16.msra.mxu1 %v8573_v40  ;;  %v8585_v40 = vld [vmem:[%s10606_s3 + $0xf8] sm:$0xff]  }
 0x36e   : > { %7562 = vmatprep.subr.bf16.mxu1 %v8574_v13 }
 0x370   : > { %7531 = vmatmul.mubr.bf16.gmra.mrb[8].mxu1 %v9905_v46 }
 0x371   : > { %7534 = vmatprep.mubr.bf16.mxu1 %v9897_v24  ;;  %7563 = vmatpush3.bf16.msra.mxu1 %v8574_v13  ;;  %v8586_v13 = vld [vmem:[%s10606_s3 + $0x100] sm:$0xff]  }
 0x372   : > { %7564 = vmatprep.subr.bf16.mxu1 %v8575_v48 }
 0x375   : > { %7565 = vmatpush3.bf16.msra.mxu1 %v8575_v48  ;;  %v8587_v48 = vld [vmem:[%s10606_s3 + $0x108] sm:$0xff]  }
 0x376   : > { %7566 = vmatprep.subr.bf16.mxu1 %v8576_v55 }
 0x378   : > { %7535 = vmatmul.mubr.bf16.gmra.mrb[12].mxu1 %v9961_v54 }
 0x379   : > { %7538 = vmatprep.mubr.bf16.mxu1 %v9954_v58  ;;  %7567 = vmatpush3.bf16.msra.mxu1 %v8576_v55  ;;  %v8588_v55 = vld [vmem:[%s10606_s3 + $0x110] sm:$0xff]  }
 0x37a   : > { %7568 = vmatprep.subr.bf16.mxu1 %v8577_v44 }
 0x37d   : > { %7569 = vmatpush3.bf16.msra.mxu1 %v8577_v44  ;;  %v8590_v44 = vld [vmem:[%s10606_s3 + $0x120] sm:$0xff]  }
 0x37e   : > { %7602 = vmatprep.subr.bf16.mxu1 %v8578_v51 }
 0x380   : > { %7539 = vmatmul.mubr.bf16.gmra.mrb[16].mxu1 %v10021_v39 }
 0x381   : > { %7542 = vmatprep.mubr.bf16.mxu1 %v10013_v35 }
 0x388   : > { %7543 = vmatmul.mubr.bf16.gmra.mrb[20].mxu1 %v10073_v20 }
 0x389   : > { %7546 = vmatprep.mubr.bf16.mxu1 %v10066_v32 }
 0x390   : > { %7547 = vmatmul.mubr.bf16.gmra.mrb[24].mxu1 %v10107_v47 }
 0x391   : > { %7550 = vmatprep.mubr.bf16.mxu1 %v10104_v50 }
 0x398   : > { %7551 = vmatmul.mubr.bf16.gmra.mrb[28].mxu1 %v10138_v25 }
 0x399   : > { %7570 = vmatprep.mubr.bf16.mxu1 %v3971_v53  ;;  %v8594_v53 = vld [vmem:[%s10606_s3 + $0x140] sm:$0xff]  }
 0x3a0   : > { %7571 = vmatmul.mubr.bf16.vlgmr.msra.gmra.mrb[0].mxu1 %v9835_v6 }
 0x3a1   : > { %7574 = vmatprep.mubr.bf16.mxu1 %v9855_v2  ;;  %7603 = vmatpush3.bf16.msra.mxu1 %v8578_v51  ;;  %v8591_v51 = vld [vmem:[%s10606_s3 + $0x128] sm:$0xff]  }
 0x3a2   : > { %7604 = vmatprep.subr.bf16.mxu1 %v8579_v1 }
 0x3a5   : > { %7605 = vmatpush3.bf16.msra.mxu1 %v8579_v1  ;;  %v10298_v1 = vpack.c.bf16 %v10146_v42, %v10144_v59 }
 0x3a6   : > { %7606 = vmatprep.subr.bf16.mxu1 %v8580_v0 }
 0x3a8   : > { %7575 = vmatmul.mubr.bf16.gmra.mrb[4].mxu1 %v9899_v11 }
 0x3a9   : > { %7578 = vmatprep.mubr.bf16.mxu1 %v9927_v60  ;;  %7607 = vmatpush3.bf16.msra.mxu1 %v8580_v0  ;;  %v8595_v0 = vld [vmem:[%s10606_s3 + $0x148] sm:$0xff]  }
 0x3aa   : > { %7608 = vmatprep.subr.bf16.mxu1 %v8581_v52 }
 0x3ad   : > { %7609 = vmatpush3.bf16.msra.mxu1 %v8581_v52  ;;  %v8596_v52 = vld [vmem:[%s10606_s3 + $0x150] sm:$0xff]  }
 0x3ae   : > { %7610 = vmatprep.subr.bf16.mxu1 %v8582_v18 }
 0x3b0   : > { %7579 = vmatmul.mubr.bf16.gmra.mrb[8].mxu1 %v9967_v14 }
 0x3b1   : > { %7582 = vmatprep.mubr.bf16.mxu1 %v10015_v21  ;;  %7611 = vmatpush3.bf16.msra.mxu1 %v8582_v18  ;;  %v8598_v18 = vld [vmem:[%s10606_s3 + $0x160] sm:$0xff]  }
 0x3b2   : > { %7612 = vmatprep.subr.bf16.mxu1 %v8583_v57 }
 0x3b5   : > { %7613 = vmatpush3.bf16.msra.mxu1 %v8583_v57  ;;  %v8599_v57 = vld [vmem:[%s10606_s3 + $0x168] sm:$0xff]  }
 0x3b6   : > { %7614 = vmatprep.subr.bf16.mxu1 %v8584_v63 }
 0x3b8   : > { %7583 = vmatmul.mubr.bf16.gmra.mrb[12].mxu1 %v10037_v29 }
 0x3b9   : > { %7586 = vmatprep.mubr.bf16.mxu1 %v10075_v10  ;;  %7615 = vmatpush3.bf16.msra.mxu1 %v8584_v63  ;;  %v8600_v63 = vld [vmem:[%s10606_s3 + $0x170] sm:$0xff]  }
 0x3ba   : > { %7616 = vmatprep.subr.bf16.mxu1 %v8585_v40 }
 0x3bd   : > { %7617 = vmatpush3.bf16.msra.mxu1 %v8585_v40  ;;  %v8601_v40 = vld [vmem:[%s10606_s3 + $0x178] sm:$0xff]  }
 0x3be   : > { %7650 = vmatprep.subr.bf16.mxu1 %v8586_v13 }
 0x3c0   : > { %7587 = vmatmul.mubr.bf16.gmra.mrb[16].mxu1 %v10100_v12 }
 0x3c1   : > { %7590 = vmatprep.mubr.bf16.mxu1 %v10109_v62 }
 0x3c8   : > { %7591 = vmatmul.mubr.bf16.gmra.mrb[20].mxu1 %v10128_v30 }
 0x3c9   : > { %7594 = vmatprep.mubr.bf16.mxu1 %v10135_v8 }
 0x3d0   : > { %7595 = vmatmul.mubr.bf16.gmra.mrb[24].mxu1 %v10140_v19 }
 0x3d1   : > { %7598 = vmatprep.mubr.bf16.mxu1 %v10150_v45 }
 0x3d8   : > { %7599 = vmatmul.mubr.bf16.gmra.mrb[28].mxu1 %v10158_v28 }
 0x3d9   : > { %7618 = vmatprep.mubr.bf16.mxu1 %v9804_v23  ;;  %v8589_v23 = vld [vmem:[%s10606_s3 + $0x118] sm:$0xff]  }
 0x3e0   : > { %7619 = vmatmul.mubr.bf16.vlgmr.msra.gmra.mrb[0].mxu1 %v9799_v7 }
 0x3e1   : > { %7622 = vmatprep.mubr.bf16.mxu1 %v9849_v33  ;;  %7651 = vmatpush3.bf16.msra.mxu1 %v8586_v13  ;;  %v8602_v13 = vld [vmem:[%s10606_s3 + $0x180] sm:$0xff]  }
 0x3e2   : > { %7652 = vmatprep.subr.bf16.mxu1 %v8587_v48 }
 0x3e5   : > { %7653 = vmatpush3.bf16.msra.mxu1 %v8587_v48  ;;  %v10734_v48 = vld [vmem:[#allocation6_spill] sm:$0xff] }
 0x3e6   : > { %7654 = vmatprep.subr.bf16.mxu1 %v8588_v55 }
 0x3e8   : > { %7623 = vmatmul.mubr.bf16.gmra.mrb[4].mxu1 %v9845_v27 }
 0x3e9   : > { %7626 = vmatprep.mubr.bf16.mxu1 %v9905_v46  ;;  %7655 = vmatpush3.bf16.msra.mxu1 %v8588_v55  ;;  %v10735_v55 = vld [vmem:[#allocation8_spill] sm:$0xff] }
 0x3ea   : > { %7656 = vmatprep.subr.bf16.mxu1 %v8589_v23 }
 0x3ed   : > { %7657 = vmatpush3.bf16.msra.mxu1 %v8589_v23  ;;  %v10736_v23 = vld [vmem:[#allocation7_spill] sm:$0xff] }
 0x3ee   : > { %7658 = vmatprep.subr.bf16.mxu1 %v8590_v44 }
 0x3f0   : > { %7627 = vmatmul.mubr.bf16.gmra.mrb[8].mxu1 %v9897_v24 }
 0x3f1   : > { %7630 = vmatprep.mubr.bf16.mxu1 %v9961_v54  ;;  %7659 = vmatpush3.bf16.msra.mxu1 %v8590_v44  ;;  %v4508_v44 = vrot.slane %v10146_v42, 1  ;;  %v8603_v42 = vld [vmem:[%s10606_s3 + $0x188] sm:$0xff]  }
 0x3f2   : > { %7660 = vmatprep.subr.bf16.mxu1 %v8591_v51 }
 0x3f5   : > { %7661 = vmatpush3.bf16.msra.mxu1 %v8591_v51  ;;  %v4510_v51 = vrot.slane %v10152_v15, 1  ;;  %v8606_v15 = vld [vmem:[%s10606_s3 + $0x1a0] sm:$0xff]  }
 0x3f6   : > { %7662 = vmatprep.subr.bf16.mxu1 %v8592_v49 }
 0x3f8   : > { %7631 = vmatmul.mubr.bf16.gmra.mrb[12].mxu1 %v9954_v58 }
 0x3f9   : > { %7634 = vmatprep.mubr.bf16.mxu1 %v10021_v39  ;;  %7663 = vmatpush3.bf16.msra.mxu1 %v8592_v49  ;;  %v4507_v49 = vrot.slane %v10144_v59, 1  ;;  %v8604_v59 = vld [vmem:[%s10606_s3 + $0x190] sm:$0xff]  }
 0x3fa   : > { %7664 = vmatprep.subr.bf16.mxu1 %v8593_v37 }
 0x3fd   : > { %7665 = vmatpush3.bf16.msra.mxu1 %v8593_v37  ;;  %v4509_v37 = vsel %vm465_vm0, %v4507_v49, %v4508_v44 }
 0x3fe   : > { %7698 = vmatprep.subr.bf16.mxu1 %v8594_v53 }
 0x400   : > { %7635 = vmatmul.mubr.bf16.gmra.mrb[16].mxu1 %v10013_v35 }
 0x401   : > { %7638 = vmatprep.mubr.bf16.mxu1 %v10073_v20 }
 0x408   : > { %7639 = vmatmul.mubr.bf16.gmra.mrb[20].mxu1 %v10066_v32 }
 0x409   : > { %7642 = vmatprep.mubr.bf16.mxu1 %v10107_v47 }
 0x410   : > { %7643 = vmatmul.mubr.bf16.gmra.mrb[24].mxu1 %v10104_v50 }
 0x411   : > { %7646 = vmatprep.mubr.bf16.mxu1 %v10138_v25 }
 0x418   : > { %7647 = vmatmul.mubr.bf16.gmra.mrb[28].mxu1 %v10298_v1 }
 0x419   : > { %7666 = vmatprep.mubr.bf16.mxu1 %v9810_v17  ;;  %v8597_v17 = vld [vmem:[%s10606_s3 + $0x158] sm:$0xff]  }
 0x420   : > { %7667 = vmatmul.mubr.bf16.vlgmr.msra.gmra.mrb[0].mxu1 %v9817_v38 }
 0x421   : > { %7670 = vmatprep.mubr.bf16.mxu1 %v9863_v5  ;;  %7699 = vmatpush3.bf16.msra.mxu1 %v8594_v53  ;;  %v4511_v53 = vsel %vm465_vm0, %v4508_v44, %v4510_v51 }
 0x422   : > { %7700 = vmatprep.subr.bf16.mxu1 %v8595_v0 }
 0x425   : > { %7701 = vmatpush3.bf16.msra.mxu1 %v8595_v0  ;;  %v10345_v0 = vpack.c.bf16 %v4511_v53, %v4509_v37 }
 0x426   : > { %7702 = vmatprep.subr.bf16.mxu1 %v8596_v52 }
 0x428   : > { %7671 = vmatmul.mubr.bf16.gmra.mrb[4].mxu1 %v9860_v34 }
 0x429   : > { %7674 = vmatprep.mubr.bf16.mxu1 %v9918_v61  ;;  %7703 = vmatpush3.bf16.msra.mxu1 %v8596_v52  ;;  %v8607_v52 = vld [vmem:[%s10606_s3 + $0x1a8] sm:$0xff]  }
 0x42a   : > { %7704 = vmatprep.subr.bf16.mxu1 %v8597_v17 }
 0x42d   : > { %7705 = vmatpush3.bf16.msra.mxu1 %v8597_v17  ;;  %v8608_v17 = vld [vmem:[%s10606_s3 + $0x1b0] sm:$0xff]  }
 0x42e   : > { %7706 = vmatprep.subr.bf16.mxu1 %v8598_v18 }
 0x430   : > { %7675 = vmatmul.mubr.bf16.gmra.mrb[8].mxu1 %v9915_v43 }
 0x431   : > { %7678 = vmatprep.mubr.bf16.mxu1 %v9975_v56  ;;  %7707 = vmatpush3.bf16.msra.mxu1 %v8598_v18  ;;  %v8609_v18 = vld [vmem:[%s10606_s3 + $0x1b8] sm:$0xff]  }
 0x432   : > { %7708 = vmatprep.subr.bf16.mxu1 %v8599_v57 }
 0x435   : > { %7709 = vmatpush3.bf16.msra.mxu1 %v8599_v57  ;;  %v8610_v57 = vld [vmem:[%s10606_s3 + $0x1c0] sm:$0xff]  }
 0x436   : > { %7710 = vmatprep.subr.bf16.mxu1 %v8600_v63 }
 0x438   : > { %7679 = vmatmul.mubr.bf16.gmra.mrb[12].mxu1 %v9972_v41 }
 0x439   : > { %7682 = vmatprep.mubr.bf16.mxu1 %v10034_v36  ;;  %7711 = vmatpush3.bf16.msra.mxu1 %v8600_v63  ;;  %v8611_v63 = vld [vmem:[%s10606_s3 + $0x1c8] sm:$0xff]  }
 0x43a   : > { %7712 = vmatprep.subr.bf16.mxu1 %v8601_v40 }
 0x43d   : > { %7713 = vmatpush3.bf16.msra.mxu1 %v8601_v40  ;;  %v8612_v40 = vld [vmem:[%s10606_s3 + $0x1d0] sm:$0xff]  }
 0x43e   : > { %7746 = vmatprep.subr.bf16.mxu1 %v8602_v13 }
 0x440   : > { %7683 = vmatmul.mubr.bf16.gmra.mrb[16].mxu1 %v10734_v48 }
 0x441   : > { %7686 = vmatprep.mubr.bf16.mxu1 %v10735_v55 }
 0x448   : > { %7687 = vmatmul.mubr.bf16.gmra.mrb[20].mxu1 %v10736_v23 }
 0x449   : > { %7690 = vmatprep.mubr.bf16.mxu1 %v10120_v4 }
 0x450   : > { %7691 = vmatmul.mubr.bf16.gmra.mrb[24].mxu1 %v10117_v16 }
 0x451   : > { %7694 = vmatprep.mubr.bf16.mxu1 %v10154_v26 }
 0x458   : > { %7695 = vmatmul.mubr.bf16.gmra.mrb[28].mxu1 %v10345_v0 }
 0x459   : > { %7714 = vmatprep.mubr.bf16.mxu1 %v9835_v6  ;;  %v8605_v6 = vld [vmem:[%s10606_s3 + $0x198] sm:$0xff]  }
 0x460   : > { %7715 = vmatmul.mubr.bf16.vlgmr.msra.gmra.mrb[0].mxu1 %v9855_v2 }
 0x461   : > { %7718 = vmatprep.mubr.bf16.mxu1 %v9899_v11  ;;  %7747 = vmatpush3.bf16.msra.mxu1 %v8602_v13  ;;  %v8660_v13 = vld [vmem:[#allocation2 + $0x39] sm:$0xff] }
 0x462   : > { %7748 = vmatprep.subr.bf16.mxu1 %v8603_v42 }
 0x465   : > { %7749 = vmatpush3.bf16.msra.mxu1 %v8603_v42 }
 0x466   : > { %7750 = vmatprep.subr.bf16.mxu1 %v8604_v59 }
 0x468   : > { %7719 = vmatmul.mubr.bf16.gmra.mrb[4].mxu1 %v9927_v60 }
 0x469   : > { %7722 = vmatprep.mubr.bf16.mxu1 %v9967_v14  ;;  %7751 = vmatpush3.bf16.msra.mxu1 %v8604_v59 }
 0x46a   : > { %7752 = vmatprep.subr.bf16.mxu1 %v8605_v6 }
 0x46d   : > { %7753 = vmatpush3.bf16.msra.mxu1 %v8605_v6 }
 0x46e   : > { %7754 = vmatprep.subr.bf16.mxu1 %v8606_v15 }
 0x470   : > { %7723 = vmatmul.mubr.bf16.gmra.mrb[8].mxu1 %v10015_v21 }
 0x471   : > { %7726 = vmatprep.mubr.bf16.mxu1 %v10037_v29  ;;  %7755 = vmatpush3.bf16.msra.mxu1 %v8606_v15 }
 0x472   : > { %7756 = vmatprep.subr.bf16.mxu1 %v8607_v52 }
 0x475   : > { %7757 = vmatpush3.bf16.msra.mxu1 %v8607_v52  ;;  %v8661_v52 = vld [vmem:[#allocation2 + $0x49] sm:$0xff] }
 0x476   : > { %7758 = vmatprep.subr.bf16.mxu1 %v8608_v17 }
 0x478   : > { %7727 = vmatmul.mubr.bf16.gmra.mrb[12].mxu1 %v10075_v10 }
 0x479   : > { %7730 = vmatprep.mubr.bf16.mxu1 %v10100_v12  ;;  %7759 = vmatpush3.bf16.msra.mxu1 %v8608_v17 }
 0x47a   : > { %7760 = vmatprep.subr.bf16.mxu1 %v8609_v18 }
 0x47d   : > { %7761 = vmatpush3.bf16.msra.mxu1 %v8609_v18 }
 0x47e   : > { %7794 = vmatprep.subr.bf16.mxu1 %v8610_v57 }
 0x480   : > { %7731 = vmatmul.mubr.bf16.gmra.mrb[16].mxu1 %v10109_v62 }
 0x481   : > { %7734 = vmatprep.mubr.bf16.mxu1 %v10128_v30 }
 0x488   : > { %7735 = vmatmul.mubr.bf16.gmra.mrb[20].mxu1 %v10135_v8 }
 0x489   : > { %7738 = vmatprep.mubr.bf16.mxu1 %v10140_v19 }
 0x490   : > { %7739 = vmatmul.mubr.bf16.gmra.mrb[24].mxu1 %v10150_v45 }
 0x491   : > { %7742 = vmatprep.mubr.bf16.mxu1 %v10158_v28 }
 0x498   : > { %7743 = vmatmul.mubr.bf16.gmra.mrb[28].mxu1 %v10167_v3 }
 0x499   : > { %7762 = vmatprep.mubr.bf16.mxu1 %v9799_v7  ;;  %v8613_v7 = vld [vmem:[%s10606_s3 + $0x1d8] sm:$0xff]  }
 0x4a0   : > { %7763 = vmatmul.mubr.bf16.vlgmr.msra.gmra.mrb[0].mxu1 %v9849_v33  ;;  %v8615_v33 = vld [vmem:[%s10606_s3 + $0x1e8] sm:$0xff]  }
 0x4a1   : > { %7766 = vmatprep.mubr.bf16.mxu1 %v9845_v27  ;;  %7795 = vmatpush3.bf16.msra.mxu1 %v8610_v57  ;;  %v8614_v27 = vld [vmem:[%s10606_s3 + $0x1e0] sm:$0xff]  }
 0x4a2   : > { %7796 = vmatprep.subr.bf16.mxu1 %v8611_v63 }
 0x4a5   : > { %7797 = vmatpush3.bf16.msra.mxu1 %v8611_v63  ;;  %v8662_v63 = vld [vmem:[#allocation2 + $0x61] sm:$0xff] }
 0x4a6   : > { %7798 = vmatprep.subr.bf16.mxu1 %v8612_v40 }
 0x4a8   : > { %7767 = vmatmul.mubr.bf16.gmra.mrb[4].mxu1 %v9905_v46  ;;  %v8617_v46 = vld [vmem:[%s10606_s3 + $0x1f8] sm:$0xff]  }
 0x4a9   : > { %7770 = vmatprep.mubr.bf16.mxu1 %v9897_v24  ;;  %7799 = vmatpush3.bf16.msra.mxu1 %v8612_v40  ;;  %v8616_v24 = vld [vmem:[%s10606_s3 + $0x1f0] sm:$0xff]  }
 0x4aa   : > { %7800 = vmatprep.subr.bf16.mxu1 %v8613_v7 }
 0x4ad   : > { %7801 = vmatpush3.bf16.msra.mxu1 %v8613_v7 }
 0x4ae   : > { %7802 = vmatprep.subr.bf16.mxu1 %v8614_v27 }
 0x4b0   : > { %7771 = vmatmul.mubr.bf16.gmra.mrb[8].mxu1 %v9961_v54  ;;  %v8619_v54 = vld [vmem:[%s10606_s3 + $0x208] sm:$0xff]  }
 0x4b1   : > { %7774 = vmatprep.mubr.bf16.mxu1 %v9954_v58  ;;  %7803 = vmatpush3.bf16.msra.mxu1 %v8614_v27  ;;  %v8618_v58 = vld [vmem:[%s10606_s3 + $0x200] sm:$0xff]  }
 0x4b2   : > { %7804 = vmatprep.subr.bf16.mxu1 %v8615_v33 }
 0x4b5   : > { %7805 = vmatpush3.bf16.msra.mxu1 %v8615_v33  ;;  %v8663_v33 = vld [vmem:[#allocation2 + $0x51] sm:$0xff] }
 0x4b6   : > { %7806 = vmatprep.subr.bf16.mxu1 %v8616_v24 }
 0x4b8   : > { %7775 = vmatmul.mubr.bf16.gmra.mrb[12].mxu1 %v10021_v39 }
 0x4b9   : > { %7778 = vmatprep.mubr.bf16.mxu1 %v10013_v35  ;;  %7807 = vmatpush3.bf16.msra.mxu1 %v8616_v24  ;;  %v8620_v35 = vld [vmem:[%s10606_s3 + $0x210] sm:$0xff]  }
 0x4ba   : > { %7808 = vmatprep.subr.bf16.mxu1 %v8617_v46 }
 0x4bd   : > { %7809 = vmatpush3.bf16.msra.mxu1 %v8617_v46 }
 0x4be   : > { %7842 = vmatprep.subr.bf16.mxu1 %v8618_v58 }
 0x4c0   : > { %7779 = vmatmul.mubr.bf16.gmra.mrb[16].mxu1 %v10073_v20  ;;  %v8629_v20 = vld [vmem:[%s10608_s5 + $0x18] sm:$0xff]  }
 0x4c1   : > { %7782 = vmatprep.mubr.bf16.mxu1 %v10066_v32 }
 0x4c8   : > { %7783 = vmatmul.mubr.bf16.gmra.mrb[20].mxu1 %v10107_v47  ;;  %v8633_v47 = vld [vmem:[%s10608_s5 + $0x38] sm:$0xff]  }
 0x4c9   : > { %7786 = vmatprep.mubr.bf16.mxu1 %v10104_v50  ;;  %v8632_v50 = vld [vmem:[%s10608_s5 + $0x30] sm:$0xff]  }
 0x4d0   : > { %7787 = vmatmul.mubr.bf16.gmra.mrb[24].mxu1 %v10138_v25 }
 0x4d1   : > { %7790 = vmatprep.mubr.bf16.mxu1 %v10298_v1 }
 0x4d8   : > { %7791 = vmatmul.mubr.bf16.gmra.mrb[28].mxu1 %v8754_v9 }
 0x4d9   : > { %7810 = vmatprep.mubr.bf16.mxu1 %v9817_v38  ;;  %v8621_v38 = vld [vmem:[%s10606_s3 + $0x218] sm:$0xff]  }
 0x4e0   : > { %7811 = vmatmul.mubr.bf16.vlgmr.msra.gmra.mrb[0].mxu1 %v9863_v5  ;;  %v8623_v5 = vld [vmem:[%s10606_s3 + $0x228] sm:$0xff]  }
 0x4e1   : > { %7814 = vmatprep.mubr.bf16.mxu1 %v9860_v34  ;;  %7843 = vmatpush3.bf16.msra.mxu1 %v8618_v58  ;;  %v8622_v34 = vld [vmem:[%s10606_s3 + $0x220] sm:$0xff]   ;;  %v8664_v58 = vld [vmem:[#allocation2 + $0x69] sm:$0xff] }
 0x4e2   : > { %7844 = vmatprep.subr.bf16.mxu1 %v8619_v54 }
 0x4e5   : > { %7845 = vmatpush3.bf16.msra.mxu1 %v8619_v54 }
 0x4e6   : > { %7846 = vmatprep.subr.bf16.mxu1 %v8620_v35 }
 0x4e8   : > { %7815 = vmatmul.mubr.bf16.gmra.mrb[4].mxu1 %v9918_v61  ;;  %v8625_v61 = vld [vmem:[%s10606_s3 + $0x238] sm:$0xff]  }
 0x4e9   : > { %7818 = vmatprep.mubr.bf16.mxu1 %v9915_v43  ;;  %7847 = vmatpush3.bf16.msra.mxu1 %v8620_v35  ;;  %v8624_v43 = vld [vmem:[%s10606_s3 + $0x230] sm:$0xff]  }
 0x4ea   : > { %7848 = vmatprep.subr.bf16.mxu1 %v8621_v38 }
 0x4ed   : > { %7849 = vmatpush3.bf16.msra.mxu1 %v8621_v38 }
 0x4ee   : > { %7850 = vmatprep.subr.bf16.mxu1 %v8622_v34 }
 0x4f0   : > { %7819 = vmatmul.mubr.bf16.gmra.mrb[8].mxu1 %v9975_v56  ;;  %v5301_v56 = vrot.slane %v10207_v31, 1 }
 0x4f1   : > { %7822 = vmatprep.mubr.bf16.mxu1 %v9972_v41  ;;  %7851 = vmatpush3.bf16.msra.mxu1 %v8622_v34  ;;  %v3215_v41 = vld [vmem:[#allocation2 + $0x1a8] sm:$0x3] }
 0x4f2   : > { %7852 = vmatprep.subr.bf16.mxu1 %v8623_v5  ;;  %v5304_v39 = vrot.slane %v3215_v41, 1 }
 0x4f5   : > { %7853 = vmatpush3.bf16.msra.mxu1 %v8623_v5 }
 0x4f6   : > { %7854 = vmatprep.subr.bf16.mxu1 %v8624_v43 }
 0x4f8   : > { %7823 = vmatmul.mubr.bf16.gmra.mrb[12].mxu1 %v10034_v36  ;;  %v5305_v36 = vsel %vm465_vm0, %v5301_v56, %v5304_v39 }
 0x4f9   : > { %7826 = vmatprep.mubr.bf16.mxu1 %v10734_v48  ;;  %7855 = vmatpush3.bf16.msra.mxu1 %v8624_v43  ;;  %v5308_v32 = vpack.c.bf16 %v5305_v36, %v5301_v56 }
 0x4fa   : > { %7856 = vmatprep.subr.bf16.mxu1 %v8625_v61 }
 0x4fd   : > { %7857 = vmatpush3.bf16.msra.mxu1 %v8625_v61 }
 0x500   : > { %7827 = vmatmul.mubr.bf16.gmra.mrb[16].mxu1 %v10735_v55 }
 0x501   : > { %7830 = vmatprep.mubr.bf16.mxu1 %v10736_v23 }
 0x508   : > { %7831 = vmatmul.mubr.bf16.gmra.mrb[20].mxu1 %v10120_v4 }
 0x509   : > { %7834 = vmatprep.mubr.bf16.mxu1 %v10117_v16 }
 0x510   : > { %7835 = vmatmul.mubr.bf16.gmra.mrb[24].mxu1 %v10154_v26  ;;  %v8657_v26 = vld [vmem:[#allocation2 + $0x19] sm:$0xff] }
 0x511   : > { %7838 = vmatprep.mubr.bf16.mxu1 %v10345_v0 }
 0x518   : > { %7839 = vmatmul.mubr.bf16.gmra.mrb[28].mxu1 %v5308_v32 }
 0x519   : > { %7858 = vmatprep.mubr.bf16.mxu1 %v9855_v2  ;;  %v5570_v2 = vrot.slane %v3215_v41, 2 }
 0x520   : > { %7859 = vmatmul.mubr.bf16.vlgmr.msra.gmra.mrb[0].mxu1 %v9899_v11  ;;  %v5571_v11 = vsel %vm1029_vm1, %v10210_v22, %v5570_v2 }
 0x521   : > { %7862 = vmatprep.mubr.bf16.mxu1 %v9927_v60  ;;  %v5574_v60 = vpack.c.bf16 %v5571_v11, %v10210_v22  ;;  %v8659_v22 = vld [vmem:[#allocation2 + $0x21] sm:$0xff]  ;;  %v8665_v11 = vld [vmem:[#allocation2 + $0x79] sm:$0xff] }
 0x528   : > { %7863 = vmatmul.mubr.bf16.gmra.mrb[4].mxu1 %v9967_v14  ;;  %v8626_v14 = vld [vmem:[%s10608_s5] sm:$0xff]  }
 0x529   : > { %7866 = vmatprep.mubr.bf16.mxu1 %v10015_v21  ;;  %7891 = vmatpush3.bf16.msra.mxu0 %v8626_v14  ;;  %v8627_v21 = vld [vmem:[%s10608_s5 + $0x8] sm:$0xff]  }
 0x52a   : > { %7892 = vmatprep.subr.bf16.mxu0 %v10207_v31 }
 0x52d   : > { %7893 = vmatpush3.bf16.msra.mxu0 %v8627_v21  ;;  %v8666_v21 = vld [vmem:[#allocation2 + $0x91] sm:$0xff] }
 0x52e   : > { %7894 = vmatprep.subr.bf16.mxu0 %v10207_v31 }
 0x530   : > { %7867 = vmatmul.mubr.bf16.gmra.mrb[8].mxu1 %v10037_v29  ;;  %v8628_v29 = vld [vmem:[%s10608_s5 + $0x10] sm:$0xff]  }
 0x531   : > { %7870 = vmatprep.mubr.bf16.mxu1 %v10075_v10  ;;  %7895 = vmatpush3.bf16.msra.mxu0 %v8628_v29  ;;  %v8630_v10 = vld [vmem:[%s10608_s5 + $0x20] sm:$0xff]  }
 0x532   : > { %7896 = vmatprep.subr.bf16.mxu0 %v10207_v31 }
 0x535   : > { %7897 = vmatpush3.bf16.msra.mxu0 %v8629_v20 }
 0x536   : > { %7898 = vmatprep.subr.bf16.mxu0 %v10207_v31 }
 0x538   : > { %7871 = vmatmul.mubr.bf16.gmra.mrb[12].mxu1 %v10100_v12  ;;  %v8631_v12 = vld [vmem:[%s10608_s5 + $0x28] sm:$0xff]  }
 0x539   : > { %7874 = vmatprep.mubr.bf16.mxu1 %v10109_v62  ;;  %7899 = vmatpush3.bf16.msra.mxu0 %v8630_v10  ;;  %v10519_v62 = vld [vmem:[%s10607_s4] ss:$0 sm:$0xff] }
 0x53a   : > { %7900 = vmatprep.subr.bf16.mxu0 %v10207_v31 }
 0x53d   : > { %7901 = vmatpush3.bf16.msra.mxu0 %v8631_v12  ;;  %v8667_v12 = vld [vmem:[#allocation2 + $0x81] sm:$0xff] }
 0x53e   : > { %7902 = vmatprep.subr.bf16.mxu0 %v10207_v31 }
 0x540   : > { %7875 = vmatmul.mubr.bf16.gmra.mrb[16].mxu1 %v10128_v30 }
 0x541   : > { %7878 = vmatprep.mubr.bf16.mxu1 %v10135_v8  ;;  %7903 = vmatpush3.bf16.msra.mxu0 %v8632_v50 }
 0x542   : > { %7904 = vmatprep.subr.bf16.mxu0 %v10207_v31 }
 0x545   : > { %7905 = vmatpush3.bf16.msra.mxu0 %v8633_v47  ;;  %v8668_v47 = vld [vmem:[#allocation2 + $0x99] sm:$0xff] }
 0x548   : > { %7879 = vmatmul.mubr.bf16.gmra.mrb[20].mxu1 %v10140_v19 }
 0x549   : > { %7882 = vmatprep.mubr.bf16.mxu1 %v10150_v45 }
 0x550   : > { %7883 = vmatmul.mubr.bf16.gmra.mrb[24].mxu1 %v10158_v28 }
 0x551   : > { %7886 = vmatprep.mubr.bf16.mxu1 %v10167_v3  ;;  %v8658_v3 = vld [vmem:[#allocation2 + $0x31] sm:$0xff] }
 0x558   : > { %7887 = vmatmul.mubr.bf16.gmra.mrb[28].mxu1 %v5574_v60 }
 0x5f3   : > { %v7860_v16 = vpop.f32.mrb[0].mxu1 }
 0x5f4   : > { %v5674_v4 = vpop.f32.mrb[1].mxu1  ;;  %v5842_v30 = vadd.f32 %v7860_v16, %v10519_v62 }
 0x5f5   : > { %v5840_v8 = vadd.f32 %v10519_v62, %v5674_v4  ;;  %v7861_v25 = vpop.f32.mrb[2].mxu1 }
 0x5f6   : > { %v5843_v19 = vadd.f32 %v7861_v25, %v10519_v62  ;;  %v5677_v45 = vpop.f32.mrb[3].mxu1  ;;  %v5874_v31 = vadd.f32 %v8658_v3, %v5842_v30 }
 0x5f7   : > { %v5872_v28 = vadd.f32 %v8657_v26, %v5840_v8  ;;  %v5841_v9 = vadd.f32 %v10519_v62, %v5677_v45 }
 0x5f8   : > { %v5875_v48 = vadd.f32 %v8660_v13, %v5843_v19  ;;  %v5906_v49 = vmax.f32 %v5874_v31, 0.0 }
 0x5f9   : > { %v5873_v1 = vadd.f32 %v8659_v22, %v5841_v9  ;;  %v5904_v55 = vmax.f32 %v5872_v28, 0.0 }
 0x5fa   : > { %v5907_v59 = vmax.f32 %v5875_v48, 0.0 }
 0x5fb   : > { %v5905_v23 = vmax.f32 %v5873_v1, 0.0  ;;  %v7864_v44 = vpop.f32.mrb[4].mxu1  ;;  %v8669_v1 = vld [vmem:[#allocation2 + $0xa9] sm:$0xff] }
 0x5fc   : > { %v5690_v51 = vpop.f32.mrb[5].mxu1  ;;  %v5846_v53 = vadd.f32 %v7864_v44, %v10519_v62 }
 0x5fd   : > { %v5936_v37 = vadd.f32 %v5905_v23, %v5904_v55  ;;  %v5844_v0 = vadd.f32 %v10519_v62, %v5690_v51  ;;  %v7865_v42 = vpop.f32.mrb[6].mxu1  ;;  %v8670_v23 = vld [vmem:[#allocation2 + $0xc1] sm:$0xff] }
 0x5fe   : > { %v5693_v6 = vpop.f32.mrb[7].mxu1  ;;  %v5847_v18 = vadd.f32 %v7865_v42, %v10519_v62  ;;  %v5878_v40 = vadd.f32 %v8662_v63, %v5846_v53  ;;  %v8672_v42 = vld [vmem:[#allocation2 + $0xc9] sm:$0xff] }
 0x5ff   : > { %v5937_v15 = vadd.f32 %v5936_v37, %v5906_v49  ;;  %v5876_v17 = vadd.f32 %v8661_v52, %v5844_v0  ;;  %v5845_v57 = vadd.f32 %v10519_v62, %v5693_v6  ;;  %v8671_v37 = vld [vmem:[#allocation2 + $0xb1] sm:$0xff] }
 0x600   : > { %v5879_v54 = vadd.f32 %v8664_v58, %v5847_v18  ;;  %v5910_v5 = vmax.f32 %v5878_v40, 0.0 }
 0x601   : > { %v5908_v7 = vmax.f32 %v5876_v17, 0.0  ;;  %v5938_v27 = vadd.f32 %v5937_v15, %v5907_v59  ;;  %v5877_v24 = vadd.f32 %v8663_v33, %v5845_v57 }
 0x602   : > { %v5911_v32 = vmax.f32 %v5879_v54, 0.0 }
 0x603   : > { %v5939_v46 = vadd.f32 %v5938_v27, %v5908_v7  ;;  %v5909_v35 = vmax.f32 %v5877_v24, 0.0  ;;  %v7868_v38 = vpop.f32.mrb[8].mxu1 }
 0x604   : > { %v5706_v34 = vpop.f32.mrb[9].mxu1  ;;  %v5850_v61 = vadd.f32 %v7868_v38, %v10519_v62 }
 0x605   : > { %v5940_v43 = vadd.f32 %v5939_v46, %v5909_v35  ;;  %v5848_v41 = vadd.f32 %v10519_v62, %v5706_v34  ;;  %v7869_v56 = vpop.f32.mrb[10].mxu1  ;;  %v8673_v46 = vld [vmem:[#allocation2 + $0xd9] sm:$0xff]  ;;  %v8674_v35 = vld [vmem:[#allocation2 + $0xf1] sm:$0xff] }
 0x606   : > { %v5851_v39 = vadd.f32 %v7869_v56, %v10519_v62  ;;  %v5709_v36 = vpop.f32.mrb[11].mxu1  ;;  %v5882_v29 = vadd.f32 %v8666_v21, %v5850_v61 }
 0x607   : > { %v5941_v2 = vadd.f32 %v5940_v43, %v5910_v5  ;;  %v5880_v60 = vadd.f32 %v8665_v11, %v5848_v41  ;;  %v5849_v14 = vadd.f32 %v10519_v62, %v5709_v36  ;;  %v8675_v43 = vld [vmem:[#allocation2 + $0xe1] sm:$0xff]  ;;  %v8676_v41 = vld [vmem:[#allocation2 + $0xf9] sm:$0xff] }
 0x608   : > { %v5883_v16 = vadd.f32 %v8668_v47, %v5851_v39  ;;  %v5914_v19 = vmax.f32 %v5882_v29, 0.0 }
 0x609   : > { %v5912_v20 = vmax.f32 %v5880_v60, 0.0  ;;  %v5942_v10 = vadd.f32 %v5941_v2, %v5911_v32  ;;  %v5881_v50 = vadd.f32 %v8667_v12, %v5849_v14 }
 0x60a   : > { %v5915_v3 = vmax.f32 %v5883_v16, 0.0 }
 0x60b   : > { %v5943_v4 = vadd.f32 %v5942_v10, %v5912_v20  ;;  %v5913_v30 = vmax.f32 %v5881_v50, 0.0  ;;  %v7872_v8 = vpop.f32.mrb[12].mxu1  ;;  %v8677_v50 = vld [vmem:[#allocation2 + $0x109] sm:$0xff] }
 0x60c   : > { %v5722_v25 = vpop.f32.mrb[13].mxu1  ;;  %v5854_v26 = vadd.f32 %v7872_v8, %v10519_v62 }
 0x60d   : > { %v5944_v45 = vadd.f32 %v5943_v4, %v5913_v30  ;;  %v5852_v28 = vadd.f32 %v10519_v62, %v5722_v25  ;;  %v7873_v9 = vpop.f32.mrb[14].mxu1  ;;  %v8678_v30 = vld [vmem:[#allocation2 + $0x121] sm:$0xff] }
 0x60e   : > { %v5725_v31 = vpop.f32.mrb[15].mxu1  ;;  %v5855_v48 = vadd.f32 %v7873_v9, %v10519_v62  ;;  %v5886_v44 = vadd.f32 %v8670_v23, %v5854_v26  ;;  %v8680_v9 = vld [vmem:[#allocation2 + $0x129] sm:$0xff] }
 0x60f   : > { %v5945_v22 = vadd.f32 %v5944_v45, %v5914_v19  ;;  %v5884_v13 = vadd.f32 %v8669_v1, %v5852_v28  ;;  %v5853_v55 = vadd.f32 %v10519_v62, %v5725_v31  ;;  %v8679_v45 = vld [vmem:[#allocation2 + $0x111] sm:$0xff] }
 0x610   : > { %v5887_v59 = vadd.f32 %v8672_v42, %v5855_v48  ;;  %v5918_v17 = vmax.f32 %v5886_v44, 0.0 }
 0x611   : > { %v5916_v51 = vmax.f32 %v5884_v13, 0.0  ;;  %v5946_v49 = vadd.f32 %v5945_v22, %v5915_v3  ;;  %v5885_v53 = vadd.f32 %v8671_v37, %v5853_v55 }
 0x612   : > { %v5919_v33 = vmax.f32 %v5887_v59, 0.0 }
 0x613   : > { %v5947_v0 = vadd.f32 %v5946_v49, %v5916_v51  ;;  %v5917_v6 = vmax.f32 %v5885_v53, 0.0  ;;  %v7876_v15 = vpop.f32.mrb[16].mxu1 }
 0x614   : > { %v5738_v52 = vpop.f32.mrb[17].mxu1  ;;  %v5858_v57 = vadd.f32 %v7876_v15, %v10519_v62 }
 0x615   : > { %v5948_v18 = vadd.f32 %v5947_v0, %v5917_v6  ;;  %v5856_v63 = vadd.f32 %v10519_v62, %v5738_v52  ;;  %v7877_v40 = vpop.f32.mrb[18].mxu1  ;;  %v8681_v0 = vld [vmem:[#allocation2 + $0x139] sm:$0xff]  ;;  %v8682_v6 = vld [vmem:[#allocation2 + $0x151] sm:$0xff] }
 0x616   : > { %v5859_v7 = vadd.f32 %v7877_v40, %v10519_v62  ;;  %v5741_v27 = vpop.f32.mrb[19].mxu1  ;;  %v5890_v38 = vadd.f32 %v8674_v35, %v5858_v57 }
 0x617   : > { %v5949_v24 = vadd.f32 %v5948_v18, %v5918_v17  ;;  %v5888_v58 = vadd.f32 %v8673_v46, %v5856_v63  ;;  %v5857_v54 = vadd.f32 %v10519_v62, %v5741_v27  ;;  %v8683_v18 = vld [vmem:[#allocation2 + $0x141] sm:$0xff]  ;;  %v8684_v63 = vld [vmem:[#allocation2 + $0x159] sm:$0xff] }
 0x618   : > { %v5891_v56 = vadd.f32 %v8676_v41, %v5859_v7  ;;  %v5922_v11 = vmax.f32 %v5890_v38, 0.0 }
 0x619   : > { %v5920_v34 = vmax.f32 %v5888_v58, 0.0  ;;  %v5950_v5 = vadd.f32 %v5949_v24, %v5919_v33  ;;  %v5889_v61 = vadd.f32 %v8675_v43, %v5857_v54 }
 0x61a   : > { %v5923_v20 = vmax.f32 %v5891_v56, 0.0 }
 0x61b   : > { %v5951_v39 = vadd.f32 %v5950_v5, %v5920_v34  ;;  %v5921_v36 = vmax.f32 %v5889_v61, 0.0  ;;  %v7880_v32 = vpop.f32.mrb[20].mxu1  ;;  %v8685_v61 = vld [vmem:[#allocation2 + $0x169] sm:$0xff] }
 0x61c   : > { %v5754_v2 = vpop.f32.mrb[21].mxu1  ;;  %v5862_v14 = vadd.f32 %v7880_v32, %v10519_v62 }
 0x61d   : > { %v5952_v60 = vadd.f32 %v5951_v39, %v5921_v36  ;;  %v5860_v21 = vadd.f32 %v10519_v62, %v5754_v2  ;;  %v7881_v29 = vpop.f32.mrb[22].mxu1  ;;  %v8686_v36 = vld [vmem:[#allocation2 + $0x181] sm:$0xff] }
 0x61e   : > { %v5757_v10 = vpop.f32.mrb[23].mxu1  ;;  %v5863_v16 = vadd.f32 %v7881_v29, %v10519_v62  ;;  %v5894_v8 = vadd.f32 %v8678_v30, %v5862_v14  ;;  %v8688_v29 = vld [vmem:[#allocation2 + $0x189] sm:$0xff] }
 0x61f   : > { %v5953_v12 = vadd.f32 %v5952_v60, %v5922_v11  ;;  %v5892_v47 = vadd.f32 %v8677_v50, %v5860_v21  ;;  %v5861_v4 = vadd.f32 %v10519_v62, %v5757_v10  ;;  %v8687_v60 = vld [vmem:[#allocation2 + $0x171] sm:$0xff] }
 0x620   : > { %v5895_v3 = vadd.f32 %v8680_v9, %v5863_v16  ;;  %v5926_v13 = vmax.f32 %v5894_v8, 0.0  ;;  %v5991_v9 = vld [vmem:[%s10609_s6] sm:$0x1] }
 0x621   : > { %v5924_v25 = vmax.f32 %v5892_v47, 0.0  ;;  %v5954_v19 = vadd.f32 %v5953_v12, %v5923_v20  ;;  %v5893_v26 = vadd.f32 %v8679_v45, %v5861_v4 }
 0x622   : > { %v5927_v37 = vmax.f32 %v5895_v3, 0.0 }
 0x623   : > { %v5955_v28 = vadd.f32 %v5954_v19, %v5924_v25  ;;  %v5925_v31 = vmax.f32 %v5893_v26, 0.0  ;;  %v7884_v22 = vpop.f32.mrb[24].mxu1 }
 0x624   : > { %v5770_v1 = vpop.f32.mrb[25].mxu1  ;;  %v5866_v55 = vadd.f32 %v7884_v22, %v10519_v62 }
 0x625   : > { %v5956_v48 = vadd.f32 %v5955_v28, %v5925_v31  ;;  %v5864_v23 = vadd.f32 %v10519_v62, %v5770_v1  ;;  %v7885_v44 = vpop.f32.mrb[26].mxu1 }
 0x626   : > { %v5867_v51 = vadd.f32 %v7885_v44, %v10519_v62  ;;  %v5773_v49 = vpop.f32.mrb[27].mxu1  ;;  %v5898_v15 = vadd.f32 %v8682_v6, %v5866_v55 }
 0x627   : > { %v5957_v53 = vadd.f32 %v5956_v48, %v5926_v13  ;;  %v5896_v42 = vadd.f32 %v8681_v0, %v5864_v23  ;;  %v5865_v59 = vadd.f32 %v10519_v62, %v5773_v49 }
 0x628   : > { %v5899_v40 = vadd.f32 %v8684_v63, %v5867_v51  ;;  %v5930_v46 = vmax.f32 %v5898_v15, 0.0 }
 0x629   : > { %v5928_v52 = vmax.f32 %v5896_v42, 0.0  ;;  %v5958_v17 = vadd.f32 %v5957_v53, %v5927_v37  ;;  %v5897_v57 = vadd.f32 %v8683_v18, %v5865_v59 }
 0x62a   : > { %v5931_v34 = vmax.f32 %v5899_v40, 0.0 }
 0x62b   : > { %v5959_v7 = vadd.f32 %v5958_v17, %v5928_v52  ;;  %v5929_v27 = vmax.f32 %v5897_v57, 0.0  ;;  %v7888_v33 = vpop.f32.mrb[28].mxu1 }
 0x62c   : > { %v5786_v24 = vpop.f32.mrb[29].mxu1  ;;  %v5870_v54 = vadd.f32 %v7888_v33, %v10519_v62 }
 0x62d   : > { %v5960_v58 = vadd.f32 %v5959_v7, %v5929_v27  ;;  %v5868_v35 = vadd.f32 %v10519_v62, %v5786_v24  ;;  %v7889_v38 = vpop.f32.mrb[30].mxu1 }
 0x62e   : > { %v5789_v5 = vpop.f32.mrb[31].mxu1  ;;  %v5871_v56 = vadd.f32 %v7889_v38, %v10519_v62  ;;  %v5902_v32 = vadd.f32 %v8686_v36, %v5870_v54 }
 0x62f   : > { %v5961_v43 = vadd.f32 %v5960_v58, %v5930_v46  ;;  %v5900_v41 = vadd.f32 %v8685_v61, %v5868_v35  ;;  %v5869_v39 = vadd.f32 %v10519_v62, %v5789_v5 }
 0x630   : > { %v5903_v20 = vadd.f32 %v8688_v29, %v5871_v56  ;;  %v5934_v12 = vmax.f32 %v5902_v32, 0.0 }
 0x631   : > { %v5932_v2 = vmax.f32 %v5900_v41, 0.0  ;;  %v5962_v11 = vadd.f32 %v5961_v43, %v5931_v34  ;;  %v5901_v14 = vadd.f32 %v8687_v60, %v5869_v39 }
 0x632   : > { %v5935_v47 = vmax.f32 %v5903_v20, 0.0 }
 0x633   : > { %v5963_v21 = vadd.f32 %v5962_v11, %v5932_v2  ;;  %v5933_v10 = vmax.f32 %v5901_v14, 0.0 }
 0x635   : > { %v5964_v50 = vadd.f32 %v5963_v21, %v5933_v10 }
 0x637   : > { %v5965_v16 = vadd.f32 %v5964_v50, %v5934_v12 }
 0x639   : > { %v5966_v4 = vadd.f32 %v5965_v16, %v5935_v47 }
 0x63b   : > { %v5967_v30 = vrot.slane %v5966_v4, 4 }
 0x63d   : > { %v5968_v8 = vadd.f32 %v5967_v30, %v5966_v4 }
 0x63f   : > { %v5969_v62 = vrot.slane %v5968_v8, 2 }
 0x641   : > { %v5970_v25 = vadd.f32 %v5969_v62, %v5968_v8 }
 0x643   : > { %v5971_v19 = vrot.slane %v5970_v25, 1 }
 0x645   : > { %v5972_v45 = vadd.f32 %v5971_v19, %v5970_v25 }
 0x647   : > { %v5973_v26 = vmul.f32 0.00390625, %v5972_v45 }
 0x649   : > { %v5974_v28 = vpack.c.bf16 %v5973_v26, %v5973_v26 }
 0x64b   : > { %7907 = vmatmul.mubr.bf16.vlgmr.msra.gmra.mrb[32].mxu0 %v5974_v28 }
 0x71e   : > { %v6074_v3 = vpop.f32.mrb[32].mxu0 }
 0x71f   : > { %v6075_v31 = vadd.f32 %v6074_v3, %v5991_v9  ;;  %v7908_v22 = vpop.f32.mrb[33].mxu0 }
 0x720   : > { %v6077_v1 = vpop.f32.mrb[34].mxu0 }
 0x721   : > { %6080 = vst [vmem:[%s270_s17] sm:$0x1] %v6075_v31  ;;  %v7909_v13 = vpop.f32.mrb[35].mxu0 }
 0x722   : > { %8702 = shalt.err (!%p8699_p3)
}
 0x723   : > { %s8703_s9 = scalar_lea.hbm %s10561_s20, 16  ;;  %s8707_s15 = scalar_lea.hbm %s10610_s7, 32 }
 0x724   : > { %p8704_p4 = scmp.ne.s32.totalorder %s10561_s20, %s8703_s9  ;;  %p8708_p9 = scmp.lt.u32.totalorder %s10561_s20, %s10610_s7 }
 0x725   : > { %p8709_p10 = scmp.lt.u32.totalorder %s8707_s15, %s8703_s9  ;;  %p8711_p12 = scmp.lt.u32.totalorder %s8703_s9, %s10561_s20 }
 0x726   : > { %p8705_p7 = pnand %p8704_p4, %p8835_p5 }
 0x727   : > { %p8710_p11 = por %p8709_p10, %p8708_p9 }
 0x728   : > { %p8706_p8 = pneg %p8705_p7 }
 0x729   : > { %p8712_p13 = por %p8711_p12, %p8710_p11 }
 0x72b   : > { %p8713_p0 = pnand %p8712_p13, %p8706_p8 }
 0x72d   : > { %8716 = shalt.err (!%p8713_p0)
}
 0x72e   : > { %8423 = dma.vmem_to_hbm [thread:$0]  (%p8835_p5), %s10563_s23, 16, %s10561_s20, %s6082_s21  }
 0x72f PF: > { %p8429_p1 = scmp.ge.s32.totalorder %s8751_s27, 2  ;;  %s6106_s18 = sand.u32 1, %s8739_s24  }
 0x730   : > { %s6107_s19 = scalar_lea.sflag [#allocation4], %s6106_s18 }
 0x731   : > { %p8426_p2 = pnand %p8429_p1, %p8839_p6 }
 0x733   : > { %8734 = dma.done.wait (!%p8426_p2), %s6107_s19, 16  }
 0x734   : > { %8736 = vsyncadd (!%p8426_p2), %s6107_s19, 4294967280  ;;  %p17_p3 = scmp.ge.s32.totalorder %s8822_s30, 4   ;;  %s10737_s24 = smov %s8743_s25 }
 0x735   : > { %s10738_s25 = smov %s8747_s26  ;;  %s10739_s26 = smov %s8833_s10 }
 0x736   : > { %s10740_s27 = smov %s8822_s30  ;;  %19 = sbr.rel (!%p17_p3) target bundleno = 3 (0x3), region = 100 }
 0x73d   :  { %6111 = vsyncpa [#allocation4], 1 }
 0x73e   :  { %6113 = vsyncpa [#allocation4 + $0x1], 1 }

</bundles_post_ra>
